<compile_context>
chip_gen: v7x
topology: tpu7x:2x2x1
jax: 0.10.0
libtpu: 0.0.40
codegen_flags: <defaults>
</compile_context>

<pallas_src>
import numpy as np
import jax
import jax.numpy as jnp
from jax.experimental import pallas as pl
from jax.experimental.pallas import tpu as pltpu


NB = 4  # branches, in module output order: nc, in, ec, ie


# ----------------------------------------------------------------------------
# Fused, batched kernel
# ----------------------------------------------------------------------------
def make_kernel(P, Lmax, T, B1, B2, B3, woff, out_w):
    """P = pairs per grid step; Lmax = padded label width (D = 2*Lmax)."""
    G = 4 * P  # graphs per step (4 graph slots per pair)

    def kernel(avg_ref, adj_ref, feat_ref, w_ref, b_ref, out_ref):
        f32 = jnp.float32

        def wmat(name):
            o, r, c = woff[name]
            return w_ref[o:o + r, 0:c]

        nmax = adj_ref.shape[2]
        wfeat = feat_ref.shape[3]

        # ---- GraphAggregationLayer x2 for all 4*P graphs (batched MXU) ------
        adj = adj_ref[...].reshape(G, nmax, nmax)     # slot-major: g = s*P + p
        feat = feat_ref[...].reshape(G, nmax, wfeat)  # lane-placed per slot
        h1 = jnp.einsum('gnm,gml->gnl', adj, feat, preferred_element_type=f32)
        h2 = jnp.einsum('gnm,gml->gnl', adj, h1, preferred_element_type=f32)

        # ---- column-sum pooling (3 reductions) + slot merge (lane-disjoint) -
        p0 = jnp.sum(feat, axis=1)                    # (G, 16)
        p1 = jnp.sum(h1, axis=1)
        p2 = jnp.sum(h2, axis=1)

        def slot_sum(x):                              # (G,16) -> (P,16)
            return x[0:P] + x[P:2 * P] + x[2 * P:3 * P] + x[3 * P:4 * P]

        l0, l1, l2 = slot_sum(p0), slot_sum(p1), slot_sum(p2)

        # ---- lane-dense per-pair embedding ECAT = [e1cat | e2cat]  (P, 64) --
        ecat = (jnp.dot(l0, wmat('pl0'), preferred_element_type=f32)
                + jnp.dot(l1, wmat('pl1'), preferred_element_type=f32)
                + jnp.dot(l2, wmat('pl2'), preferred_element_type=f32))

        # ---- TensorNetworkModule: bilinear via MXU replication matmuls ------
        o1 = jnp.dot(ecat, wmat('rep1'), preferred_element_type=f32)  # (P,256)
        o2 = jnp.dot(ecat, wmat('rep2'), preferred_element_type=f32)  # (P,256)
        tnet = jnp.dot(o1 * o2, wmat('wflat'), preferred_element_type=f32)
        blk = jnp.dot(ecat, wmat('wbt'), preferred_element_type=f32)  # fused

        s = jnp.maximum(tnet + blk + b_ref[0:1, 0:NB * T], 0.0)       # (P,64)

        # ---- 4-layer MLP head, block-diagonal over the 4 branches -----------
        s = jnp.maximum(jnp.dot(s, wmat('w1'), preferred_element_type=f32)
                        + b_ref[1:2, 0:NB * B1], 0.0)
        s = jnp.maximum(jnp.dot(s, wmat('w2'), preferred_element_type=f32)
                        + b_ref[2:3, 0:NB * B2], 0.0)
        s = jnp.maximum(jnp.dot(s, wmat('w3'), preferred_element_type=f32)
                        + b_ref[3:4, 0:NB * B3], 0.0)
        scores = jax.nn.sigmoid(jnp.dot(s, wmat('ws'),
                                        preferred_element_type=f32)
                                + b_ref[4:5, 0:NB])                    # (P,4)

        # ---- target_mode == 'exp' glue ---------------------------------------
        avg = avg_ref[...]                                             # (P,1)
        ged = -avg * jnp.sum(jnp.log(scores), axis=1, keepdims=True)   # (P,1)
        sim = jnp.exp(-ged / avg)                                      # (P,1)
        pad = jnp.zeros((P, out_w - NB - 2), dtype=f32)
        out_ref[...] = jnp.concatenate([scores, ged, sim, pad], axis=1)

    return kernel


def build_forward(woff, *, P, Nmax, Lmax, T, B1, B2, B3, out_w=8):
    kernel = make_kernel(P, Lmax, T, B1, B2, B3, woff, out_w)
    Wfeat = 4 * Lmax

    @jax.jit
    def run(avg_all, adj_all, feat_all, wslab, bslab):
        B = avg_all.shape[0]
        return pl.pallas_call(
            kernel,
            out_shape=jax.ShapeDtypeStruct((B, out_w), jnp.float32),
            grid=(B // P,),
            in_specs=[
                pl.BlockSpec((P, 1), lambda i: (i, 0)),
                pl.BlockSpec((4, P, Nmax, Nmax), lambda i: (0, i, 0, 0)),
                pl.BlockSpec((4, P, Nmax, Wfeat), lambda i: (0, i, 0, 0)),
                # constant block index -> weights DMA'd once, VMEM-resident
                pl.BlockSpec(wslab.shape, lambda i: (0, 0)),
                pl.BlockSpec(bslab.shape, lambda i: (0, 0)),
            ],
            out_specs=pl.BlockSpec((P, out_w), lambda i: (i, 0)),
            compiler_params=pltpu.CompilerParams(
                dimension_semantics=("parallel",)),
        )(avg_all, adj_all, feat_all, wslab, bslab)

    def forward(avg_all, adj_all, feat_all, wslab, bslab):
        B = avg_all.shape[0]
        Bp = -(-B // P) * P
        if Bp != B:  # pad with dummy pairs, slice back after
            padn = Bp - B
            avg_all = jnp.concatenate(
                [avg_all, jnp.ones((padn, 1), jnp.float32)], axis=0)
            adj_all = jnp.concatenate(
                [adj_all, jnp.zeros((4, padn, Nmax, Nmax), jnp.float32)], axis=1)
            feat_all = jnp.concatenate(
                [feat_all, jnp.zeros((4, padn, Nmax, Wfeat), jnp.float32)], axis=1)
        out = run(avg_all, adj_all, feat_all, wslab, bslab)
        return out[:B]

    return forward


# ----------------------------------------------------------------------------
# Host-side parameter init and packing (glue, no runtime cost)
# ----------------------------------------------------------------------------
def init_linear(key, fin, fout):
    k1, k2 = jax.random.split(key)
    bound = 1.0 / np.sqrt(fin)
    w = jax.random.uniform(k1, (fin, fout), jnp.float32, -bound, bound)
    b = jax.random.uniform(k2, (1, fout), jnp.float32, -bound, bound)
    return w, b


def init_branch(key, L, T, B1, B2, B3):
    D = 2 * L
    ks = jax.random.split(key, 7)
    W = jax.random.uniform(ks[0], (D, D, T), jnp.float32, -0.1, 0.1)
    Wb = jax.random.uniform(ks[1], (T, 2 * D), jnp.float32, -0.1, 0.1)
    bias = jax.random.uniform(ks[2], (T, 1), jnp.float32, -0.1, 0.1)
    w1, b1 = init_linear(ks[3], T, B1)
    w2, b2 = init_linear(ks[4], B1, B2)
    w3, b3 = init_linear(ks[5], B2, B3)
    ws, bs = init_linear(ks[6], B3, 1)
    return dict(L=L, W=W, Wb=Wb, bias=bias,
                w1=w1, b1=b1, w2=w2, b2=b2, w3=w3, b3=b3, ws=ws, bs=bs)


def _block_diag(blocks):
    rows = sum(b.shape[0] for b in blocks)
    cols = sum(b.shape[1] for b in blocks)
    out = np.zeros((rows, cols), np.float32)
    r = c = 0
    for b in blocks:
        out[r:r + b.shape[0], c:c + b.shape[1]] = b
        r += b.shape[0]
        c += b.shape[1]
    return out


def build_placement(Lmax):
    """PL_k: (16,64) level-k placement into ECAT; REP1/REP2: (64,256) outer."""
    D = 2 * Lmax
    WL = 4 * Lmax              # width of pooled level arrays L_k
    E = 2 * NB * D             # ECAT width = 64
    # branch -> (e1 graph slot, e2 graph slot, level of 1st half, 2nd half)
    branch_src = [(0, 1, 0, 1),   # nc : graph1/graph2, levels (0,1)
                  (0, 1, 0, 1),   # in
                  (2, 3, 0, 1),   # ec : edge graphs,   levels (0,1)
                  (0, 1, 1, 2)]   # ie : graph1/graph2, levels (1,2)
    PL = np.zeros((3, WL, E), np.float32)
    for b, (s1, s2, la, lb) in enumerate(branch_src):
        for l in range(Lmax):
            PL[la, s1 * Lmax + l, D * b + l] = 1.0
            PL[lb, s1 * Lmax + l, D * b + Lmax + l] = 1.0
            PL[la, s2 * Lmax + l, NB * D + D * b + l] = 1.0
            PL[lb, s2 * Lmax + l, NB * D + D * b + Lmax + l] = 1.0
    REP1 = np.zeros((E, NB * D * D), np.float32)
    REP2 = np.zeros((E, NB * D * D), np.float32)
    for b in range(NB):
        for i in range(D):
            for j in range(D):
                col = b * D * D + i * D + j
                REP1[b * D + i, col] = 1.0
                REP2[NB * D + b * D + j, col] = 1.0
    return PL, REP1, REP2


def pack_params(branches, Lmax, T, B1, B2, B3):
    """Pack the 4 branches + placement matrices into one weight slab + biases."""
    D = 2 * Lmax
    PL, REP1, REP2 = build_placement(Lmax)

    wflat_b, wbt1_b, wbt2_b = [], [], []
    w1b, w2b, w3b, wsb = [], [], [], []
    btn, b1, b2, b3, bs = [], [], [], [], []
    for prm in branches:
        L = prm['L']
        # map original pooled-embedding index -> padded (D = 2*Lmax) index
        m = np.array([i if i < L else i - L + Lmax for i in range(2 * L)])
        W = np.asarray(prm['W'], np.float32)
        Wb = np.asarray(prm['Wb'], np.float32)
        Wpad = np.zeros((D, D, T), np.float32)
        Wpad[np.ix_(m, m)] = W
        Wbpad = np.zeros((T, 2 * D), np.float32)
        Wbpad[:, np.concatenate([m, D + m])] = Wb
        wflat_b.append(Wpad.reshape(D * D, T))        # [i*D+j, t] = W[i,j,t]
        wbt1_b.append(Wbpad[:, :D].T)
        wbt2_b.append(Wbpad[:, D:].T)
        w1b.append(np.asarray(prm['w1'], np.float32))
        w2b.append(np.asarray(prm['w2'], np.float32))
        w3b.append(np.asarray(prm['w3'], np.float32))
        wsb.append(np.asarray(prm['ws'], np.float32))
        btn.append(np.asarray(prm['bias'], np.float32).T)
        b1.append(np.asarray(prm['b1'], np.float32))
        b2.append(np.asarray(prm['b2'], np.float32))
        b3.append(np.asarray(prm['b3'], np.float32))
        bs.append(np.asarray(prm['bs'], np.float32))

    mats = {
        'pl0': PL[0], 'pl1': PL[1], 'pl2': PL[2],
        'rep1': REP1, 'rep2': REP2,
        'wflat': _block_diag(wflat_b),
        'wbt': np.concatenate([_block_diag(wbt1_b), _block_diag(wbt2_b)], 0),
        'w1': _block_diag(w1b), 'w2': _block_diag(w2b),
        'w3': _block_diag(w3b), 'ws': _block_diag(wsb),
    }
    lane = -(-max(v.shape[1] for v in mats.values()) // 128) * 128    # 256
    woff, slab_rows, cur = {}, [], 0
    for name, mat in mats.items():
        r, c = mat.shape
        rp = -(-r // 8) * 8                                           # sublane align
        padded = np.zeros((rp, lane), np.float32)
        padded[:r, :c] = mat
        slab_rows.append(padded)
        woff[name] = (cur, r, c)
        cur += rp
    wslab = np.concatenate(slab_rows, axis=0)                         # (672, 256)

    bvecs = [np.concatenate(v, axis=1) for v in (btn, b1, b2, b3, bs)]
    bslab = np.zeros((8, 64), np.float32)
    for i, vec in enumerate(bvecs):
        bslab[i, :vec.shape[1]] = vec[0]
    return jnp.asarray(wslab), jnp.asarray(bslab), woff


def pack_pairs(pair_list, Nmax, Lmax):
    """Stack B pairs: slot-major graphs, features lane-placed per slot."""
    B = len(pair_list)
    adj_all = np.zeros((4, B, Nmax, Nmax), np.float32)
    feat_all = np.zeros((4, B, Nmax, 4 * Lmax), np.float32)
    avg_all = np.zeros((B, 1), np.float32)
    names = [('adj1', 'emb1'), ('adj2', 'emb2'),
             ('edge_adj1', 'edge_attr1'), ('edge_adj2', 'edge_attr2')]
    for p, data in enumerate(pair_list):
        for s, (ak, fk) in enumerate(names):
            a = np.asarray(data[ak], np.float32)
            f = np.asarray(data[fk], np.float32)
            n, l = f.shape
            adj_all[s, p, :n, :n] = a
            feat_all[s, p, :n, s * Lmax:s * Lmax + l] = f
        avg_all[p, 0] = float(data['avg_v'])
    return jnp.asarray(adj_all), jnp.asarray(feat_all), jnp.asarray(avg_all)


# ----------------------------------------------------------------------------
# Pure-JAX reference (mirrors the PyTorch column-vector math) for validation
# ----------------------------------------------------------------------------
def _ref_branch(p1_col, p2_col, prm):
    D = p1_col.shape[0]
    W, Wb, bias = prm['W'], prm['Wb'], prm['bias']
    T = W.shape[2]
    scoring = (p1_col.T @ W.reshape(D, -1)).reshape(D, T)
    scoring = scoring.T @ p2_col
    block = Wb @ jnp.concatenate([p1_col, p2_col], axis=0)
    s = jax.nn.relu(scoring + block + bias).T
    s = jax.nn.relu(s @ prm['w1'] + prm['b1'])
    s = jax.nn.relu(s @ prm['w2'] + prm['b2'])
    s = jax.nn.relu(s @ prm['w3'] + prm['b3'])
    return jax.nn.sigmoid(s @ prm['ws'] + prm['bs'])


def _ref_forward(data, branches, avg_v):
    def gal(adj, feat):
        h1 = adj @ feat
        return h1, adj @ h1

    g1h1, g1h2 = gal(data['adj1'], data['emb1'])
    g2h1, g2h2 = gal(data['adj2'], data['emb2'])
    e1h1, _ = gal(data['edge_adj1'], data['edge_attr1'])
    e2h1, _ = gal(data['edge_adj2'], data['edge_attr2'])
    cat = lambda a, b: jnp.sum(jnp.concatenate([a, b], axis=1), axis=0)[:, None]
    g1_01, g2_01 = cat(data['emb1'], g1h1), cat(data['emb2'], g2h1)
    g1_12, g2_12 = cat(g1h1, g1h2), cat(g2h1, g2h2)
    e1_01, e2_01 = cat(data['edge_attr1'], e1h1), cat(data['edge_attr2'], e2h1)
    pairs = [(g1_01, g2_01), (g1_01, g2_01), (e1_01, e2_01), (g1_12, g2_12)]
    scores = [_ref_branch(p1, p2, prm).reshape(-1)
              for (p1, p2), prm in zip(pairs, branches)]
    score = jnp.concatenate(scores)               # [nc, in, ec, ie]
    pre_ged = jnp.sum(-jnp.log(score) * avg_v)
    pre_sim = jnp.exp(-pre_ged / avg_v)
    return pre_sim, pre_ged, score


# ----------------------------------------------------------------------------
if __name__ == "__main__":
    key = jax.random.PRNGKey(0)
    Ln, Le = 4, 3              # number_of_node_labels / number_of_edge_labels
    T = 16                     # args.tensor_neurons
    B1, B2, B3 = 16, 8, 4      # args.reg_neurons = "16-8-4"
    Lmax = max(Ln, Le)
    Nmax = 16                  # padded node / edge count per graph
    Bpairs = 16                # batch of graph pairs
    P = 8                      # pairs per grid step (sublane rows)

    kparam, kdata = jax.random.split(key)

    # branch order == module output order: nc, in, ec, ie
    bkeys = jax.random.split(kparam, 4)
    branches = [init_branch(bkeys[0], Ln, T, B1, B2, B3),
                init_branch(bkeys[1], Ln, T, B1, B2, B3),
                init_branch(bkeys[2], Le, T, B1, B2, B3),
                init_branch(bkeys[3], Ln, T, B1, B2, B3)]
    wslab, bslab, woff = pack_params(branches, Lmax, T, B1, B2, B3)

    def onehot(k, n, c):
        return jax.nn.one_hot(jax.random.randint(k, (n,), 0, c), c,
                              dtype=jnp.float32)

    def rand_adj(k, n):
        a = (jax.random.uniform(k, (n, n)) < 0.4).astype(jnp.float32)
        a = jnp.triu(a, 1)
        return a + a.T + jnp.eye(n, dtype=jnp.float32)

    pair_list = []
    pkeys = jax.random.split(kdata, Bpairs)
    for p in range(Bpairs):
        ks = jax.random.split(pkeys[p], 12)
        N1 = int(jax.random.randint(ks[8], (), 6, 13))
        N2 = int(jax.random.randint(ks[9], (), 6, 13))
        E1 = int(jax.random.randint(ks[10], (), 5, 15))
        E2 = int(jax.random.randint(ks[11], (), 5, 15))
        pair_list.append({
            'emb1': onehot(ks[0], N1, Ln), 'emb2': onehot(ks[1], N2, Ln),
            'edge_attr1': onehot(ks[2], E1, Le), 'edge_attr2': onehot(ks[3], E2, Le),
            'adj1': rand_adj(ks[4], N1), 'adj2': rand_adj(ks[5], N2),
            'edge_adj1': rand_adj(ks[6], E1), 'edge_adj2': rand_adj(ks[7], E2),
            'avg_v': 0.5 * (N1 + N2),
        })

    adj_all, feat_all, avg_all = pack_pairs(pair_list, Nmax, Lmax)

    forward = build_forward(woff, P=P, Nmax=Nmax, Lmax=Lmax,
                            T=T, B1=B1, B2=B2, B3=B3)
    out = jax.block_until_ready(
        forward(avg_all, adj_all, feat_all, wslab, bslab))     # (Bpairs, 8)

    # --- validate every pair against the pure-JAX reference ------------------
    for p, data in enumerate(pair_list):
        r_sim, r_ged, r_score = _ref_forward(data, branches,
                                             jnp.float32(data['avg_v']))
        np.testing.assert_allclose(np.asarray(out[p, :NB]), np.asarray(r_score),
                                   rtol=1e-4, atol=1e-5)
        np.testing.assert_allclose(float(out[p, NB]), float(r_ged),
                                   rtol=1e-4, atol=1e-5)
        np.testing.assert_allclose(float(out[p, NB + 1]), float(r_sim),
                                   rtol=1e-4, atol=1e-5)

    print("KERNEL_OK")
</pallas_src>

<mosaic_0001>
module attributes {stable_mosaic.version = 11 : i64} {
  func.func @kernel(%arg0: i32, %arg1: memref<8x1xf32, #tpu.memory_space<vmem>>, %arg2: memref<4x8x16x16xf32, #tpu.memory_space<vmem>>, %arg3: memref<4x8x16x16xf32, #tpu.memory_space<vmem>>, %arg4: memref<672x256xf32, #tpu.memory_space<vmem>>, %arg5: memref<8x64xf32, #tpu.memory_space<vmem>>, %arg6: memref<8x8xf32, #tpu.memory_space<vmem>>) attributes {dimension_semantics = [#tpu.dimension_semantics<parallel>], iteration_bounds = array<i64: 2>, scalar_prefetch = 0 : i64, scratch_operands = 0 : i64, tpu.core_type = #tpu.core_type<tc>, window_params = [{transform_indices = @transform_0, window_bounds = array<i64: 8, 1>}, {transform_indices = @transform_1, window_bounds = array<i64: 4, 8, 16, 16>}, {transform_indices = @transform_2, window_bounds = array<i64: 4, 8, 16, 16>}, {pipeline_mode = #tpu.pipeline_mode<synchronous>, transform_indices = @transform_3, window_bounds = array<i64: 672, 256>}, {pipeline_mode = #tpu.pipeline_mode<synchronous>, transform_indices = @transform_4, window_bounds = array<i64: 8, 64>}, {transform_indices = @transform_5, window_bounds = array<i64: 8, 8>}]} {
    %c0 = arith.constant 0 : index
    %c0_0 = arith.constant 0 : index
    %c0_1 = arith.constant 0 : index
    %c0_2 = arith.constant 0 : index
    %0 = vector.load %arg2[%c0, %c0_0, %c0_1, %c0_2] : memref<4x8x16x16xf32, #tpu.memory_space<vmem>>, vector<4x8x16x16xf32>
    %1 = vector.shape_cast %0 : vector<4x8x16x16xf32> to vector<32x16x16xf32>
    %c0_3 = arith.constant 0 : index
    %c0_4 = arith.constant 0 : index
    %c0_5 = arith.constant 0 : index
    %c0_6 = arith.constant 0 : index
    %2 = vector.load %arg3[%c0_3, %c0_4, %c0_5, %c0_6] : memref<4x8x16x16xf32, #tpu.memory_space<vmem>>, vector<4x8x16x16xf32>
    %3 = vector.shape_cast %2 : vector<4x8x16x16xf32> to vector<32x16x16xf32>
    "tpu.trace_start"() <{level = 10 : i32, message = "gnm,gml->gnl"}> : () -> ()
    %cst = arith.constant dense<0.000000e+00> : vector<32x16x16xf32>
    %4 = tpu.matmul %1, %3, %cst {dimension_numbers = #tpu.dot_dimension_numbers<[2], [1], [1], [2], [0, 0, 0, 1, 1, 2], [0], [0]>} : vector<32x16x16xf32>, vector<32x16x16xf32>, vector<32x16x16xf32> -> vector<32x16x16xf32>
    %cst_7 = arith.constant dense<0.000000e+00> : vector<32x16x16xf32>
    %5 = tpu.matmul %1, %4, %cst_7 {dimension_numbers = #tpu.dot_dimension_numbers<[2], [1], [1], [2], [0, 0, 0, 1, 1, 2], [0], [0]>} : vector<32x16x16xf32>, vector<32x16x16xf32>, vector<32x16x16xf32> -> vector<32x16x16xf32>
    "tpu.trace_stop"() : () -> ()
    %cst_8 = arith.constant dense<0.000000e+00> : vector<32x16xf32>
    %6 = vector.multi_reduction <add>, %3, %cst_8 [1] : vector<32x16x16xf32> to vector<32x16xf32>
    %cst_9 = arith.constant dense<0.000000e+00> : vector<32x16xf32>
    %7 = vector.multi_reduction <add>, %4, %cst_9 [1] : vector<32x16x16xf32> to vector<32x16xf32>
    %cst_10 = arith.constant dense<0.000000e+00> : vector<32x16xf32>
    %8 = vector.multi_reduction <add>, %5, %cst_10 [1] : vector<32x16x16xf32> to vector<32x16xf32>
    %9 = vector.extract_strided_slice %6 {offsets = [0, 0], sizes = [8, 16], strides = [1, 1]} : vector<32x16xf32> to vector<8x16xf32>
    %10 = vector.extract_strided_slice %6 {offsets = [8, 0], sizes = [8, 16], strides = [1, 1]} : vector<32x16xf32> to vector<8x16xf32>
    %11 = arith.addf %9, %10 : vector<8x16xf32>
    %12 = vector.extract_strided_slice %6 {offsets = [16, 0], sizes = [8, 16], strides = [1, 1]} : vector<32x16xf32> to vector<8x16xf32>
    %13 = arith.addf %11, %12 : vector<8x16xf32>
    %14 = vector.extract_strided_slice %6 {offsets = [24, 0], sizes = [8, 16], strides = [1, 1]} : vector<32x16xf32> to vector<8x16xf32>
    %15 = arith.addf %13, %14 : vector<8x16xf32>
    %16 = vector.extract_strided_slice %7 {offsets = [0, 0], sizes = [8, 16], strides = [1, 1]} : vector<32x16xf32> to vector<8x16xf32>
    %17 = vector.extract_strided_slice %7 {offsets = [8, 0], sizes = [8, 16], strides = [1, 1]} : vector<32x16xf32> to vector<8x16xf32>
    %18 = arith.addf %16, %17 : vector<8x16xf32>
    %19 = vector.extract_strided_slice %7 {offsets = [16, 0], sizes = [8, 16], strides = [1, 1]} : vector<32x16xf32> to vector<8x16xf32>
    %20 = arith.addf %18, %19 : vector<8x16xf32>
    %21 = vector.extract_strided_slice %7 {offsets = [24, 0], sizes = [8, 16], strides = [1, 1]} : vector<32x16xf32> to vector<8x16xf32>
    %22 = arith.addf %20, %21 : vector<8x16xf32>
    %23 = vector.extract_strided_slice %8 {offsets = [0, 0], sizes = [8, 16], strides = [1, 1]} : vector<32x16xf32> to vector<8x16xf32>
    %24 = vector.extract_strided_slice %8 {offsets = [8, 0], sizes = [8, 16], strides = [1, 1]} : vector<32x16xf32> to vector<8x16xf32>
    %25 = arith.addf %23, %24 : vector<8x16xf32>
    %26 = vector.extract_strided_slice %8 {offsets = [16, 0], sizes = [8, 16], strides = [1, 1]} : vector<32x16xf32> to vector<8x16xf32>
    %27 = arith.addf %25, %26 : vector<8x16xf32>
    %28 = vector.extract_strided_slice %8 {offsets = [24, 0], sizes = [8, 16], strides = [1, 1]} : vector<32x16xf32> to vector<8x16xf32>
    %29 = arith.addf %27, %28 : vector<8x16xf32>
    %c0_11 = arith.constant 0 : index
    %c0_12 = arith.constant 0 : index
    %30 = vector.load %arg4[%c0_11, %c0_12] : memref<672x256xf32, #tpu.memory_space<vmem>>, vector<16x64xf32>
    %cst_13 = arith.constant dense<0.000000e+00> : vector<8x64xf32>
    %31 = tpu.matmul %15, %30, %cst_13 {dimension_numbers = #tpu.dot_dimension_numbers<[1], [0], [0], [1], [0, 0, 1, 1], [], []>} : vector<8x16xf32>, vector<16x64xf32>, vector<8x64xf32> -> vector<8x64xf32>
    %c16 = arith.constant 16 : index
    %c0_14 = arith.constant 0 : index
    %32 = vector.load %arg4[%c16, %c0_14] : memref<672x256xf32, #tpu.memory_space<vmem>>, vector<16x64xf32>
    %cst_15 = arith.constant dense<0.000000e+00> : vector<8x64xf32>
    %33 = tpu.matmul %22, %32, %cst_15 {dimension_numbers = #tpu.dot_dimension_numbers<[1], [0], [0], [1], [0, 0, 1, 1], [], []>} : vector<8x16xf32>, vector<16x64xf32>, vector<8x64xf32> -> vector<8x64xf32>
    %34 = arith.addf %31, %33 : vector<8x64xf32>
    %c32 = arith.constant 32 : index
    %c0_16 = arith.constant 0 : index
    %35 = vector.load %arg4[%c32, %c0_16] : memref<672x256xf32, #tpu.memory_space<vmem>>, vector<16x64xf32>
    %cst_17 = arith.constant dense<0.000000e+00> : vector<8x64xf32>
    %36 = tpu.matmul %29, %35, %cst_17 {dimension_numbers = #tpu.dot_dimension_numbers<[1], [0], [0], [1], [0, 0, 1, 1], [], []>} : vector<8x16xf32>, vector<16x64xf32>, vector<8x64xf32> -> vector<8x64xf32>
    %37 = arith.addf %34, %36 : vector<8x64xf32>
    %c48 = arith.constant 48 : index
    %c0_18 = arith.constant 0 : index
    %38 = vector.load %arg4[%c48, %c0_18] : memref<672x256xf32, #tpu.memory_space<vmem>>, vector<64x256xf32>
    %cst_19 = arith.constant dense<0.000000e+00> : vector<8x256xf32>
    %39 = tpu.matmul %37, %38, %cst_19 {dimension_numbers = #tpu.dot_dimension_numbers<[1], [0], [0], [1], [0, 0, 1, 1], [], []>} : vector<8x64xf32>, vector<64x256xf32>, vector<8x256xf32> -> vector<8x256xf32>
    %c112 = arith.constant 112 : index
    %c0_20 = arith.constant 0 : index
    %40 = vector.load %arg4[%c112, %c0_20] : memref<672x256xf32, #tpu.memory_space<vmem>>, vector<64x256xf32>
    %cst_21 = arith.constant dense<0.000000e+00> : vector<8x256xf32>
    %41 = tpu.matmul %37, %40, %cst_21 {dimension_numbers = #tpu.dot_dimension_numbers<[1], [0], [0], [1], [0, 0, 1, 1], [], []>} : vector<8x64xf32>, vector<64x256xf32>, vector<8x256xf32> -> vector<8x256xf32>
    %42 = arith.mulf %39, %41 : vector<8x256xf32>
    %c176 = arith.constant 176 : index
    %c0_22 = arith.constant 0 : index
    %43 = vector.load %arg4[%c176, %c0_22] : memref<672x256xf32, #tpu.memory_space<vmem>>, vector<256x64xf32>
    %cst_23 = arith.constant dense<0.000000e+00> : vector<8x64xf32>
    %44 = tpu.matmul %42, %43, %cst_23 {dimension_numbers = #tpu.dot_dimension_numbers<[1], [0], [0], [1], [0, 0, 1, 1], [], []>} : vector<8x256xf32>, vector<256x64xf32>, vector<8x64xf32> -> vector<8x64xf32>
    %c432 = arith.constant 432 : index
    %c0_24 = arith.constant 0 : index
    %45 = vector.load %arg4[%c432, %c0_24] : memref<672x256xf32, #tpu.memory_space<vmem>>, vector<64x64xf32>
    %cst_25 = arith.constant dense<0.000000e+00> : vector<8x64xf32>
    %46 = tpu.matmul %37, %45, %cst_25 {dimension_numbers = #tpu.dot_dimension_numbers<[1], [0], [0], [1], [0, 0, 1, 1], [], []>} : vector<8x64xf32>, vector<64x64xf32>, vector<8x64xf32> -> vector<8x64xf32>
    %47 = arith.addf %44, %46 : vector<8x64xf32>
    %c0_26 = arith.constant 0 : index
    %c0_27 = arith.constant 0 : index
    %48 = vector.load %arg5[%c0_26, %c0_27] : memref<8x64xf32, #tpu.memory_space<vmem>>, vector<1x64xf32>
    %49 = vector.broadcast %48 : vector<1x64xf32> to vector<8x64xf32>
    %50 = arith.addf %47, %49 : vector<8x64xf32>
    %cst_28 = arith.constant 0.000000e+00 : f32
    %51 = vector.broadcast %cst_28 : f32 to vector<8x64xf32>
    %52 = arith.maximumf %50, %51 : vector<8x64xf32>
    %c496 = arith.constant 496 : index
    %c0_29 = arith.constant 0 : index
    %53 = vector.load %arg4[%c496, %c0_29] : memref<672x256xf32, #tpu.memory_space<vmem>>, vector<64x64xf32>
    %cst_30 = arith.constant dense<0.000000e+00> : vector<8x64xf32>
    %54 = tpu.matmul %52, %53, %cst_30 {dimension_numbers = #tpu.dot_dimension_numbers<[1], [0], [0], [1], [0, 0, 1, 1], [], []>} : vector<8x64xf32>, vector<64x64xf32>, vector<8x64xf32> -> vector<8x64xf32>
    %c1 = arith.constant 1 : index
    %c0_31 = arith.constant 0 : index
    %55 = vector.load %arg5[%c1, %c0_31] : memref<8x64xf32, #tpu.memory_space<vmem>>, vector<1x64xf32>
    %56 = vector.broadcast %55 : vector<1x64xf32> to vector<8x64xf32>
    %57 = arith.addf %54, %56 : vector<8x64xf32>
    %cst_32 = arith.constant 0.000000e+00 : f32
    %58 = vector.broadcast %cst_32 : f32 to vector<8x64xf32>
    %59 = arith.maximumf %57, %58 : vector<8x64xf32>
    %c560 = arith.constant 560 : index
    %c0_33 = arith.constant 0 : index
    %60 = vector.load %arg4[%c560, %c0_33] : memref<672x256xf32, #tpu.memory_space<vmem>>, vector<64x32xf32>
    %cst_34 = arith.constant dense<0.000000e+00> : vector<8x32xf32>
    %61 = tpu.matmul %59, %60, %cst_34 {dimension_numbers = #tpu.dot_dimension_numbers<[1], [0], [0], [1], [0, 0, 1, 1], [], []>} : vector<8x64xf32>, vector<64x32xf32>, vector<8x32xf32> -> vector<8x32xf32>
    %c2 = arith.constant 2 : index
    %c0_35 = arith.constant 0 : index
    %62 = vector.load %arg5[%c2, %c0_35] : memref<8x64xf32, #tpu.memory_space<vmem>>, vector<1x32xf32>
    %63 = vector.broadcast %62 : vector<1x32xf32> to vector<8x32xf32>
    %64 = arith.addf %61, %63 : vector<8x32xf32>
    %cst_36 = arith.constant 0.000000e+00 : f32
    %65 = vector.broadcast %cst_36 : f32 to vector<8x32xf32>
    %66 = arith.maximumf %64, %65 : vector<8x32xf32>
    %c624 = arith.constant 624 : index
    %c0_37 = arith.constant 0 : index
    %67 = vector.load %arg4[%c624, %c0_37] : memref<672x256xf32, #tpu.memory_space<vmem>>, vector<32x16xf32>
    %cst_38 = arith.constant dense<0.000000e+00> : vector<8x16xf32>
    %68 = tpu.matmul %66, %67, %cst_38 {dimension_numbers = #tpu.dot_dimension_numbers<[1], [0], [0], [1], [0, 0, 1, 1], [], []>} : vector<8x32xf32>, vector<32x16xf32>, vector<8x16xf32> -> vector<8x16xf32>
    %c3 = arith.constant 3 : index
    %c0_39 = arith.constant 0 : index
    %69 = vector.load %arg5[%c3, %c0_39] : memref<8x64xf32, #tpu.memory_space<vmem>>, vector<1x16xf32>
    %70 = vector.broadcast %69 : vector<1x16xf32> to vector<8x16xf32>
    %71 = arith.addf %68, %70 : vector<8x16xf32>
    %cst_40 = arith.constant 0.000000e+00 : f32
    %72 = vector.broadcast %cst_40 : f32 to vector<8x16xf32>
    %73 = arith.maximumf %71, %72 : vector<8x16xf32>
    %c656 = arith.constant 656 : index
    %c0_41 = arith.constant 0 : index
    %74 = vector.load %arg4[%c656, %c0_41] : memref<672x256xf32, #tpu.memory_space<vmem>>, vector<16x4xf32>
    %cst_42 = arith.constant dense<0.000000e+00> : vector<8x4xf32>
    %75 = tpu.matmul %73, %74, %cst_42 {dimension_numbers = #tpu.dot_dimension_numbers<[1], [0], [0], [1], [0, 0, 1, 1], [], []>} : vector<8x16xf32>, vector<16x4xf32>, vector<8x4xf32> -> vector<8x4xf32>
    %c4 = arith.constant 4 : index
    %c0_43 = arith.constant 0 : index
    %76 = vector.load %arg5[%c4, %c0_43] : memref<8x64xf32, #tpu.memory_space<vmem>>, vector<1x4xf32>
    %77 = vector.broadcast %76 : vector<1x4xf32> to vector<8x4xf32>
    %78 = arith.addf %75, %77 : vector<8x4xf32>
    %79 = arith.negf %78 : vector<8x4xf32>
    %80 = math.exp %79 : vector<8x4xf32>
    %cst_44 = arith.constant 1.000000e+00 : f32
    %81 = vector.broadcast %cst_44 : f32 to vector<8x4xf32>
    %82 = arith.addf %81, %80 : vector<8x4xf32>
    %83 = arith.divf %81, %82 : vector<8x4xf32>
    %c0_45 = arith.constant 0 : index
    %c0_46 = arith.constant 0 : index
    %84 = vector.load %arg1[%c0_45, %c0_46] : memref<8x1xf32, #tpu.memory_space<vmem>>, vector<8x1xf32>
    %cst_47 = arith.constant 0.000000e+00 : f32
    %85 = vector.broadcast %cst_47 : f32 to vector<8x1xf32>
    %86 = arith.subf %85, %84 : vector<8x1xf32>
    %87 = math.log %83 : vector<8x4xf32>
    %cst_48 = arith.constant dense<0.000000e+00> : vector<8xf32>
    %88 = vector.multi_reduction <add>, %87, %cst_48 [1] : vector<8x4xf32> to vector<8xf32>
    %89 = vector.shape_cast %88 : vector<8xf32> to vector<8x1xf32>
    %90 = arith.mulf %86, %89 : vector<8x1xf32>
    %cst_49 = arith.constant 0.000000e+00 : f32
    %91 = vector.broadcast %cst_49 : f32 to vector<8x1xf32>
    %92 = arith.subf %91, %90 : vector<8x1xf32>
    %93 = arith.divf %92, %84 : vector<8x1xf32>
    %94 = math.exp %93 : vector<8x1xf32>
    %cst_50 = arith.constant 0.000000e+00 : f32
    %95 = vector.broadcast %cst_50 : f32 to vector<8x2xf32>
    %96 = tpu.concatenate %83, %90, %94, %95 in 1 : vector<8x4xf32>, vector<8x1xf32>, vector<8x1xf32>, vector<8x2xf32> -> vector<8x8xf32>
    %c0_51 = arith.constant 0 : index
    %c0_52 = arith.constant 0 : index
    %97 = vector.load %arg6[%c0_51, %c0_52] : memref<8x8xf32, #tpu.memory_space<vmem>>, vector<8x8xf32>
    tpu.vector_store %arg6[%c0_51, %c0_52], %96 {strides = array<i32>} : memref<8x8xf32, #tpu.memory_space<vmem>>, vector<8x8xf32>,
    return
  }
  func.func @transform_0(%arg0: i32) -> (i32, i32) {
    %c0_i32 = arith.constant 0 : i32
    %c0_i32_0 = arith.constant 0 : i32
    return %arg0, %c0_i32 : i32, i32
  }
  func.func @transform_1(%arg0: i32) -> (i32, i32, i32, i32) {
    %c0_i32 = arith.constant 0 : i32
    %c0_i32_0 = arith.constant 0 : i32
    %c0_i32_1 = arith.constant 0 : i32
    %c0_i32_2 = arith.constant 0 : i32
    return %c0_i32, %arg0, %c0_i32_0, %c0_i32_1 : i32, i32, i32, i32
  }
  func.func @transform_2(%arg0: i32) -> (i32, i32, i32, i32) {
    %c0_i32 = arith.constant 0 : i32
    %c0_i32_0 = arith.constant 0 : i32
    %c0_i32_1 = arith.constant 0 : i32
    %c0_i32_2 = arith.constant 0 : i32
    return %c0_i32, %arg0, %c0_i32_0, %c0_i32_1 : i32, i32, i32, i32
  }
  func.func @transform_3(%arg0: i32) -> (i32, i32) {
    %c0_i32 = arith.constant 0 : i32
    %c0_i32_0 = arith.constant 0 : i32
    %c0_i32_1 = arith.constant 0 : i32
    return %c0_i32, %c0_i32_0 : i32, i32
  }
  func.func @transform_4(%arg0: i32) -> (i32, i32) {
    %c0_i32 = arith.constant 0 : i32
    %c0_i32_0 = arith.constant 0 : i32
    %c0_i32_1 = arith.constant 0 : i32
    return %c0_i32, %c0_i32_0 : i32, i32
  }
  func.func @transform_5(%arg0: i32) -> (i32, i32) {
    %c0_i32 = arith.constant 0 : i32
    %c0_i32_0 = arith.constant 0 : i32
    return %arg0, %c0_i32 : i32, i32
  }
}

</mosaic_0001>

<bundles_post_ra>
// kernel: run.1
= control target key start
LH: loop header
LB: loop body
LE: loop exit
PB: predicated region body
PF: predicated region fallthrough
CT: control target
= control target key end

     0   :  { %10 = vsyncpa [#allocation3], 0  ;;  %s10256_s0 = inlined_call_operand.vmem [shape: f32[16,1], index: 0, kind: input, shape index: {}]   ;;  %s10257_s1 = inlined_call_operand.hbm [shape: f32[4,16,16,16], index: 1, kind: input, shape index: {}]   ;;  %s10258_s2 = inlined_call_operand.hbm [shape: f32[4,16,16,16], index: 2, kind: input, shape index: {}]   ;;  %s10259_s3 = inlined_call_operand.hbm [shape: f32[672,256], index: 3, kind: input, shape index: {}]   ;;  %s10260_s4 = inlined_call_operand.vmem [shape: f32[8,64], index: 4, kind: input, shape index: {}]   ;;  %s10261_s5 = inlined_call_operand.vmem [shape: f32[16,8], index: 5, kind: output, shape index: {}]  }
   0x1   :  { %12 = vsyncpa [#allocation3 + $0x1], 0 }
   0x2   :  { %13 = vsyncpa [#allocation5], 0 }
   0x3   :  { %15 = vsyncpa [#allocation5 + $0x1], 0  ;;  %s9254_s18 = smov 0   ;;  %s9256_s19 = smov 0  }
   0x4   :  { %s9258_s20 = smov 0   ;;  %s9260_s21 = smov 0  }
   0x5 LB: > { %s9273_s22 = sadd.s32 4294967295, %s9202_s21   ;;  %s9276_s23 = sadd.s32 1, %s9202_s21   ;;  %s9202_s21 = sphi %s9260_s21, %s10278_s21   ;;  %s9198_s20 = sphi %s9258_s20, %s10277_s20   ;;  %s9194_s19 = sphi %s9256_s19, %s10276_s19   ;;  %s9190_s18 = sphi %s9254_s18, %s10275_s18  }
   0x6   : > { %s51_s24 = ssub.s32 %s9202_s21, %s9276_s23  ;;  %s54_s25 = sadd.s32 1, %s9198_s20 }
   0x7   : > { %p52_p0 = scmp.eq.s32.totalorder %s51_s24, 0  ;;  %p61_p1 = scmp.ne.s32.totalorder %s9198_s20, %s9194_s19 }
   0x8   : > { %p62_p2 = scmp.eq.s32.totalorder %s9202_s21, 0  ;;  %p67_p3 = scmp.ne.s32.totalorder %s9194_s19, %s9190_s18 }
   0x9   : > { %s9286_s26 = scalar_select %p52_p0, %s9198_s20, %s54_s25  }
   0xa   : > { %p9288_p4 = por %p62_p2, %p61_p1  ;;  %p10262_p5 = scmp.eq.s32.totalorder %s9273_s22, 0 }
   0xb   : > { %p7550_p6 = scmp.ge.s32.totalorder %s9202_s21, 1  ;;  %p172_p7 = scmp.lt.s32.totalorder %s9202_s21, 3 }
   0xc   : > { %s10266_s27 = scalar_select %p9288_p4, 1, 0 }
   0xd   : > { %p9297_p8 = por %p10262_p5, %p67_p3  ;;  %p9301_p9 = pnand %p7550_p6, %p172_p7 }
   0xe   : > { %s9204_s30 = smov [#allocation6]   ;;  %s9132_s10 = scalar_lea.hbm %s10259_s3, 21504 }
   0xf   : > { %s10267_s28 = scalar_select %p9297_p8, 1, 0 }
  0x10   : > { %s10268_s29 = scalar_select %p9301_p9, 1, 0 }
  0x11   : > { %s184_s6 = sshll.u32 %s9204_s30, 4  ;;  %p9000_p10 = pneg %p9301_p9  ;;  %s185_s6 = int_to_ptr.vmem [resolvable:$true] %s184_s6 }
  0x12   : > { %p9133_p12 = scmp.ne.s32.totalorder %s10259_s3, %s9132_s10  ;;  %p9139_p2 = scmp.lt.u32.totalorder %s9132_s10, %s10259_s3 }
  0x13   : > { %p9309_p11 = pnand %p9000_p10, %p10262_p5 }
  0x15   : > { %p9134_p13 = pneg %p9309_p11 }
  0x17   : > { %p9135_p0 = pnand %p9134_p13, %p9133_p12 }
  0x19   : > { %p9136_p1 = pneg %p9135_p0 }
  0x1b   : > { %p9141_p3 = pnand %p9139_p2, %p9136_p1 }
  0x1d   : > { %9144 = shalt.err (!%p9141_p3)
}
  0x1e   : > { %s9145_s15 = scalar_lea.vmem %s185_s6, 21504  ;;  %p9153_p5 = scmp.lt.s32.totalorder %s185_s6, %s185_s6 }
  0x1f   : > { %p9146_p6 = scmp.ne.s32.totalorder %s185_s6, %s9145_s15  ;;  %p9154_p8 = scmp.lt.s32.totalorder %s9145_s15, %s9145_s15 }
  0x21   : > { %p9148_p7 = pnand %p9146_p6, %p9134_p13  ;;  %p9155_p9 = por %p9154_p8, %p9153_p5 }
  0x23   : > { %p9149_p10 = pneg %p9148_p7 }
  0x25   : > { %p9156_p4 = pnand %p9155_p9, %p9149_p10 }
  0x27   : > { %9159 = shalt.err (!%p9156_p4)
}
  0x28   : > { %s9205_s16 = smov 256   ;;  %s9206_s17 = smov 16  }
  0x29   : > { %9003 = dma.hbm_to_vmem [thread:$0]  (!%p9309_p11), %s10259_s3, 21504, %s185_s6, [#allocation5], %s9205_s16, %s9205_s16, %s9206_s17  }
  0x2a   : > { %p7552_p12 = scmp.ge.s32.totalorder %s9202_s21, 2 }
  0x2c   : > { %197 = sbr.rel (%p7552_p12) target bundleno = 78 (0x4e), region = 24 }
  0x33   : > { %s208_s25 = sand.u32 1, %s9198_s20   ;;  %s7718_s30 = sshll.u32 %s9202_s21, 11 }
  0x34   : > { %s7553_s8 = sshll.u32 %s208_s25, 9  ;;  %s219_s10 = scalar_lea.hbm %s10257_s1, %s7718_s30 }
  0x35   : > { %p10270_p4 = scmp.ne.s32.totalorder %s10266_s27, 0  ;;  %s212_s11 = scalar_lea.vmem [#allocation2], %s7553_s8 }
  0x36   : > { %s232_s12 = sshll.u32 %s212_s11, 4  ;;  %s9207_s14 = smov 4096   ;;  %s233_s12 = int_to_ptr.vmem [resolvable:$true] %s232_s12 }
  0x37   : > { %s8980_s6 = scalar_select %p10270_p4, [#allocation0], [#allocation11] }
  0x38   : > { %8981 = sst [smem:[#allocation8]] (%p10270_p4), %s9207_s14  ;;  %s9208_s15 = smov 2048  }
  0x39   : > { %s224_s13 = sld [smem:[%s8980_s6]]   ;;  %s9209_s16 = smov 16  }
  0x3a   : > { %8982 = sst [smem:[#allocation8 + $0x1]] (%p10270_p4), %s9208_s15  ;;  %s9210_s17 = smov 128  }
  0x3b   : > { %8983 = sst [smem:[#allocation8 + $0x2]] (%p10270_p4), %s9209_s16  ;;  %s9211_s24 = smov 8  }
  0x3c   : > { %8984 = sst [smem:[#allocation8 + $0x3]] (%p10270_p4), %s9210_s17  ;;  %s209_s7 = scalar_lea.sflag [#allocation3], %s208_s25 }
  0x3d   : > { %8985 = sst [smem:[#allocation8 + $0x4]] (%p10270_p4), %s9210_s17  ;;  %s9212_s6 = smov [#allocation7]  }
  0x3e   : > { %8986 = sst [smem:[#allocation8 + $0x5]] (%p10270_p4), %s9211_s24 }
  0x3f   : > { %s7557_s18 = sshll.u32 %s224_s13, 26 }
  0x40   : > { %s7558_s9 = sadd.s32 134217728, %s7557_s18 }
  0x41   : > { %8987 = dma.general (%p10270_p4), %s219_s10, 8192, %s233_s12, %s209_s7, %s9212_s6, [#allocation8], %s7558_s9, 0  }
  0x42   : > { %s255_s11 = sand.u32 1, %s9202_s21   ;;  %s266_s13 = scalar_lea.hbm %s10258_s2, %s7718_s30 }
  0x43   : > { %s8988_s16 = scalar_select %p10270_p4, [#allocation0], [#allocation12] }
  0x44   : > { %s259_s17 = scalar_lea.vmem [#allocation4], %s7553_s8  ;;  %s9213_s10 = smov 4096  }
  0x45   : > { %s279_s25 = sshll.u32 %s259_s17, 4  ;;  %s271_s18 = sld [smem:[%s8988_s16]]   ;;  %s280_s25 = int_to_ptr.vmem [resolvable:$true] %s279_s25 }
  0x46   : > { %8989 = sst [smem:[#allocation10]] (%p10270_p4), %s9213_s10  ;;  %s9214_s12 = smov 2048  }
  0x47   : > { %8990 = sst [smem:[#allocation10 + $0x1]] (%p10270_p4), %s9214_s12  ;;  %s9215_s24 = smov 16  }
  0x48   : > { %8991 = sst [smem:[#allocation10 + $0x2]] (%p10270_p4), %s9215_s24  ;;  %s9216_s21 = smov 128  }
  0x49   : > { %8992 = sst [smem:[#allocation10 + $0x3]] (%p10270_p4), %s9216_s21  ;;  %s9217_s8 = smov 8  }
  0x4a   : > { %8993 = sst [smem:[#allocation10 + $0x4]] (%p10270_p4), %s9216_s21  ;;  %s256_s7 = scalar_lea.sflag [#allocation5], %s255_s11 }
  0x4b   : > { %s7563_s30 = sshll.u32 %s271_s18, 26  ;;  %8994 = sst [smem:[#allocation10 + $0x5]] (%p10270_p4), %s9217_s8 }
  0x4c   : > { %s7564_s9 = sadd.s32 134217728, %s7563_s30  ;;  %s9218_s6 = smov [#allocation9]  }
  0x4d   : > { %8995 = dma.general (%p10270_p4), %s266_s13, 8192, %s280_s25, %s256_s7, %s9218_s6, [#allocation10], %s7564_s9, 0  }
  0x4e PF: > { %p10271_p5 = scmp.ne.s32.totalorder %s10268_s29, 0 }
  0x4f   : > { %s306_s14 = sand.u32 (!%p10271_p5), 1, %s9194_s19   ;;  %p10272_p8 = scmp.ne.s32.totalorder (!%p10271_p5), %s10267_s28, 0 }
  0x50   : > { %304 = sbr.rel (%p10271_p5) target bundleno = 2462 (0x99e), region = 40  ;;  %s7566_s15 = sshll.u32 (!%p10271_p5), %s306_s14, 9 }
  0x51   : > { %s307_s16 = scalar_lea.sflag (!%p10271_p5), [#allocation3], %s306_s14  ;;  %s9374_s17 = scalar_lea.vmem (!%p10271_p5), [#allocation2], %s7566_s15 }
  0x57   : > { %9177 = dma.done.wait (%p10272_p8), %s307_s16, 8192  }
  0x58   : > { %9179 = vsyncadd (%p10272_p8), %s307_s16, 4294959104  ;;  %s315_s27 = sand.u32 1, %s9273_s22   ;;  %s9381_s13 = scalar_lea.vmem [#allocation4], %s7566_s15 }
  0x59   : > { %s316_s11 = scalar_lea.sflag [#allocation5], %s315_s27 }
  0x5a   : > { %9181 = dma.done.wait (%p10272_p8), %s316_s11, 8192  }
  0x5b   : > { %9183 = vsyncadd (%p10272_p8), %s316_s11, 4294959104  ;;  %p10273_p9 = scmp.eq.s32.totalorder %s9273_s22, 0 }
  0x5d   : > { %9185 = dma.done.wait (%p10273_p9), [#allocation5], 21504   ;;  %p10274_p11 = pmov %p10273_p9 }
  0x5e   : > { %vm496_vm0 = vcmask 130048   ;;  %v432_v0 = vld [vmem:[%s9381_s13] sm:$0xff]  ;;  %v433_v1 = vld [vmem:[%s9381_s13 + $0x8] sm:$0xff]  ;;  %v434_v2 = vld [vmem:[%s9381_s13 + $0x10] sm:$0xff]  ;;  %vm6437_vm1 = vcmask 1041409   ;;  %vm6439_vm2 = vcmask 1042434  }
  0x5f   : > { %9187 = vsyncadd (%p10274_p11), [#allocation5], 4294945792  ;;  %v8600_v3 = vpack.c.bf16 %v433_v1, %v432_v0  ;;  %v5489_v4 = vsel %vm496_vm0, %v432_v0, 0.0  ;;  %v5490_v5 = vsel %vm496_vm0, %v433_v1, 0.0  ;;  %v435_v6 = vld [vmem:[%s9381_s13 + $0x18] sm:$0xff]  ;;  %v5498_v7 = vsel %vm496_vm0, %v434_v2, 0.0 }
  0x60   : > { %v368_v8 = vld [vmem:[%s9374_s17] sm:$0xff]  ;;  %v370_v9 = vld [vmem:[%s9374_s17 + $0x10] sm:$0xff]  ;;  %v5491_v10 = vadd.f32 %v5490_v5, %v5489_v4  ;;  %v8604_v11 = vpack.c.bf16 %v435_v6, %v434_v2  ;;  %v5499_v12 = vsel %vm496_vm0, %v435_v6, 0.0  ;;  %v437_v15 = vld [vmem:[%s9381_s13 + $0x28] sm:$0xff]  ;;  %vm6441_vm3 = vcmask 1043459   ;;  %p358_p13 = scmp.lt.s32.totalorder %s9273_s22, 1 }
  0x61   : > { %8060 = vmatprep.mubr.msk.f32.mxu0 %vm496_vm0, %v368_v8  ;;  %8067 = vmatprep.mubr.msk.f32.mxu1 %vm496_vm0, %v370_v9  ;;  %v436_v13 = vld [vmem:[%s9381_s13 + $0x20] sm:$0xff]  ;;  %v5500_v14 = vadd.f32 %v5499_v12, %v5498_v7  ;;  %v438_v17 = vld [vmem:[%s9381_s13 + $0x30] sm:$0xff]  ;;  %v439_v18 = vld [vmem:[%s9381_s13 + $0x38] sm:$0xff]  ;;  %v5508_v22 = vsel %vm496_vm0, %v437_v15, 0.0  ;;  %vm9220_vm4 = vmmov 0   ;;  %vm6443_vm5 = vcmask 1044484  }
  0x62   : > { %8601 = vmatprep.subr.bf16.mxu0 %v8600_v3  ;;  %v5507_v16 = vsel %vm496_vm0, %v436_v13, 0.0  ;;  %v5492_v19 = vrot.slane %v5491_v10, 4  ;;  %8605 = vmatprep.subr.bf16.mxu1 %v8604_v11  ;;  %v369_v20 = vld [vmem:[%s9374_s17 + $0x8] sm:$0xff]  ;;  %v8608_v21 = vpack.c.bf16 %v437_v15, %v436_v13  ;;  %v8612_v23 = vpack.c.bf16 %v439_v18, %v438_v17  ;;  %v371_v25 = vld [vmem:[%s9374_s17 + $0x18] sm:$0xff]  ;;  %v440_v29 = vld [vmem:[%s9381_s13 + $0x40] sm:$0xff]  ;;  %s10280_s22 = smov (!%p358_p13, %s9273_s22), 1 }
  0x63   : > { %8603 = vmatpush3.bf16.msra.mxu0 %v8600_v3  ;;  %v5501_v24 = vrot.slane %v5500_v14, 4  ;;  %8607 = vmatpush3.bf16.msra.mxu1 %v8604_v11  ;;  %v5509_v26 = vadd.f32 %v5508_v22, %v5507_v16  ;;  %v5516_v27 = vsel %vm496_vm0, %v438_v17, 0.0  ;;  %v5517_v28 = vsel %vm496_vm0, %v439_v18, 0.0  ;;  %v441_v30 = vld [vmem:[%s9381_s13 + $0x48] sm:$0xff]  ;;  %v372_v33 = vld [vmem:[%s9374_s17 + $0x20] sm:$0xff]  ;;  %v442_v36 = vld [vmem:[%s9381_s13 + $0x50] sm:$0xff] }
  0x64   : > { %v5493_v31 = vadd.f32 %v5492_v19, %v5491_v10  ;;  %8609 = vmatprep.subr.bf16.mxu0 %v8608_v21  ;;  %8613 = vmatprep.subr.bf16.mxu1 %v8612_v23  ;;  %v5518_v32 = vadd.f32 %v5517_v28, %v5516_v27  ;;  %v8616_v34 = vpack.c.bf16 %v441_v30, %v440_v29  ;;  %v5525_v35 = vsel %vm496_vm0, %v440_v29, 0.0  ;;  %v443_v37 = vld [vmem:[%s9381_s13 + $0x58] sm:$0xff]  ;;  %v374_v40 = vld [vmem:[%s9374_s17 + $0x30] sm:$0xff]  ;;  %v373_v45 = vld [vmem:[%s9374_s17 + $0x28] sm:$0xff]  ;;  %s7569_s9 = sshll.u32 %s10280_s22, 3  ;;  %s9222_s15 = smov 4  }
  0x65   : > { %v5502_v38 = vadd.f32 %v5501_v24, %v5500_v14  ;;  %v5510_v39 = vrot.slane %v5509_v26, 4  ;;  %v5526_v41 = vsel %vm496_vm0, %v441_v30, 0.0  ;;  %v8620_v42 = vpack.c.bf16 %v443_v37, %v442_v36  ;;  %v444_v48 = vld [vmem:[%s9381_s13 + $0x60] sm:$0xff]  ;;  %v445_v49 = vld [vmem:[%s9381_s13 + $0x68] sm:$0xff]  ;;  %v375_v52 = vld [vmem:[%s9374_s17 + $0x38] sm:$0xff]  ;;  %s361_s14 = scalar_lea.vmem %s10256_s0, %s7569_s9  ;;  %s9223_s16 = smov 5  }
  0x66   : > { %8061 = vmatmul.mubr.msk.f32.vlgmr.msra.gmra.mrb[0].mxu0 %vm496_vm0, %v369_v20  ;;  %v5494_v43 = vrot.slane %v5493_v31, 2  ;;  %8068 = vmatmul.mubr.msk.f32.vlgmr.msra.gmra.mrb[0].mxu1 %vm496_vm0, %v371_v25  ;;  %v5519_v44 = vrot.slane %v5518_v32, 4  ;;  %v5527_v46 = vadd.f32 %v5526_v41, %v5525_v35  ;;  %v5534_v47 = vsel %vm496_vm0, %v442_v36, 0.0  ;;  %v376_v57 = vld [vmem:[%s9374_s17 + $0x40] sm:$0xff]  ;;  %v446_v59 = vld [vmem:[%s9381_s13 + $0x70] sm:$0xff]  ;;  %v447_v60 = vld [vmem:[%s9381_s13 + $0x78] sm:$0xff]  ;;  %s367_s27 = scalar_lea.vmem %s10261_s5, %s7569_s9 }
  0x67   : > { %8611 = vmatpush3.bf16.msra.mxu0 %v8608_v21  ;;  %v5503_v50 = vrot.slane %v5502_v38, 2  ;;  %v5511_v51 = vadd.f32 %v5510_v39, %v5509_v26  ;;  %8615 = vmatpush3.bf16.msra.mxu1 %v8612_v23  ;;  %v5535_v53 = vsel %vm496_vm0, %v443_v37, 0.0  ;;  %v8624_v58 = vpack.c.bf16 %v445_v49, %v444_v48  ;;  %v378_v63 = vld [vmem:[%s9374_s17 + $0x50] sm:$0xff]  ;;  %v377_v6 = vld [vmem:[%s9374_s17 + $0x48] sm:$0xff]  ;;  %v379_v7 = vld [vmem:[%s9374_s17 + $0x58] sm:$0xff] }
  0x68   : > { %8074 = vmatprep.mubr.msk.f32.mxu0 %vm496_vm0, %v372_v33  ;;  %v5520_v54 = vadd.f32 %v5519_v44, %v5518_v32  ;;  %8081 = vmatprep.mubr.msk.f32.mxu1 %vm496_vm0, %v374_v40  ;;  %v5528_v55 = vrot.slane %v5527_v46, 4  ;;  %v5536_v56 = vadd.f32 %v5535_v53, %v5534_v47  ;;  %v5495_v61 = vadd.f32 %v5494_v43, %v5493_v31  ;;  %v380_v12 = vld [vmem:[%s9374_s17 + $0x60] sm:$0xff]  ;;  %v382_v16 = vld [vmem:[%s9374_s17 + $0x70] sm:$0xff]  ;;  %v449_v18 = vld [vmem:[%s9381_s13 + $0x88] sm:$0xff] }
  0x69   : > { %8617 = vmatprep.subr.bf16.mxu0 %v8616_v34  ;;  %v5512_v62 = vrot.slane %v5511_v51, 2  ;;  %8621 = vmatprep.subr.bf16.mxu1 %v8620_v42  ;;  %v5543_v0 = vsel %vm496_vm0, %v444_v48, 0.0  ;;  %v5544_v1 = vsel %vm496_vm0, %v445_v49, 0.0  ;;  %v5504_v2 = vadd.f32 %v5503_v50, %v5502_v38  ;;  %v448_v17 = vld [vmem:[%s9381_s13 + $0x80] sm:$0xff]  ;;  %v381_v22 = vld [vmem:[%s9374_s17 + $0x68] sm:$0xff]  ;;  %v450_v23 = vld [vmem:[%s9381_s13 + $0x90] sm:$0xff] }
  0x6a   : > { %8075 = vmatmul.mubr.msk.f32.vlgmr.msra.gmra.mrb[2].mxu0 %vm496_vm0, %v373_v45  ;;  %v5521_v3 = vrot.slane %v5520_v54, 2  ;;  %8082 = vmatmul.mubr.msk.f32.vlgmr.msra.gmra.mrb[2].mxu1 %vm496_vm0, %v375_v52  ;;  %v5529_v4 = vadd.f32 %v5528_v55, %v5527_v46  ;;  %v5537_v5 = vrot.slane %v5536_v56, 4  ;;  %v5545_v8 = vadd.f32 %v5544_v1, %v5543_v0  ;;  %v451_v24 = vld [vmem:[%s9381_s13 + $0x98] sm:$0xff]  ;;  %v452_v32 = vld [vmem:[%s9381_s13 + $0xa0] sm:$0xff]  ;;  %v453_v33 = vld [vmem:[%s9381_s13 + $0xa8] sm:$0xff] }
  0x6b   : > { %8619 = vmatpush3.bf16.msra.mxu0 %v8616_v34  ;;  %8623 = vmatpush3.bf16.msra.mxu1 %v8620_v42  ;;  %v8628_v9 = vpack.c.bf16 %v447_v60, %v446_v59  ;;  %v5513_v10 = vadd.f32 %v5512_v62, %v5511_v51  ;;  %v5552_v15 = vsel %vm496_vm0, %v446_v59, 0.0  ;;  %v5496_v19 = vrot.slane %v5495_v61, 1  ;;  %v383_v28 = vld [vmem:[%s9374_s17 + $0x78] sm:$0xff]  ;;  %v384_v38 = vld [vmem:[%s9374_s17 + $0x80] sm:$0xff]  ;;  %v386_v43 = vld [vmem:[%s9374_s17 + $0x90] sm:$0xff] }
  0x6c   : > { %8088 = vmatprep.mubr.msk.f32.mxu0 %vm496_vm0, %v376_v57  ;;  %v5530_v11 = vrot.slane %v5529_v4, 2  ;;  %8095 = vmatprep.mubr.msk.f32.mxu1 %vm496_vm0, %v378_v63  ;;  %v5522_v13 = vadd.f32 %v5521_v3, %v5520_v54  ;;  %v5538_v14 = vadd.f32 %v5537_v5, %v5536_v56  ;;  %v5505_v20 = vrot.slane %v5504_v2, 1  ;;  %v454_v44 = vld [vmem:[%s9381_s13 + $0xb0] sm:$0xff]  ;;  %v455_v45 = vld [vmem:[%s9381_s13 + $0xb8] sm:$0xff]  ;;  %v385_v49 = vld [vmem:[%s9374_s17 + $0x88] sm:$0xff] }
  0x6d   : > { %8625 = vmatprep.subr.bf16.mxu0 %v8624_v58  ;;  %8629 = vmatprep.subr.bf16.mxu1 %v8628_v9  ;;  %v5553_v21 = vsel %vm496_vm0, %v447_v60, 0.0  ;;  %v5546_v26 = vrot.slane %v5545_v8, 4  ;;  %v5561_v29 = vsel %vm496_vm0, %v448_v17, 0.0  ;;  %v5514_v30 = vrot.slane %v5513_v10, 1  ;;  %v387_v54 = vld [vmem:[%s9374_s17 + $0x98] sm:$0xff]  ;;  %v456_v56 = vld [vmem:[%s9381_s13 + $0xc0] sm:$0xff] }
  0x6e   : > { %8089 = vmatmul.mubr.msk.f32.vlgmr.msra.gmra.mrb[4].mxu0 %vm496_vm0, %v377_v6  ;;  %8096 = vmatmul.mubr.msk.f32.vlgmr.msra.gmra.mrb[4].mxu1 %vm496_vm0, %v379_v7  ;;  %v5531_v25 = vadd.f32 %v5530_v11, %v5529_v4  ;;  %v9454_v27 = vadd.f32 %v5553_v21, %v5552_v15  ;;  %v8632_v31 = vpack.c.bf16 %v449_v18, %v448_v17  ;;  %v5523_v34 = vrot.slane %v5522_v13, 1  ;;  %v457_v57 = vld [vmem:[%s9381_s13 + $0xc8] sm:$0xff]  ;;  %v388_v62 = vld [vmem:[%s9374_s17 + $0xa0] sm:$0xff]  ;;  %v390_v3 = vld [vmem:[%s9374_s17 + $0xb0] sm:$0xff] }
  0x6f   : > { %8627 = vmatpush3.bf16.msra.mxu0 %v8624_v58  ;;  %8631 = vmatpush3.bf16.msra.mxu1 %v8628_v9  ;;  %v5539_v35 = vrot.slane %v5538_v14, 2  ;;  %v5562_v36 = vsel %vm496_vm0, %v449_v18, 0.0  ;;  %v8636_v37 = vpack.c.bf16 %v451_v24, %v450_v23  ;;  %v9465_v39 = vadd.f32 %v5496_v19, %v5495_v61  ;;  %v458_v4 = vld [vmem:[%s9381_s13 + $0xd0] sm:$0xff]  ;;  %v459_v5 = vld [vmem:[%s9381_s13 + $0xd8] sm:$0xff] }
  0x70   : > { %8102 = vmatprep.mubr.msk.f32.mxu0 %vm496_vm0, %v380_v12  ;;  %8109 = vmatprep.mubr.msk.f32.mxu1 %vm496_vm0, %v382_v16  ;;  %v9467_v40 = vadd.f32 %v5505_v20, %v5504_v2  ;;  %v5563_v41 = vadd.f32 %v5562_v36, %v5561_v29  ;;  %v5570_v42 = vsel %vm496_vm0, %v450_v23, 0.0  ;;  %v5532_v46 = vrot.slane %v5531_v25, 1  ;;  %v391_v15 = vld [vmem:[%s9374_s17 + $0xb8] sm:$0xff] }
  0x71   : > { %8633 = vmatprep.subr.bf16.mxu0 %v8632_v31  ;;  %v5547_v47 = vadd.f32 %v5546_v26, %v5545_v8  ;;  %8637 = vmatprep.subr.bf16.mxu1 %v8636_v37  ;;  %v5571_v48 = vsel %vm496_vm0, %v451_v24, 0.0  ;;  %v8640_v50 = vpack.c.bf16 %v453_v33, %v452_v32  ;;  %v9476_v51 = vadd.f32 %v5514_v30, %v5513_v10  ;;  %v392_v24 = vld [vmem:[%s9374_s17 + $0xc0] sm:$0xff]  ;;  %v461_v26 = vld [vmem:[%s9381_s13 + $0xe8] sm:$0xff] }
  0x72   : > { %8103 = vmatmul.mubr.msk.f32.vlgmr.msra.gmra.mrb[6].mxu0 %vm496_vm0, %v381_v22  ;;  %8110 = vmatmul.mubr.msk.f32.vlgmr.msra.gmra.mrb[6].mxu1 %vm496_vm0, %v383_v28  ;;  %v5564_v52 = vrot.slane %v5563_v41, 4  ;;  %v5572_v53 = vadd.f32 %v5571_v48, %v5570_v42  ;;  %v5579_v55 = vsel %vm496_vm0, %v452_v32, 0.0  ;;  %v9483_v58 = vadd.f32 %v5523_v34, %v5522_v13  ;;  %v394_v32 = vld [vmem:[%s9374_s17 + $0xd0] sm:$0xff] }
  0x73   : > { %8635 = vmatpush3.bf16.msra.mxu0 %v8632_v31  ;;  %8639 = vmatpush3.bf16.msra.mxu1 %v8636_v37  ;;  %v9485_v59 = vadd.f32 %v5539_v35, %v5538_v14  ;;  %v5580_v60 = vsel %vm496_vm0, %v453_v33, 0.0  ;;  %v8644_v61 = vpack.c.bf16 %v455_v45, %v454_v44  ;;  %v5588_v2 = vsel %vm496_vm0, %v454_v44, 0.0  ;;  %v389_v14 = vld [vmem:[%s9374_s17 + $0xa8] sm:$0xff]  ;;  %v395_v44 = vld [vmem:[%s9374_s17 + $0xd8] sm:$0xff] }
  0x74   : > { %8116 = vmatprep.mubr.msk.f32.mxu0 %vm496_vm0, %v384_v38  ;;  %8123 = vmatprep.mubr.msk.f32.mxu1 %vm496_vm0, %v386_v43  ;;  %v5565_v63 = vadd.f32 %v5564_v52, %v5563_v41  ;;  %v5573_v0 = vrot.slane %v5572_v53, 4  ;;  %v5581_v1 = vadd.f32 %v5580_v60, %v5579_v55  ;;  %v9495_v6 = vadd.f32 %v5532_v46, %v5531_v25  ;;  %v460_v25 = vld [vmem:[%s9381_s13 + $0xe0] sm:$0xff]  ;;  %v393_v37 = vld [vmem:[%s9374_s17 + $0xc8] sm:$0xff]  ;;  %v462_v38 = vld [vmem:[%s9381_s13 + $0xf0] sm:$0xff] }
  0x75   : > { %8641 = vmatprep.subr.bf16.mxu0 %v8640_v50  ;;  %v5548_v7 = vrot.slane %v5547_v47, 2  ;;  %8645 = vmatprep.subr.bf16.mxu1 %v8644_v61  ;;  %v5589_v8 = vsel %vm496_vm0, %v455_v45, 0.0  ;;  %v8648_v9 = vpack.c.bf16 %v457_v57, %v456_v56  ;;  %v5541_v16 = vrot.slane %v9485_v59, 1  ;;  %v463_v41 = vld [vmem:[%s9381_s13 + $0xf8] sm:$0xff]  ;;  %v396_v52 = vld [vmem:[%s9374_s17 + $0xe0] sm:$0xff] }
  0x76   : > { %8117 = vmatmul.mubr.msk.f32.vlgmr.msra.gmra.mrb[8].mxu0 %vm496_vm0, %v385_v49  ;;  %8124 = vmatmul.mubr.msk.f32.vlgmr.msra.gmra.mrb[8].mxu1 %vm496_vm0, %v387_v54  ;;  %v5566_v10 = vrot.slane %v5565_v63, 2  ;;  %v5574_v11 = vadd.f32 %v5573_v0, %v5572_v53  ;;  %v5582_v12 = vrot.slane %v5581_v1, 4  ;;  %v5590_v13 = vadd.f32 %v5589_v8, %v5588_v2  ;;  %v397_v0 = vld [vmem:[%s9374_s17 + $0xe8] sm:$0xff] }
  0x77   : > { %8643 = vmatpush3.bf16.msra.mxu0 %v8640_v50  ;;  %8647 = vmatpush3.bf16.msra.mxu1 %v8644_v61  ;;  %v5597_v17 = vsel %vm496_vm0, %v456_v56, 0.0  ;;  %v5598_v18 = vsel %vm496_vm0, %v457_v57, 0.0  ;;  %v8652_v19 = vpack.c.bf16 %v459_v5, %v458_v4  ;;  %v9509_v28 = vadd.f32 %v5548_v7, %v5547_v47  ;;  %v398_v57 = vld [vmem:[%s9374_s17 + $0xf0] sm:$0xff]  ;;  %v400_v7 = vld [vmem:[%s9374_s17 + $0x100] sm:$0xff] }
  0x78   : > { %8130 = vmatprep.mubr.msk.f32.mxu0 %vm496_vm0, %v388_v62  ;;  %8137 = vmatprep.mubr.msk.f32.mxu1 %vm496_vm0, %v390_v3  ;;  %v5567_v20 = vadd.f32 %v5566_v10, %v5565_v63  ;;  %v5575_v21 = vrot.slane %v5574_v11, 2  ;;  %v5583_v22 = vadd.f32 %v5582_v12, %v5581_v1  ;;  %v5591_v23 = vrot.slane %v5590_v13, 4  ;;  %v399_v12 = vld [vmem:[%s9374_s17 + $0xf8] sm:$0xff] }
  0x79   : > { %8649 = vmatprep.subr.bf16.mxu0 %v8648_v9  ;;  %v5599_v29 = vadd.f32 %v5598_v18, %v5597_v17  ;;  %v5606_v30 = vsel %vm496_vm0, %v458_v4, 0.0  ;;  %v5607_v31 = vsel %vm496_vm0, %v459_v5, 0.0  ;;  %8653 = vmatprep.subr.bf16.mxu1 %v8652_v19  ;;  %v8656_v45 = vpack.c.bf16 %v461_v26, %v460_v25  ;;  %v464_v5 = vld [vmem:[%s9381_s13 + $0x100] sm:$0xff]  ;;  %v466_v18 = vld [vmem:[%s9381_s13 + $0x110] sm:$0xff] }
  0x7a   : > { %8131 = vmatmul.mubr.msk.f32.vlgmr.msra.gmra.mrb[10].mxu0 %vm496_vm0, %v389_v14  ;;  %8138 = vmatmul.mubr.msk.f32.vlgmr.msra.gmra.mrb[10].mxu1 %vm496_vm0, %v391_v15  ;;  %v5568_v33 = vrot.slane %v5567_v20, 1  ;;  %v5576_v34 = vadd.f32 %v5575_v21, %v5574_v11  ;;  %v5584_v35 = vrot.slane %v5583_v22, 2  ;;  %v5592_v36 = vadd.f32 %v5591_v23, %v5590_v13 }
  0x7b   : > { %8651 = vmatpush3.bf16.msra.mxu0 %v8648_v9  ;;  %v5600_v42 = vrot.slane %v5599_v29, 4  ;;  %v5608_v43 = vadd.f32 %v5607_v31, %v5606_v30  ;;  %8655 = vmatpush3.bf16.msra.mxu1 %v8652_v19  ;;  %v5615_v46 = vsel %vm496_vm0, %v460_v25, 0.0  ;;  %v5616_v55 = vsel %vm496_vm0, %v461_v26, 0.0  ;;  %v402_v19 = vld [vmem:[%s9374_s17 + $0x110] sm:$0xff]  ;;  %v468_v30 = vld [vmem:[%s9381_s13 + $0x120] sm:$0xff]  ;;  %v469_v31 = vld [vmem:[%s9381_s13 + $0x128] sm:$0xff] }
  0x7c   : > { %8144 = vmatprep.mubr.msk.f32.mxu0 %vm496_vm0, %v392_v24  ;;  %v5569_v47 = vadd.f32 %v5568_v33, %v5567_v20  ;;  %v5577_v48 = vrot.slane %v5576_v34, 1  ;;  %v5585_v49 = vadd.f32 %v5584_v35, %v5583_v22  ;;  %v5593_v50 = vrot.slane %v5592_v36, 2  ;;  %8151 = vmatprep.mubr.msk.f32.mxu1 %vm496_vm0, %v394_v32 }
  0x7d   : > { %v5601_v53 = vadd.f32 %v5600_v42, %v5599_v29  ;;  %v5609_v54 = vrot.slane %v5608_v43, 4  ;;  %8657 = vmatprep.subr.bf16.mxu0 %v8656_v45  ;;  %v8660_v56 = vpack.c.bf16 %v463_v41, %v462_v38  ;;  %v5617_v3 = vadd.f32 %v5616_v55, %v5615_v46  ;;  %v406_v55 = vld [vmem:[%s9374_s17 + $0x130] sm:$0xff] }
  0x7e   : > { %8145 = vmatmul.mubr.msk.f32.vlgmr.msra.gmra.mrb[12].mxu0 %vm496_vm0, %v393_v37  ;;  %v9528_v60 = vadd.f32 %v5569_v47, %v9465_v39  ;;  %v5578_v61 = vadd.f32 %v5577_v48, %v5576_v34  ;;  %v5586_v62 = vrot.slane %v5585_v49, 1  ;;  %v5594_v63 = vadd.f32 %v5593_v50, %v5592_v36  ;;  %8152 = vmatmul.mubr.msk.f32.vlgmr.msra.gmra.mrb[12].mxu1 %vm496_vm0, %v395_v44  ;;  %v465_v39 = vld [vmem:[%s9381_s13 + $0x108] sm:$0xff] }
  0x7f   : > { %8659 = vmatpush3.bf16.msra.mxu0 %v8656_v45  ;;  %v5602_v1 = vrot.slane %v5601_v53, 2  ;;  %v5610_v2 = vadd.f32 %v5609_v54, %v5608_v43  ;;  %8661 = vmatprep.subr.bf16.mxu1 %v8660_v56  ;;  %v5624_v4 = vsel %vm496_vm0, %v462_v38, 0.0  ;;  %v5625_v11 = vsel %vm496_vm0, %v463_v41, 0.0  ;;  %v401_v37 = vld [vmem:[%s9374_s17 + $0x108] sm:$0xff]  ;;  %v470_v38 = vld [vmem:[%s9381_s13 + $0x130] sm:$0xff]  ;;  %v471_v41 = vld [vmem:[%s9381_s13 + $0x138] sm:$0xff] }
  0x80   : > { %8158 = vmatprep.mubr.msk.f32.mxu0 %vm496_vm0, %v396_v52  ;;  %v9538_v8 = vadd.f32 %v5578_v61, %v9467_v40  ;;  %v5587_v9 = vadd.f32 %v5586_v62, %v5585_v49  ;;  %v5595_v10 = vrot.slane %v5594_v63, 1  ;;  %8663 = vmatpush3.bf16.msra.mxu1 %v8660_v56  ;;  %v5618_v15 = vrot.slane %v5617_v3, 4  ;;  %v467_v40 = vld [vmem:[%s9381_s13 + $0x118] sm:$0xff]  ;;  %v404_v45 = vld [vmem:[%s9374_s17 + $0x120] sm:$0xff]  ;;  %v405_v62 = vld [vmem:[%s9374_s17 + $0x128] sm:$0xff] }
  0x81   : > { %8165 = vmatprep.mubr.msk.f32.mxu1 %vm496_vm0, %v398_v57  ;;  %v5603_v13 = vadd.f32 %v5602_v1, %v5601_v53  ;;  %v5611_v14 = vrot.slane %v5610_v2, 2  ;;  %v9543_v17 = vadd.f32 %v5625_v11, %v5624_v4  ;;  %v5542_v20 = vadd.f32 %v5541_v16, %v9485_v59  ;;  %v403_v49 = vld [vmem:[%s9374_s17 + $0x118] sm:$0xff]  ;;  %v408_v4 = vld [vmem:[%s9374_s17 + $0x140] sm:$0xff] }
  0x82   : > { %8159 = vmatmul.mubr.msk.f32.vlgmr.msra.gmra.mrb[14].mxu0 %vm496_vm0, %v397_v0  ;;  %v9553_v21 = vadd.f32 %v5587_v9, %v9476_v51  ;;  %v5596_v22 = vadd.f32 %v5595_v10, %v5594_v63  ;;  %v8664_v23 = vpack.c.bf16 %v465_v39, %v464_v5  ;;  %v5619_v26 = vadd.f32 %v5618_v15, %v5617_v3  ;;  %v472_v63 = vld [vmem:[%s9381_s13 + $0x140] sm:$0xff]  ;;  %v473_v0 = vld [vmem:[%s9381_s13 + $0x148] sm:$0xff]  ;;  %v407_v9 = vld [vmem:[%s9374_s17 + $0x138] sm:$0xff] }
  0x83   : > { %8172 = vmatprep.mubr.msk.f32.mxu0 %vm496_vm0, %v400_v7  ;;  %v5604_v24 = vrot.slane %v5603_v13, 1  ;;  %v5612_v25 = vadd.f32 %v5611_v14, %v5610_v2  ;;  %8166 = vmatmul.mubr.msk.f32.vlgmr.msra.gmra.mrb[14].mxu1 %vm496_vm0, %v399_v12  ;;  %v5633_v29 = vsel %vm496_vm0, %v464_v5, 0.0  ;;  %v5550_v59 = vrot.slane %v9509_v28, 1  ;;  %v474_v10 = vld [vmem:[%s9381_s13 + $0x150] sm:$0xff]  ;;  %v475_v11 = vld [vmem:[%s9381_s13 + $0x158] sm:$0xff] }
  0x84   : > { %v9562_v51 = vadd.f32 %v5596_v22, %v9483_v58  ;;  %8665 = vmatprep.subr.bf16.mxu0 %v8664_v23  ;;  %v5634_v16 = vsel %vm496_vm0, %v465_v39, 0.0  ;;  %v8668_v32 = vpack.c.bf16 %v467_v40, %v466_v18  ;;  %8179 = vmatprep.mubr.msk.f32.mxu1 %vm496_vm0, %v402_v19  ;;  %v5620_v35 = vrot.slane %v5619_v26, 2  ;;  %v476_v22 = vld [vmem:[%s9381_s13 + $0x160] sm:$0xff] }
  0x85   : > { %v5605_v33 = vadd.f32 %v5604_v24, %v5603_v13  ;;  %v5613_v34 = vrot.slane %v5612_v25, 1  ;;  %v5642_v36 = vsel %vm496_vm0, %v466_v18, 0.0  ;;  %8667 = vmatpush3.bf16.msra.mxu0 %v8664_v23  ;;  %v5635_v42 = vadd.f32 %v5634_v16, %v5633_v29  ;;  %v410_v18 = vld [vmem:[%s9374_s17 + $0x150] sm:$0xff]  ;;  %v477_v23 = vld [vmem:[%s9381_s13 + $0x168] sm:$0xff] }
  0x86   : > { %8669 = vmatprep.subr.bf16.mxu1 %v8668_v32  ;;  %v5643_v58 = vsel %vm496_vm0, %v467_v40, 0.0  ;;  %v8672_v43 = vpack.c.bf16 %v469_v31, %v468_v30  ;;  %v5651_v44 = vsel %vm496_vm0, %v468_v30, 0.0  ;;  %v5621_v48 = vadd.f32 %v5620_v35, %v5619_v26 }
  0x87   : > { %v9574_v46 = vadd.f32 %v5605_v33, %v9495_v6  ;;  %v5614_v47 = vadd.f32 %v5613_v34, %v5612_v25  ;;  %8671 = vmatpush3.bf16.msra.mxu1 %v8668_v32  ;;  %v5636_v50 = vrot.slane %v5635_v42, 4  ;;  %v5644_v52 = vadd.f32 %v5643_v58, %v5642_v36  ;;  %v409_v32 = vld [vmem:[%s9374_s17 + $0x148] sm:$0xff] }
  0x88   : > { %8173 = vmatmul.mubr.msk.f32.vlgmr.msra.gmra.mrb[16].mxu0 %vm496_vm0, %v401_v37  ;;  %8673 = vmatprep.subr.bf16.mxu0 %v8672_v43  ;;  %v5652_v53 = vsel %vm496_vm0, %v469_v31, 0.0  ;;  %v8676_v54 = vpack.c.bf16 %v471_v41, %v470_v38  ;;  %v5551_v6 = vadd.f32 %v5550_v59, %v9509_v28  ;;  %v5622_v57 = vrot.slane %v5621_v48, 1  ;;  %v412_v37 = vld [vmem:[%s9374_s17 + $0x160] sm:$0xff] }
  0x89   : > { %v9581_v56 = vadd.f32 %v5614_v47, %v5542_v20  ;;  %v5653_v61 = vadd.f32 %v5652_v53, %v5651_v44  ;;  %8675 = vmatpush3.bf16.msra.mxu0 %v8672_v43  ;;  %8186 = vmatprep.mubr.msk.f32.mxu0 %vm496_vm0, %v404_v45  ;;  %v5637_v1 = vadd.f32 %v5636_v50, %v5635_v42  ;;  %v5645_v2 = vrot.slane %v5644_v52, 4  ;;  %v411_v43 = vld [vmem:[%s9374_s17 + $0x158] sm:$0xff]  ;;  %v478_v44 = vld [vmem:[%s9381_s13 + $0x170] sm:$0xff] }
  0x8a   : > { %8180 = vmatmul.mubr.msk.f32.vlgmr.msra.gmra.mrb[16].mxu1 %vm496_vm0, %v403_v49  ;;  %8677 = vmatprep.subr.bf16.mxu1 %v8676_v54  ;;  %v5660_v28 = vsel %vm496_vm0, %v470_v38, 0.0  ;;  %v5661_v3 = vsel %vm496_vm0, %v471_v41, 0.0  ;;  %v5623_v5 = vadd.f32 %v5622_v57, %v5621_v48  ;;  %v8680_v14 = vpack.c.bf16 %v473_v0, %v472_v63  ;;  %v479_v45 = vld [vmem:[%s9381_s13 + $0x178] sm:$0xff]  ;;  %v413_v57 = vld [vmem:[%s9374_s17 + $0x168] sm:$0xff] }
  0x8b   : > { %v5654_v39 = vrot.slane %v5653_v61, 4  ;;  %v5662_v7 = vadd.f32 %v5661_v3, %v5660_v28  ;;  %8679 = vmatpush3.bf16.msra.mxu1 %v8676_v54  ;;  %8193 = vmatprep.mubr.msk.f32.mxu1 %vm496_vm0, %v406_v55  ;;  %v5638_v12 = vrot.slane %v5637_v1, 2  ;;  %v5646_v13 = vadd.f32 %v5645_v2, %v5644_v52  ;;  %v414_v52 = vld [vmem:[%s9374_s17 + $0x170] sm:$0xff] }
  0x8c   : > { %8187 = vmatmul.mubr.msk.f32.vlgmr.msra.gmra.mrb[18].mxu0 %vm496_vm0, %v405_v62  ;;  %v5669_v15 = vsel %vm496_vm0, %v472_v63, 0.0  ;;  %v9598_v40 = vadd.f32 %v5623_v5, %v5551_v6  ;;  %8681 = vmatprep.subr.bf16.mxu0 %v8680_v14  ;;  %v5670_v26 = vsel %vm496_vm0, %v473_v0, 0.0  ;;  %v8684_v29 = vpack.c.bf16 %v475_v11, %v474_v10  ;;  %v480_v5 = vld [vmem:[%s9381_s13 + $0x180] sm:$0xff] }
  0x8d   : > { %v5655_v19 = vadd.f32 %v5654_v39, %v5653_v61  ;;  %v5663_v20 = vrot.slane %v5662_v7, 4  ;;  %8200 = vmatprep.mubr.msk.f32.mxu0 %vm496_vm0, %v408_v4  ;;  %v5639_v24 = vadd.f32 %v5638_v12, %v5637_v1  ;;  %v5647_v25 = vrot.slane %v5646_v13, 2  ;;  %8683 = vmatpush3.bf16.msra.mxu0 %v8680_v14  ;;  %v416_v1 = vld [vmem:[%s9374_s17 + $0x180] sm:$0xff]  ;;  %v481_v39 = vld [vmem:[%s9381_s13 + $0x188] sm:$0xff]  ;;  %v415_v14 = vld [vmem:[%s9374_s17 + $0x178] sm:$0xff] }
  0x8e   : > { %8194 = vmatmul.mubr.msk.f32.vlgmr.msra.gmra.mrb[18].mxu1 %vm496_vm0, %v407_v9  ;;  %v5671_v59 = vadd.f32 %v5670_v26, %v5669_v15  ;;  %v5678_v16 = vsel %vm496_vm0, %v474_v10, 0.0  ;;  %8685 = vmatprep.subr.bf16.mxu1 %v8684_v29  ;;  %v5679_v35 = vsel %vm496_vm0, %v475_v11, 0.0  ;;  %v8688_v36 = vpack.c.bf16 %v477_v23, %v476_v22  ;;  %v482_v15 = vld [vmem:[%s9381_s13 + $0x190] sm:$0xff] }
  0x8f   : > { %v5656_v30 = vrot.slane %v5655_v19, 2  ;;  %v5664_v31 = vadd.f32 %v5663_v20, %v5662_v7  ;;  %8207 = vmatprep.mubr.msk.f32.mxu1 %vm496_vm0, %v410_v18  ;;  %v5640_v33 = vrot.slane %v5639_v24, 1  ;;  %v5648_v34 = vadd.f32 %v5647_v25, %v5646_v13  ;;  %8687 = vmatpush3.bf16.msra.mxu1 %v8684_v29 }
  0x90   : > { %v5672_v42 = vrot.slane %v5671_v59, 4  ;;  %v5680_v58 = vadd.f32 %v5679_v35, %v5678_v16  ;;  %8201 = vmatmul.mubr.msk.f32.vlgmr.msra.gmra.mrb[20].mxu0 %vm496_vm0, %v409_v32  ;;  %8689 = vmatprep.subr.bf16.mxu0 %v8688_v36  ;;  %v5687_v49 = vsel %vm496_vm0, %v476_v22, 0.0  ;;  %v5688_v50 = vsel %vm496_vm0, %v477_v23, 0.0  ;;  %v418_v22 = vld [vmem:[%s9374_s17 + $0x190] sm:$0xff] }
  0x91   : > { %v5657_v38 = vadd.f32 %v5656_v30, %v5655_v19  ;;  %v5665_v41 = vrot.slane %v5664_v31, 2  ;;  %v5641_v47 = vadd.f32 %v5640_v33, %v5639_v24  ;;  %v5649_v48 = vrot.slane %v5648_v34, 1  ;;  %8691 = vmatpush3.bf16.msra.mxu0 %v8688_v36  ;;  %8214 = vmatprep.mubr.msk.f32.mxu0 %vm496_vm0, %v412_v37  ;;  %v484_v30 = vld [vmem:[%s9381_s13 + $0x1a0] sm:$0xff]  ;;  %v417_v33 = vld [vmem:[%s9374_s17 + $0x188] sm:$0xff]  ;;  %v486_v36 = vld [vmem:[%s9381_s13 + $0x1b0] sm:$0xff] }
  0x92   : > { %v5673_v55 = vadd.f32 %v5672_v42, %v5671_v59  ;;  %v5681_v6 = vrot.slane %v5680_v58, 4  ;;  %8208 = vmatmul.mubr.msk.f32.vlgmr.msra.gmra.mrb[20].mxu1 %vm496_vm0, %v411_v43  ;;  %v9623_v63 = vadd.f32 %v5688_v50, %v5687_v49  ;;  %v8692_v0 = vpack.c.bf16 %v479_v45, %v478_v44  ;;  %v487_v37 = vld [vmem:[%s9381_s13 + $0x1b8] sm:$0xff]  ;;  %v488_v49 = vld [vmem:[%s9381_s13 + $0x1c0] sm:$0xff]  ;;  %v489_v50 = vld [vmem:[%s9381_s13 + $0x1c8] sm:$0xff] }
  0x93   : > { %v5658_v53 = vrot.slane %v5657_v38, 1  ;;  %v5666_v54 = vadd.f32 %v5665_v41, %v5664_v31  ;;  %v9620_v61 = vadd.f32 %v9528_v60, %v5641_v47  ;;  %v5650_v62 = vadd.f32 %v5649_v48, %v5648_v34  ;;  %8221 = vmatprep.mubr.msk.f32.mxu1 %vm496_vm0, %v414_v52  ;;  %v485_v31 = vld [vmem:[%s9381_s13 + $0x1a8] sm:$0xff]  ;;  %v422_v48 = vld [vmem:[%s9374_s17 + $0x1b0] sm:$0xff] }
  0x94   : > { %v5674_v3 = vrot.slane %v5673_v55, 2  ;;  %v5682_v4 = vadd.f32 %v5681_v6, %v5680_v58  ;;  %8693 = vmatprep.subr.bf16.mxu1 %v8692_v0  ;;  %v5696_v7 = vsel %vm496_vm0, %v478_v44, 0.0  ;;  %v5697_v9 = vsel %vm496_vm0, %v479_v45, 0.0  ;;  %8215 = vmatmul.mubr.msk.f32.vlgmr.msra.gmra.mrb[22].mxu0 %vm496_vm0, %v413_v57  ;;  %v419_v58 = vld [vmem:[%s9374_s17 + $0x198] sm:$0xff]  ;;  %v421_v57 = vld [vmem:[%s9374_s17 + $0x1a8] sm:$0xff] }
  0x95   : > { %v5659_v2 = vadd.f32 %v5658_v53, %v5657_v38  ;;  %v5667_v28 = vrot.slane %v5666_v54, 1  ;;  %v9630_v60 = vadd.f32 %v9538_v8, %v5650_v62  ;;  %8695 = vmatpush3.bf16.msra.mxu1 %v8692_v0  ;;  %v483_v8 = vld [vmem:[%s9381_s13 + $0x198] sm:$0xff]  ;;  %8228 = vmatprep.mubr.msk.f32.mxu0 %vm496_vm0, %v416_v1  ;;  %v9642_v18 = vadd.f32 %v5697_v9, %v5696_v7  ;;  %v420_v38 = vld [vmem:[%s9374_s17 + $0x1a0] sm:$0xff] }
  0x96   : > { %v5675_v12 = vadd.f32 %v5674_v3, %v5673_v55  ;;  %v5683_v13 = vrot.slane %v5682_v4, 2  ;;  %v8696_v19 = vpack.c.bf16 %v481_v39, %v480_v5  ;;  %v5705_v20 = vsel %vm496_vm0, %v480_v5, 0.0  ;;  %v491_v62 = vld [vmem:[%s9381_s13 + $0x1d8] sm:$0xff]  ;;  %v492_v9 = vld [vmem:[%s9381_s13 + $0x1e0] sm:$0xff] }
  0x97   : > { %v9636_v10 = vadd.f32 %v9553_v21, %v5659_v2  ;;  %v5668_v11 = vadd.f32 %v5667_v28, %v5666_v54  ;;  %v5706_v25 = vsel %vm496_vm0, %v481_v39, 0.0  ;;  %v8700_v29 = vpack.c.bf16 %v483_v8, %v482_v15  ;;  %v424_v28 = vld [vmem:[%s9374_s17 + $0x1c0] sm:$0xff]  ;;  %v423_v39 = vld [vmem:[%s9374_s17 + $0x1b8] sm:$0xff] }
  0x98   : > { %v5676_v23 = vrot.slane %v5675_v12, 1  ;;  %v5684_v24 = vadd.f32 %v5683_v13, %v5682_v4  ;;  %8222 = vmatmul.mubr.msk.f32.vlgmr.msra.gmra.mrb[22].mxu1 %vm496_vm0, %v415_v14  ;;  %8697 = vmatprep.subr.bf16.mxu0 %v8696_v19  ;;  %v5707_v26 = vadd.f32 %v5706_v25, %v5705_v20  ;;  %v5715_v32 = vsel %vm496_vm0, %v483_v8, 0.0  ;;  %v426_v8 = vld [vmem:[%s9374_s17 + $0x1d0] sm:$0xff] }
  0x99   : > { %v9647_v21 = vadd.f32 %v9562_v51, %v5668_v11  ;;  %v5714_v51 = vsel %vm496_vm0, %v482_v15, 0.0  ;;  %8699 = vmatpush3.bf16.msra.mxu0 %v8696_v19  ;;  %8235 = vmatprep.mubr.msk.f32.mxu1 %vm496_vm0, %v418_v22  ;;  %v8704_v43 = vpack.c.bf16 %v485_v31, %v484_v30  ;;  %v5723_v47 = vsel %vm496_vm0, %v484_v30, 0.0  ;;  %v493_v11 = vld [vmem:[%s9381_s13 + $0x1e8] sm:$0xff]  ;;  %v428_v30 = vld [vmem:[%s9374_s17 + $0x1e0] sm:$0xff] }
  0x9a   : > { %v5677_v59 = vadd.f32 %v5676_v23, %v5675_v12  ;;  %v5685_v16 = vrot.slane %v5684_v24, 1  ;;  %v5708_v34 = vrot.slane %v5707_v26, 4  ;;  %8701 = vmatprep.subr.bf16.mxu1 %v8700_v29  ;;  %v5716_v35 = vadd.f32 %v5715_v32, %v5714_v51  ;;  %v425_v23 = vld [vmem:[%s9374_s17 + $0x1c8] sm:$0xff]  ;;  %v427_v32 = vld [vmem:[%s9374_s17 + $0x1d8] sm:$0xff] }
  0x9b   : > { %8703 = vmatpush3.bf16.msra.mxu1 %v8700_v29  ;;  %8705 = vmatprep.subr.bf16.mxu0 %v8704_v43  ;;  %v8708_v53 = vpack.c.bf16 %v487_v37, %v486_v36  ;;  %v5732_v54 = vsel %vm496_vm0, %v486_v36, 0.0  ;;  %v5733_v1 = vsel %vm496_vm0, %v487_v37, 0.0  ;;  %v8712_v2 = vpack.c.bf16 %v489_v50, %v488_v49 }
  0x9c   : > { %v9661_v41 = vadd.f32 %v9574_v46, %v5677_v59  ;;  %v5686_v42 = vadd.f32 %v5685_v16, %v5684_v24  ;;  %v5709_v44 = vadd.f32 %v5708_v34, %v5707_v26  ;;  %v5717_v45 = vrot.slane %v5716_v35, 4  ;;  %8229 = vmatmul.mubr.msk.f32.vlgmr.msra.gmra.mrb[24].mxu0 %vm496_vm0, %v417_v33  ;;  %v494_v33 = vld [vmem:[%s9381_s13 + $0x1f0] sm:$0xff]  ;;  %v495_v34 = vld [vmem:[%s9381_s13 + $0x1f8] sm:$0xff] }
  0x9d   : > { %v5724_v46 = vsel %vm496_vm0, %v485_v31, 0.0  ;;  %8242 = vmatprep.mubr.msk.f32.mxu0 %vm496_vm0, %v420_v38  ;;  %8707 = vmatpush3.bf16.msra.mxu0 %v8704_v43  ;;  %v5734_v5 = vadd.f32 %v5733_v1, %v5732_v54  ;;  %v5741_v7 = vsel %vm496_vm0, %v488_v49, 0.0  ;;  %v5742_v13 = vsel %vm496_vm0, %v489_v50, 0.0 }
  0x9e   : > { %v9670_v52 = vadd.f32 %v9581_v56, %v5686_v42  ;;  %v5710_v55 = vrot.slane %v5709_v44, 2  ;;  %v5718_v6 = vadd.f32 %v5717_v45, %v5716_v35  ;;  %8236 = vmatmul.mubr.msk.f32.vlgmr.msra.gmra.mrb[24].mxu1 %vm496_vm0, %v419_v58  ;;  %v490_v56 = vld [vmem:[%s9381_s13 + $0x1d0] sm:$0xff]  ;;  %v5725_v0 = vadd.f32 %v5724_v46, %v5723_v47  ;;  %8709 = vmatprep.subr.bf16.mxu1 %v8708_v53  ;;  %v429_v45 = vld [vmem:[%s9374_s17 + $0x1e8] sm:$0xff] }
  0x9f   : > { %8249 = vmatprep.mubr.msk.f32.mxu1 %vm496_vm0, %v422_v48  ;;  %8711 = vmatpush3.bf16.msra.mxu1 %v8708_v53  ;;  %v8716_v14 = vpack.c.bf16 %v491_v62, %v490_v56  ;;  %v5750_v15 = vsel %vm496_vm0, %v490_v56, 0.0  ;;  %v5735_v22 = vrot.slane %v5734_v5, 4  ;;  %v5743_v25 = vadd.f32 %v5742_v13, %v5741_v7  ;;  %v430_v42 = vld [vmem:[%s9374_s17 + $0x1f0] sm:$0xff] }
  0xa0   : > { %v5711_v3 = vadd.f32 %v5710_v55, %v5709_v44  ;;  %v5719_v4 = vrot.slane %v5718_v6, 2  ;;  %v5726_v12 = vrot.slane %v5725_v0, 4  ;;  %8243 = vmatmul.mubr.msk.f32.vlgmr.msra.gmra.mrb[26].mxu0 %vm496_vm0, %v421_v57  ;;  %8713 = vmatprep.subr.bf16.mxu0 %v8712_v2  ;;  %v5751_v26 = vsel %vm496_vm0, %v491_v62, 0.0  ;;  %v431_v62 = vld [vmem:[%s9374_s17 + $0x1f8] sm:$0xff] }
  0xa1   : > { %8715 = vmatpush3.bf16.msra.mxu0 %v8712_v2  ;;  %8256 = vmatprep.mubr.msk.f32.mxu0 %vm496_vm0, %v424_v28  ;;  %v8720_v29 = vpack.c.bf16 %v493_v11, %v492_v9  ;;  %v5736_v16 = vadd.f32 %v5735_v22, %v5734_v5  ;;  %v9695_v51 = vadd.f32 %v5751_v26, %v5750_v15  ;;  %v5744_v36 = vrot.slane %v5743_v25, 4  ;;  %v9069_v5 = vld [vmem:[%s9374_s17 + $0x10] sm:$0xff] }
  0xa2   : > { %v5712_v19 = vrot.slane %v5711_v3, 1  ;;  %v5720_v20 = vadd.f32 %v5719_v4, %v5718_v6  ;;  %v5727_v24 = vadd.f32 %v5726_v12, %v5725_v0  ;;  %8250 = vmatmul.mubr.msk.f32.vlgmr.msra.gmra.mrb[26].mxu1 %vm496_vm0, %v423_v39  ;;  %8717 = vmatprep.subr.bf16.mxu1 %v8716_v14  ;;  %v5759_v37 = vsel %vm496_vm0, %v492_v9, 0.0 }
  0xa3   : > { %8719 = vmatpush3.bf16.msra.mxu1 %v8716_v14  ;;  %8263 = vmatprep.mubr.msk.f32.mxu1 %vm496_vm0, %v426_v8  ;;  %v5760_v38 = vsel %vm496_vm0, %v493_v11, 0.0  ;;  %v5737_v44 = vrot.slane %v5736_v16, 2  ;;  %v5745_v48 = vadd.f32 %v5744_v36, %v5743_v25  ;;  %v8724_v50 = vpack.c.bf16 %v495_v34, %v494_v33 }
  0xa4   : > { %v5713_v31 = vadd.f32 %v5712_v19, %v5711_v3  ;;  %v5721_v59 = vrot.slane %v5720_v20, 1  ;;  %v5728_v35 = vrot.slane %v5727_v24, 2  ;;  %8257 = vmatmul.mubr.msk.f32.vlgmr.msra.gmra.mrb[28].mxu0 %vm496_vm0, %v425_v23  ;;  %8721 = vmatprep.subr.bf16.mxu0 %v8720_v29  ;;  %v9711_v49 = vadd.f32 %v5760_v38, %v5759_v37 }
  0xa5   : > { %8723 = vmatpush3.bf16.msra.mxu0 %v8720_v29  ;;  %8270 = vmatprep.mubr.msk.f32.mxu0 %vm496_vm0, %v428_v30  ;;  %v5768_v53 = vsel %vm496_vm0, %v494_v33, 0.0  ;;  %v5746_v55 = vrot.slane %v5745_v48, 2  ;;  %v5769_v6 = vsel %vm496_vm0, %v495_v34, 0.0  ;;  %v9746_v33 = vld [vmem:[#allocation6 + $0x30] sm:$0xff]  ;;  %vm6445_vm6 = vcmask 1045509  }
  0xa6   : > { %v9706_v58 = vadd.f32 %v9620_v61, %v5713_v31  ;;  %v5722_v43 = vadd.f32 %v5721_v59, %v5720_v20  ;;  %v5729_v47 = vadd.f32 %v5728_v35, %v5727_v24  ;;  %8264 = vmatmul.mubr.msk.f32.vlgmr.msra.gmra.mrb[28].mxu1 %vm496_vm0, %v427_v32  ;;  %v5738_v61 = vadd.f32 %v5737_v44, %v5736_v16  ;;  %v9744_v32 = vld [vmem:[#allocation6 + $0x20] sm:$0xff]  ;;  %v9070_v44 = vld [vmem:[%s9374_s17 + $0x8] sm:$0xff] }
  0xa7   : > { %8277 = vmatprep.mubr.msk.f32.mxu1 %vm496_vm0, %v430_v42  ;;  %8725 = vmatprep.subr.bf16.mxu1 %v8724_v50  ;;  %v9720_v56 = vadd.f32 %v5769_v6, %v5768_v53  ;;  %v5747_v1 = vadd.f32 %v5746_v55, %v5745_v48  ;;  %vm6447_vm7 = vcmask 1046534   ;;  %vm6449_vm8 = vcmask 1047559  }
  0xa8   : > { %v9714_v46 = vadd.f32 %v9630_v60, %v5722_v43  ;;  %v5730_v54 = vrot.slane %v5729_v47, 1  ;;  %8271 = vmatmul.mubr.msk.f32.vlgmr.msra.gmra.mrb[30].mxu0 %vm496_vm0, %v429_v45  ;;  %v5739_v57 = vrot.slane %v5738_v61, 1  ;;  %8727 = vmatpush3.bf16.msra.mxu1 %v8724_v50  ;;  %v9068_v60 = vld [vmem:[%s9374_s17] sm:$0xff]  ;;  %vm6716_vm9 = vcmask 523264  }
  0xa9   : > { %8284 = vmatprep.mubr.msk.f32.mxu0 %vm496_vm0, %v9068_v60  ;;  %v5748_v3 = vrot.slane %v5747_v1, 1  ;;  %vm7250_vm10 = vcmask 261120   ;;  %vm7415_vm11 = vcmask 31744   ;;  %vm7434_vm12 = vcmask 39936  }
  0xaa   : > { %v5731_v0 = vadd.f32 %v5730_v54, %v5729_v47  ;;  %v5740_v2 = vadd.f32 %v5739_v57, %v5738_v61  ;;  %v9071_v61 = vld [vmem:[%s9374_s17 + $0x18] sm:$0xff]  ;;  %v8857_v54 = vpack.c.bf16 %v9746_v33, %v9744_v32  ;;  %vm7436_vm13 = vcmask 48128  }
  0xab   : > { %8278 = vmatmul.mubr.msk.f32.vlgmr.msra.gmra.mrb[30].mxu1 %vm496_vm0, %v431_v62  ;;  %v5749_v39 = vadd.f32 %v5748_v3, %v5747_v1  ;;  %vm7438_vm14 = vcmask 64512  }
  0xac   : > { %v9726_v28 = vadd.f32 %v9636_v10, %v5731_v0  ;;  %v9730_v4 = vadd.f32 %v9647_v21, %v5740_v2  ;;  %8291 = vmatprep.mubr.msk.f32.mxu1 %vm496_vm0, %v9069_v5  ;;  %v9072_v5 = vld [vmem:[%s9374_s17 + $0x20] sm:$0xff] }
  0xad   : > { %v9735_v7 = vadd.f32 %v9661_v41, %v5749_v39  ;;  %v9073_v39 = vld [vmem:[%s9374_s17 + $0x30] sm:$0xff] }
 0x139   : > { %v8062_v9 = vpop.f32.mrb[0].mxu0  ;;  %v8069_v12 = vpop.f32.mrb[0].mxu1 }
 0x13a   : > { %v5778_v11 = vsel %vm496_vm0, %v8062_v9, 0.0  ;;  %v569_v13 = vpop.f32.mrb[1].mxu0  ;;  %v5787_v10 = vsel %vm496_vm0, %v8069_v12, 0.0  ;;  %v650_v8 = vpop.f32.mrb[1].mxu1 }
 0x13b   : > { %v8728_v14 = vpack.c.bf16 %v8062_v9, %v569_v13  ;;  %v5777_v15 = vsel %vm496_vm0, %v569_v13, 0.0  ;;  %v8732_v19 = vpack.c.bf16 %v8069_v12, %v650_v8  ;;  %v5786_v20 = vsel %vm496_vm0, %v650_v8, 0.0 }
 0x13c   : > { %v5779_v21 = vadd.f32 %v5778_v11, %v5777_v15  ;;  %v5788_v22 = vadd.f32 %v5787_v10, %v5786_v20  ;;  %v9074_v20 = vld [vmem:[%s9374_s17 + $0x28] sm:$0xff] }
 0x13d   : > { %v8076_v23 = vpop.f32.mrb[2].mxu0  ;;  %8729 = vmatprep.subr.bf16.mxu0 %v8728_v14  ;;  %v8083_v25 = vpop.f32.mrb[2].mxu1  ;;  %8733 = vmatprep.subr.bf16.mxu1 %v8732_v19 }
 0x13e   : > { %v5780_v41 = vrot.slane %v5779_v21, 4  ;;  %v5796_v24 = vsel %vm496_vm0, %v8076_v23, 0.0  ;;  %v731_v26 = vpop.f32.mrb[3].mxu0  ;;  %8731 = vmatpush3.bf16.msra.mxu0 %v8728_v14  ;;  %v5789_v29 = vrot.slane %v5788_v22, 4  ;;  %v5805_v30 = vsel %vm496_vm0, %v8083_v25, 0.0  ;;  %v812_v16 = vpop.f32.mrb[3].mxu1  ;;  %8735 = vmatpush3.bf16.msra.mxu1 %v8732_v19 }
 0x13f   : > { %v8736_v31 = vpack.c.bf16 %v8076_v23, %v731_v26  ;;  %v5795_v59 = vsel %vm496_vm0, %v731_v26, 0.0  ;;  %v8740_v36 = vpack.c.bf16 %v8083_v25, %v812_v16  ;;  %v5804_v37 = vsel %vm496_vm0, %v812_v16, 0.0 }
 0x140   : > { %v5781_v34 = vadd.f32 %v5780_v41, %v5779_v21  ;;  %v5797_v35 = vadd.f32 %v5796_v24, %v5795_v59  ;;  %v5790_v38 = vadd.f32 %v5789_v29, %v5788_v22  ;;  %v5806_v42 = vadd.f32 %v5805_v30, %v5804_v37  ;;  %v9075_v22 = vld [vmem:[%s9374_s17 + $0x38] sm:$0xff] }
 0x141   : > { %v8090_v43 = vpop.f32.mrb[4].mxu0  ;;  %8285 = vmatmul.mubr.msk.f32.vlgmr.msra.gmra.mrb[32].mxu0 %vm496_vm0, %v9070_v44  ;;  %8737 = vmatprep.subr.bf16.mxu0 %v8736_v31  ;;  %v8097_v50 = vpop.f32.mrb[4].mxu1 }
 0x142   : > { %v5782_v45 = vrot.slane %v5781_v34, 2  ;;  %v5798_v47 = vrot.slane %v5797_v35, 4  ;;  %v5814_v48 = vsel %vm496_vm0, %v8090_v43, 0.0  ;;  %8292 = vmatmul.mubr.msk.f32.vlgmr.msra.gmra.mrb[32].mxu1 %vm496_vm0, %v9071_v61  ;;  %8741 = vmatprep.subr.bf16.mxu1 %v8740_v36  ;;  %v893_v53 = vpop.f32.mrb[5].mxu0  ;;  %v5791_v55 = vrot.slane %v5790_v38, 2  ;;  %v974_v60 = vpop.f32.mrb[5].mxu1 }
 0x143   : > { %v5807_v6 = vrot.slane %v5806_v42, 4  ;;  %v5823_v57 = vsel %vm496_vm0, %v8097_v50, 0.0  ;;  %v8744_v62 = vpack.c.bf16 %v8090_v43, %v893_v53  ;;  %8739 = vmatpush3.bf16.msra.mxu0 %v8736_v31  ;;  %8743 = vmatpush3.bf16.msra.mxu1 %v8740_v36  ;;  %v5813_v2 = vsel %vm496_vm0, %v893_v53, 0.0 }
 0x144   : > { %v5783_v0 = vadd.f32 %v5782_v45, %v5781_v34  ;;  %v5799_v1 = vadd.f32 %v5798_v47, %v5797_v35  ;;  %v8748_v3 = vpack.c.bf16 %v8097_v50, %v974_v60  ;;  %8298 = vmatprep.mubr.msk.f32.mxu0 %vm496_vm0, %v9072_v5  ;;  %8305 = vmatprep.mubr.msk.f32.mxu1 %vm496_vm0, %v9073_v39  ;;  %v5822_v13 = vsel %vm496_vm0, %v974_v60, 0.0  ;;  %v9076_v34 = vld [vmem:[%s9374_s17 + $0x40] sm:$0xff]  ;;  %v9078_v50 = vld [vmem:[%s9374_s17 + $0x48] sm:$0xff] }
 0x145   : > { %v5792_v9 = vadd.f32 %v5791_v55, %v5790_v38  ;;  %v5808_v11 = vadd.f32 %v5807_v6, %v5806_v42  ;;  %v5815_v12 = vadd.f32 %v5814_v48, %v5813_v2  ;;  %v8104_v10 = vpop.f32.mrb[6].mxu0  ;;  %8745 = vmatprep.subr.bf16.mxu0 %v8744_v62  ;;  %v5824_v8 = vadd.f32 %v5823_v57, %v5822_v13  ;;  %v8111_v19 = vpop.f32.mrb[6].mxu1  ;;  %v9077_v42 = vld [vmem:[%s9374_s17 + $0x50] sm:$0xff]  ;;  %v9080_v39 = vld [vmem:[%s9374_s17 + $0x60] sm:$0xff] }
 0x146   : > { %v5784_v14 = vrot.slane %v5783_v0, 1  ;;  %v5800_v15 = vrot.slane %v5799_v1, 2  ;;  %v5832_v21 = vsel %vm496_vm0, %v8104_v10, 0.0  ;;  %8299 = vmatmul.mubr.msk.f32.vlgmr.msra.gmra.mrb[34].mxu0 %vm496_vm0, %v9074_v20  ;;  %8306 = vmatmul.mubr.msk.f32.vlgmr.msra.gmra.mrb[34].mxu1 %vm496_vm0, %v9075_v22  ;;  %v1055_v23 = vpop.f32.mrb[7].mxu0  ;;  %v5841_v26 = vsel %vm496_vm0, %v8111_v19, 0.0  ;;  %v1136_v29 = vpop.f32.mrb[7].mxu1 }
 0x147   : > { %v5793_v41 = vrot.slane %v5792_v9, 1  ;;  %v5809_v24 = vrot.slane %v5808_v11, 2  ;;  %v5816_v25 = vrot.slane %v5815_v12, 4  ;;  %8749 = vmatprep.subr.bf16.mxu1 %v8748_v3  ;;  %8747 = vmatpush3.bf16.msra.mxu0 %v8744_v62  ;;  %v5825_v59 = vrot.slane %v5824_v8, 4  ;;  %v9079_v62 = vld [vmem:[%s9374_s17 + $0x58] sm:$0xff] }
 0x148   : > { %v9769_v30 = vadd.f32 %v5784_v14, %v5783_v0  ;;  %v5801_v31 = vadd.f32 %v5800_v15, %v5799_v1  ;;  %v8752_v16 = vpack.c.bf16 %v8104_v10, %v1055_v23  ;;  %8751 = vmatpush3.bf16.msra.mxu1 %v8748_v3  ;;  %8312 = vmatprep.mubr.msk.f32.mxu0 %vm496_vm0, %v9076_v34  ;;  %v5831_v38 = vsel %vm496_vm0, %v1055_v23, 0.0  ;;  %v9081_v10 = vld [vmem:[%s9374_s17 + $0x70] sm:$0xff]  ;;  %v9084_v34 = vld [vmem:[%s9374_s17 + $0x78] sm:$0xff] }
 0x149   : > { %v9773_v35 = vadd.f32 %v5793_v41, %v5792_v9  ;;  %v5810_v36 = vadd.f32 %v5809_v24, %v5808_v11  ;;  %v5817_v37 = vadd.f32 %v5816_v25, %v5815_v12  ;;  %8319 = vmatprep.mubr.msk.f32.mxu1 %vm496_vm0, %v9077_v42  ;;  %v5826_v44 = vadd.f32 %v5825_v59, %v5824_v8  ;;  %v8118_v48 = vpop.f32.mrb[8].mxu0  ;;  %v8125_v57 = vpop.f32.mrb[8].mxu1 }
 0x14a   : > { %v5802_v43 = vrot.slane %v5801_v31, 1  ;;  %v5833_v45 = vadd.f32 %v5832_v21, %v5831_v38  ;;  %v8756_v47 = vpack.c.bf16 %v8111_v19, %v1136_v29  ;;  %8313 = vmatmul.mubr.msk.f32.vlgmr.msra.gmra.mrb[36].mxu0 %vm496_vm0, %v9078_v50  ;;  %8753 = vmatprep.subr.bf16.mxu0 %v8752_v16  ;;  %v5840_v55 = vsel %vm496_vm0, %v1136_v29, 0.0  ;;  %v1217_v60 = vpop.f32.mrb[9].mxu0  ;;  %v1298_v5 = vpop.f32.mrb[9].mxu1  ;;  %v9082_v19 = vld [vmem:[%s9374_s17 + $0x68] sm:$0xff] }
 0x14b   : > { %v5811_v61 = vrot.slane %v5810_v36, 1  ;;  %v5818_v53 = vrot.slane %v5817_v37, 2  ;;  %v5850_v6 = vsel %vm496_vm0, %v8118_v48, 0.0  ;;  %8320 = vmatmul.mubr.msk.f32.vlgmr.msra.gmra.mrb[36].mxu1 %vm496_vm0, %v9079_v62  ;;  %8755 = vmatpush3.bf16.msra.mxu0 %v8752_v16  ;;  %v5827_v1 = vrot.slane %v5826_v44, 2 }
 0x14c   : > { %v9784_v0 = vadd.f32 %v5802_v43, %v5801_v31  ;;  %v5834_v2 = vrot.slane %v5833_v45, 4  ;;  %v5842_v3 = vadd.f32 %v5841_v26, %v5840_v55  ;;  %8757 = vmatprep.subr.bf16.mxu1 %v8756_v47  ;;  %8326 = vmatprep.mubr.msk.f32.mxu0 %vm496_vm0, %v9080_v39  ;;  %v5859_v12 = vsel %vm496_vm0, %v8125_v57, 0.0  ;;  %v9083_v26 = vld [vmem:[%s9374_s17 + $0x80] sm:$0xff] }
 0x14d   : > { %v9788_v9 = vadd.f32 %v5811_v61, %v5810_v36  ;;  %v5819_v11 = vadd.f32 %v5818_v53, %v5817_v37  ;;  %v8760_v13 = vpack.c.bf16 %v8118_v48, %v1217_v60  ;;  %8759 = vmatpush3.bf16.msra.mxu1 %v8756_v47  ;;  %8333 = vmatprep.mubr.msk.f32.mxu1 %vm496_vm0, %v9081_v10  ;;  %v5849_v21 = vsel %vm496_vm0, %v1217_v60, 0.0  ;;  %v8132_v24 = vpop.f32.mrb[10].mxu0  ;;  %v8139_v25 = vpop.f32.mrb[10].mxu1  ;;  %v9086_v60 = vld [vmem:[%s9374_s17 + $0x88] sm:$0xff] }
 0x14e   : > { %v5828_v14 = vadd.f32 %v5827_v1, %v5826_v44  ;;  %v5835_v15 = vadd.f32 %v5834_v2, %v5833_v45  ;;  %v5843_v8 = vrot.slane %v5842_v3, 4  ;;  %8327 = vmatmul.mubr.msk.f32.vlgmr.msra.gmra.mrb[38].mxu0 %vm496_vm0, %v9082_v19  ;;  %v5851_v22 = vadd.f32 %v5850_v6, %v5849_v21  ;;  %v1379_v36 = vpop.f32.mrb[11].mxu0  ;;  %v1460_v37 = vpop.f32.mrb[11].mxu1  ;;  %v9085_v45 = vld [vmem:[%s9374_s17 + $0x90] sm:$0xff] }
 0x14f   : > { %v5820_v20 = vrot.slane %v5819_v11, 1  ;;  %v8764_v23 = vpack.c.bf16 %v8125_v57, %v1298_v5  ;;  %v5858_v41 = vsel %vm496_vm0, %v1298_v5, 0.0  ;;  %8761 = vmatprep.subr.bf16.mxu0 %v8760_v13  ;;  %8340 = vmatprep.mubr.msk.f32.mxu0 %vm496_vm0, %v9083_v26  ;;  %v5868_v43 = vsel %vm496_vm0, %v8132_v24, 0.0 }
 0x150   : > { %v5829_v29 = vrot.slane %v5828_v14, 1  ;;  %v5836_v31 = vrot.slane %v5835_v15, 2  ;;  %v5844_v59 = vadd.f32 %v5843_v8, %v5842_v3  ;;  %v5860_v16 = vadd.f32 %v5859_v12, %v5858_v41  ;;  %8334 = vmatmul.mubr.msk.f32.vlgmr.msra.gmra.mrb[38].mxu1 %vm496_vm0, %v9084_v34  ;;  %8763 = vmatpush3.bf16.msra.mxu0 %v8760_v13  ;;  %v9087_v12 = vld [vmem:[%s9374_s17 + $0xa0] sm:$0xff]  ;;  %v9088_v8 = vld [vmem:[%s9374_s17 + $0x98] sm:$0xff] }
 0x151   : > { %v9801_v38 = vadd.f32 %v5820_v20, %v5819_v11  ;;  %v5852_v42 = vrot.slane %v5851_v22, 4  ;;  %v5877_v44 = vsel %vm496_vm0, %v8139_v25, 0.0  ;;  %8765 = vmatprep.subr.bf16.mxu1 %v8764_v23  ;;  %8347 = vmatprep.mubr.msk.f32.mxu1 %vm496_vm0, %v9085_v45  ;;  %v8768_v55 = vpack.c.bf16 %v8132_v24, %v1379_v36  ;;  %v8146_v62 = vpop.f32.mrb[12].mxu0  ;;  %v8153_v39 = vpop.f32.mrb[12].mxu1 }
 0x152   : > { %v9807_v47 = vadd.f32 %v5829_v29, %v5828_v14  ;;  %v5837_v48 = vadd.f32 %v5836_v31, %v5835_v15  ;;  %v5845_v50 = vrot.slane %v5844_v59, 2  ;;  %v5861_v61 = vrot.slane %v5860_v16, 4  ;;  %8767 = vmatpush3.bf16.msra.mxu1 %v8764_v23  ;;  %v1541_v11 = vpop.f32.mrb[13].mxu0  ;;  %v1622_v21 = vpop.f32.mrb[13].mxu1  ;;  %v9089_v29 = vld [vmem:[%s9374_s17 + $0xb0] sm:$0xff] }
 0x153   : > { %v5853_v53 = vadd.f32 %v5852_v42, %v5851_v22  ;;  %v5867_v6 = vsel %vm496_vm0, %v1379_v36, 0.0  ;;  %v8772_v57 = vpack.c.bf16 %v8139_v25, %v1460_v37  ;;  %8341 = vmatmul.mubr.msk.f32.vlgmr.msra.gmra.mrb[40].mxu0 %vm496_vm0, %v9086_v60  ;;  %v5876_v10 = vsel %vm496_vm0, %v1460_v37, 0.0  ;;  %8769 = vmatprep.subr.bf16.mxu0 %v8768_v55 }
 0x154   : > { %v5838_v1 = vrot.slane %v5837_v48, 1  ;;  %v5846_v2 = vadd.f32 %v5845_v50, %v5844_v59  ;;  %v5862_v3 = vadd.f32 %v5861_v61, %v5860_v16  ;;  %v5869_v5 = vadd.f32 %v5868_v43, %v5867_v6  ;;  %8354 = vmatprep.mubr.msk.f32.mxu0 %vm496_vm0, %v9087_v12  ;;  %8771 = vmatpush3.bf16.msra.mxu0 %v8768_v55  ;;  %v9090_v50 = vld [vmem:[%s9374_s17 + $0xa8] sm:$0xff] }
 0x155   : > { %v5854_v13 = vrot.slane %v5853_v53, 2  ;;  %v5886_v14 = vsel %vm496_vm0, %v8146_v62, 0.0  ;;  %v5895_v15 = vsel %vm496_vm0, %v8153_v39, 0.0  ;;  %8348 = vmatmul.mubr.msk.f32.vlgmr.msra.gmra.mrb[40].mxu1 %vm496_vm0, %v9088_v8  ;;  %8773 = vmatprep.subr.bf16.mxu1 %v8772_v57  ;;  %v5878_v24 = vadd.f32 %v5877_v44, %v5876_v10  ;;  %v8160_v31 = vpop.f32.mrb[14].mxu0  ;;  %v9093_v10 = vld [vmem:[%s9374_s17 + $0xd0] sm:$0xff] }
 0x156   : > { %v9819_v19 = vadd.f32 %v5838_v1, %v5837_v48  ;;  %v5847_v20 = vrot.slane %v5846_v2, 1  ;;  %v5863_v22 = vrot.slane %v5862_v3, 2  ;;  %v5870_v23 = vrot.slane %v5869_v5, 4  ;;  %8775 = vmatpush3.bf16.msra.mxu1 %v8772_v57  ;;  %8361 = vmatprep.mubr.msk.f32.mxu1 %vm496_vm0, %v9089_v29  ;;  %v1703_v37 = vpop.f32.mrb[15].mxu0  ;;  %v8167_v48 = vpop.f32.mrb[14].mxu1  ;;  %v9091_v57 = vld [vmem:[%s9374_s17 + $0xb8] sm:$0xff] }
 0x157   : > { %v5855_v41 = vadd.f32 %v5854_v13, %v5853_v53  ;;  %v8776_v25 = vpack.c.bf16 %v8146_v62, %v1541_v11  ;;  %v5885_v26 = vsel %vm496_vm0, %v1541_v11, 0.0  ;;  %v5879_v43 = vrot.slane %v5878_v24, 4  ;;  %8355 = vmatmul.mubr.msk.f32.vlgmr.msra.gmra.mrb[42].mxu0 %vm496_vm0, %v9090_v50  ;;  %v1784_v62 = vpop.f32.mrb[15].mxu1 }
 0x158   : > { %v9824_v59 = vadd.f32 %v5847_v20, %v5846_v2  ;;  %v5864_v16 = vadd.f32 %v5863_v22, %v5862_v3  ;;  %v5871_v34 = vadd.f32 %v5870_v23, %v5869_v5  ;;  %v5887_v36 = vadd.f32 %v5886_v14, %v5885_v26  ;;  %v9092_v5 = vld [vmem:[%s9374_s17 + $0xc0] sm:$0xff]  ;;  %v9094_v20 = vld [vmem:[%s9374_s17 + $0xc8] sm:$0xff] }
 0x159   : > { %v5856_v42 = vrot.slane %v5855_v41, 1  ;;  %v8780_v45 = vpack.c.bf16 %v8153_v39, %v1622_v21  ;;  %v5894_v44 = vsel %vm496_vm0, %v1622_v21, 0.0  ;;  %8777 = vmatprep.subr.bf16.mxu0 %v8776_v25  ;;  %8362 = vmatmul.mubr.msk.f32.vlgmr.msra.gmra.mrb[42].mxu1 %vm496_vm0, %v9091_v57  ;;  %v5880_v1 = vadd.f32 %v5879_v43, %v5878_v24  ;;  %v9095_v26 = vld [vmem:[%s9374_s17 + $0xe0] sm:$0xff] }
 0x15a   : > { %v5865_v61 = vrot.slane %v5864_v16, 1  ;;  %v5872_v53 = vrot.slane %v5871_v34, 2  ;;  %v5888_v55 = vrot.slane %v5887_v36, 4  ;;  %v5896_v6 = vadd.f32 %v5895_v15, %v5894_v44  ;;  %8779 = vmatpush3.bf16.msra.mxu0 %v8776_v25  ;;  %8368 = vmatprep.mubr.msk.f32.mxu0 %vm496_vm0, %v9092_v5  ;;  %v9097_v44 = vld [vmem:[%s9374_s17 + $0xf0] sm:$0xff] }
 0x15b   : > { %v5857_v60 = vadd.f32 %v5856_v42, %v5855_v41  ;;  %v5904_v2 = vsel %vm496_vm0, %v8160_v31, 0.0  ;;  %v5913_v3 = vsel %vm496_vm0, %v8167_v48, 0.0  ;;  %8781 = vmatprep.subr.bf16.mxu1 %v8780_v45  ;;  %8375 = vmatprep.mubr.msk.f32.mxu1 %vm496_vm0, %v9093_v10  ;;  %v5881_v15 = vrot.slane %v5880_v1, 2  ;;  %v8174_v25 = vpop.f32.mrb[16].mxu0 }
 0x15c   : > { %v5866_v39 = vadd.f32 %v5865_v61, %v5864_v16  ;;  %v5873_v11 = vadd.f32 %v5872_v53, %v5871_v34  ;;  %v5889_v12 = vadd.f32 %v5888_v55, %v5887_v36  ;;  %v5897_v13 = vrot.slane %v5896_v6, 4  ;;  %8783 = vmatpush3.bf16.msra.mxu1 %v8780_v45  ;;  %v9096_v34 = vld [vmem:[%s9374_s17 + $0xd8] sm:$0xff]  ;;  %v1865_v36 = vpop.f32.mrb[17].mxu0 }
 0x15d   : > { %v9838_v14 = vadd.f32 %v5857_v60, %v9769_v30  ;;  %v8784_v8 = vpack.c.bf16 %v8160_v31, %v1703_v37  ;;  %v5903_v21 = vsel %vm496_vm0, %v1703_v37, 0.0  ;;  %8369 = vmatmul.mubr.msk.f32.vlgmr.msra.gmra.mrb[44].mxu0 %vm496_vm0, %v9094_v20  ;;  %v5882_v30 = vadd.f32 %v5881_v15, %v5880_v1  ;;  %v8181_v45 = vpop.f32.mrb[16].mxu1 }
 0x15e   : > { %v9844_v22 = vadd.f32 %v5866_v39, %v9773_v35  ;;  %v5874_v23 = vrot.slane %v5873_v11, 1  ;;  %v5890_v41 = vrot.slane %v5889_v12, 2  ;;  %v5898_v24 = vadd.f32 %v5897_v13, %v5896_v6  ;;  %8382 = vmatprep.mubr.msk.f32.mxu0 %vm496_vm0, %v9095_v26  ;;  %v1946_v55 = vpop.f32.mrb[17].mxu1 }
 0x15f   : > { %v5905_v29 = vadd.f32 %v5904_v2, %v5903_v21  ;;  %v8788_v16 = vpack.c.bf16 %v8167_v48, %v1784_v62  ;;  %v5912_v31 = vsel %vm496_vm0, %v1784_v62, 0.0  ;;  %8376 = vmatmul.mubr.msk.f32.vlgmr.msra.gmra.mrb[44].mxu1 %vm496_vm0, %v9096_v34  ;;  %8785 = vmatprep.subr.bf16.mxu0 %v8784_v8  ;;  %v5883_v50 = vrot.slane %v5882_v30, 1  ;;  %v8188_v1 = vpop.f32.mrb[18].mxu0  ;;  %v9099_v21 = vld [vmem:[%s9374_s17 + $0x100] sm:$0xff]  ;;  %v9101_v34 = vld [vmem:[%s9374_s17 + $0x110] sm:$0xff] }
 0x160   : > { %v5875_v35 = vadd.f32 %v5874_v23, %v5873_v11  ;;  %v5891_v37 = vadd.f32 %v5890_v41, %v5889_v12  ;;  %v5899_v42 = vrot.slane %v5898_v24, 2  ;;  %v5914_v43 = vadd.f32 %v5913_v3, %v5912_v31  ;;  %8787 = vmatpush3.bf16.msra.mxu0 %v8784_v8  ;;  %8389 = vmatprep.mubr.msk.f32.mxu1 %vm496_vm0, %v9097_v44  ;;  %v9098_v11 = vld [vmem:[%s9374_s17 + $0xe8] sm:$0xff]  ;;  %v2027_v12 = vpop.f32.mrb[19].mxu0 }
 0x161   : > { %v5906_v61 = vrot.slane %v5905_v29, 4  ;;  %v5922_v48 = vsel %vm496_vm0, %v8174_v25, 0.0  ;;  %v5931_v53 = vsel %vm496_vm0, %v8181_v45, 0.0  ;;  %8789 = vmatprep.subr.bf16.mxu1 %v8788_v16  ;;  %v5884_v2 = vadd.f32 %v5883_v50, %v5882_v30  ;;  %v8195_v8 = vpop.f32.mrb[18].mxu1 }
 0x162   : > { %v9856_v6 = vadd.f32 %v5875_v35, %v9784_v0  ;;  %v5892_v57 = vrot.slane %v5891_v37, 1  ;;  %v5900_v62 = vadd.f32 %v5899_v42, %v5898_v24  ;;  %v5915_v60 = vrot.slane %v5914_v43, 4  ;;  %8791 = vmatpush3.bf16.msra.mxu1 %v8788_v16  ;;  %v2108_v26 = vpop.f32.mrb[19].mxu1 }
 0x163   : > { %v5907_v3 = vadd.f32 %v5906_v61, %v5905_v29  ;;  %v8792_v5 = vpack.c.bf16 %v8174_v25, %v1865_v36  ;;  %v5921_v39 = vsel %vm496_vm0, %v1865_v36, 0.0  ;;  %8383 = vmatmul.mubr.msk.f32.vlgmr.msra.gmra.mrb[46].mxu0 %vm496_vm0, %v9098_v11  ;;  %v9864_v20 = vadd.f32 %v5884_v2, %v9788_v9  ;;  %v9100_v25 = vld [vmem:[%s9374_s17 + $0xf8] sm:$0xff]  ;;  %v8202_v44 = vpop.f32.mrb[20].mxu0 }
 0x164   : > { %v5893_v13 = vadd.f32 %v5892_v57, %v5891_v37  ;;  %v5901_v10 = vrot.slane %v5900_v62, 1  ;;  %v5916_v0 = vadd.f32 %v5915_v60, %v5914_v43  ;;  %v5923_v15 = vadd.f32 %v5922_v48, %v5921_v39  ;;  %8396 = vmatprep.mubr.msk.f32.mxu0 %vm496_vm0, %v9099_v21  ;;  %v2189_v57 = vpop.f32.mrb[21].mxu0 }
 0x165   : > { %v5908_v23 = vrot.slane %v5907_v3, 2  ;;  %v8796_v41 = vpack.c.bf16 %v8181_v45, %v1946_v55  ;;  %v5930_v24 = vsel %vm496_vm0, %v1946_v55, 0.0  ;;  %8390 = vmatmul.mubr.msk.f32.vlgmr.msra.gmra.mrb[46].mxu1 %vm496_vm0, %v9100_v25  ;;  %8793 = vmatprep.subr.bf16.mxu0 %v8792_v5  ;;  %v5940_v35 = vsel %vm496_vm0, %v8188_v1, 0.0 }
 0x166   : > { %v9870_v30 = vadd.f32 %v5893_v13, %v9801_v38  ;;  %v5902_v29 = vadd.f32 %v5901_v10, %v5900_v62  ;;  %v5917_v16 = vrot.slane %v5916_v0, 2  ;;  %v5924_v31 = vrot.slane %v5923_v15, 4  ;;  %8795 = vmatpush3.bf16.msra.mxu0 %v8792_v5  ;;  %8403 = vmatprep.mubr.msk.f32.mxu1 %vm496_vm0, %v9101_v34  ;;  %v9104_v13 = vld [vmem:[%s9374_s17 + $0x118] sm:$0xff] }
 0x167   : > { %v5909_v9 = vadd.f32 %v5908_v23, %v5907_v3  ;;  %v5932_v36 = vadd.f32 %v5931_v53, %v5930_v24  ;;  %v5949_v37 = vsel %vm496_vm0, %v8195_v8, 0.0  ;;  %8797 = vmatprep.subr.bf16.mxu1 %v8796_v41  ;;  %v8800_v45 = vpack.c.bf16 %v8188_v1, %v2027_v12  ;;  %v9102_v53 = vld [vmem:[%s9374_s17 + $0x108] sm:$0xff]  ;;  %v8209_v3 = vpop.f32.mrb[20].mxu1  ;;  %v9103_v1 = vld [vmem:[%s9374_s17 + $0x120] sm:$0xff]  ;;  %v8216_v23 = vpop.f32.mrb[22].mxu0 }
 0x168   : > { %v9877_v42 = vadd.f32 %v5902_v29, %v9807_v47  ;;  %v5918_v38 = vadd.f32 %v5917_v16, %v5916_v0  ;;  %v5925_v43 = vadd.f32 %v5924_v31, %v5923_v15  ;;  %8799 = vmatpush3.bf16.msra.mxu1 %v8796_v41  ;;  %v5939_v48 = vsel %vm496_vm0, %v2027_v12, 0.0  ;;  %v2270_v10 = vpop.f32.mrb[21].mxu1  ;;  %v9105_v29 = vld [vmem:[%s9374_s17 + $0x130] sm:$0xff]  ;;  %v2351_v16 = vpop.f32.mrb[23].mxu0 }
 0x169   : > { %v5910_v50 = vrot.slane %v5909_v9, 1  ;;  %v5933_v61 = vrot.slane %v5932_v36, 4  ;;  %v8804_v55 = vpack.c.bf16 %v8195_v8, %v2108_v26  ;;  %8397 = vmatmul.mubr.msk.f32.vlgmr.msra.gmra.mrb[48].mxu0 %vm496_vm0, %v9102_v53  ;;  %v5941_v47 = vadd.f32 %v5940_v35, %v5939_v48  ;;  %8801 = vmatprep.subr.bf16.mxu0 %v8800_v45 }
 0x16a   : > { %v5919_v62 = vrot.slane %v5918_v38, 1  ;;  %v5926_v60 = vrot.slane %v5925_v43, 2  ;;  %v5948_v2 = vsel %vm496_vm0, %v2108_v26, 0.0  ;;  %8410 = vmatprep.mubr.msk.f32.mxu0 %vm496_vm0, %v9103_v1  ;;  %v5958_v12 = vsel %vm496_vm0, %v8202_v44, 0.0  ;;  %8803 = vmatpush3.bf16.msra.mxu0 %v8800_v45 }
 0x16b   : > { %v5911_v5 = vadd.f32 %v5910_v50, %v5909_v9  ;;  %v5934_v39 = vadd.f32 %v5933_v61, %v5932_v36  ;;  %v5950_v11 = vadd.f32 %v5949_v37, %v5948_v2  ;;  %8404 = vmatmul.mubr.msk.f32.vlgmr.msra.gmra.mrb[48].mxu1 %vm496_vm0, %v9104_v13  ;;  %8805 = vmatprep.subr.bf16.mxu1 %v8804_v55  ;;  %v5942_v8 = vrot.slane %v5941_v47, 4  ;;  %v8223_v48 = vpop.f32.mrb[22].mxu1 }
 0x16c   : > { %v5920_v0 = vadd.f32 %v5919_v62, %v5918_v38  ;;  %v5927_v15 = vadd.f32 %v5926_v60, %v5925_v43  ;;  %v5967_v21 = vsel %vm496_vm0, %v8209_v3, 0.0  ;;  %8807 = vmatpush3.bf16.msra.mxu1 %v8804_v55  ;;  %v8808_v26 = vpack.c.bf16 %v8202_v44, %v2189_v57  ;;  %8417 = vmatprep.mubr.msk.f32.mxu1 %vm496_vm0, %v9105_v29  ;;  %v9106_v43 = vld [vmem:[%s9374_s17 + $0x128] sm:$0xff]  ;;  %v2432_v60 = vpop.f32.mrb[23].mxu1 }
 0x16d   : > { %v9890_v41 = vadd.f32 %v5911_v5, %v9819_v19  ;;  %v5935_v24 = vrot.slane %v5934_v39, 2  ;;  %v5951_v25 = vrot.slane %v5950_v11, 4  ;;  %v5943_v9 = vadd.f32 %v5942_v8, %v5941_v47  ;;  %8411 = vmatmul.mubr.msk.f32.vlgmr.msra.gmra.mrb[50].mxu0 %vm496_vm0, %v9106_v43  ;;  %v9108_v5 = vld [vmem:[%s9374_s17 + $0x140] sm:$0xff] }
 0x16e   : > { %v9895_v31 = vadd.f32 %v5920_v0, %v9824_v59  ;;  %v5928_v34 = vrot.slane %v5927_v15, 1  ;;  %v5957_v36 = vsel %vm496_vm0, %v2189_v57, 0.0  ;;  %v8812_v19 = vpack.c.bf16 %v8209_v3, %v2270_v10  ;;  %v9107_v59 = vld [vmem:[%s9374_s17 + $0x138] sm:$0xff]  ;;  %8809 = vmatprep.subr.bf16.mxu0 %v8808_v26  ;;  %8424 = vmatprep.mubr.msk.f32.mxu0 %vm496_vm0, %v9108_v5  ;;  %v9115_v5 = vld [vmem:[%s9374_s17 + $0x180] sm:$0xff] }
 0x16f   : > { %v5936_v35 = vadd.f32 %v5935_v24, %v5934_v39  ;;  %v5952_v37 = vadd.f32 %v5951_v25, %v5950_v11  ;;  %v5959_v38 = vadd.f32 %v5958_v12, %v5957_v36  ;;  %v5944_v44 = vrot.slane %v5943_v9, 2  ;;  %8418 = vmatmul.mubr.msk.f32.vlgmr.msra.gmra.mrb[50].mxu1 %vm496_vm0, %v9107_v59  ;;  %8811 = vmatpush3.bf16.msra.mxu0 %v8808_v26 }
 0x170   : > { %v5929_v45 = vadd.f32 %v5928_v34, %v5927_v15  ;;  %v5966_v50 = vsel %vm496_vm0, %v2270_v10, 0.0  ;;  %v5976_v61 = vsel %vm496_vm0, %v8216_v23, 0.0  ;;  %8813 = vmatprep.subr.bf16.mxu1 %v8812_v19  ;;  %v5985_v3 = vsel %vm496_vm0, %v8223_v48, 0.0  ;;  %v9109_v10 = vld [vmem:[%s9374_s17 + $0x150] sm:$0xff]  ;;  %v9111_v34 = vld [vmem:[%s9374_s17 + $0x158] sm:$0xff] }
 0x171   : > { %v5937_v55 = vrot.slane %v5936_v35, 1  ;;  %v5953_v53 = vrot.slane %v5952_v37, 2  ;;  %v5960_v57 = vrot.slane %v5959_v38, 4  ;;  %v5968_v62 = vadd.f32 %v5967_v21, %v5966_v50  ;;  %8815 = vmatpush3.bf16.msra.mxu1 %v8812_v19  ;;  %8431 = vmatprep.mubr.msk.f32.mxu1 %vm496_vm0, %v9109_v10  ;;  %v8230_v21 = vpop.f32.mrb[24].mxu0  ;;  %v9112_v19 = vld [vmem:[%s9374_s17 + $0x160] sm:$0xff] }
 0x172   : > { %v9905_v47 = vadd.f32 %v9838_v14, %v5929_v45  ;;  %v5945_v2 = vadd.f32 %v5944_v44, %v5943_v9  ;;  %v8816_v1 = vpack.c.bf16 %v8216_v23, %v2351_v16  ;;  %v5975_v14 = vsel %vm496_vm0, %v2351_v16, 0.0  ;;  %v9110_v23 = vld [vmem:[%s9374_s17 + $0x148] sm:$0xff]  ;;  %v2513_v9 = vpop.f32.mrb[25].mxu0 }
 0x173   : > { %v5938_v39 = vadd.f32 %v5937_v55, %v5936_v35  ;;  %v5954_v11 = vadd.f32 %v5953_v53, %v5952_v37  ;;  %v5961_v12 = vadd.f32 %v5960_v57, %v5959_v38  ;;  %v5969_v13 = vrot.slane %v5968_v62, 4  ;;  %8425 = vmatmul.mubr.msk.f32.vlgmr.msra.gmra.mrb[52].mxu0 %vm496_vm0, %v9110_v23  ;;  %v8237_v38 = vpop.f32.mrb[24].mxu1  ;;  %v9114_v57 = vld [vmem:[%s9374_s17 + $0x168] sm:$0xff] }
 0x174   : > { %v5946_v0 = vrot.slane %v5945_v2, 1  ;;  %v8820_v15 = vpack.c.bf16 %v8223_v48, %v2432_v60  ;;  %v5984_v8 = vsel %vm496_vm0, %v2432_v60, 0.0  ;;  %8817 = vmatprep.subr.bf16.mxu0 %v8816_v1  ;;  %8432 = vmatmul.mubr.msk.f32.vlgmr.msra.gmra.mrb[52].mxu1 %vm496_vm0, %v9111_v34  ;;  %v5977_v36 = vadd.f32 %v5976_v61, %v5975_v14  ;;  %v2594_v50 = vpop.f32.mrb[25].mxu1  ;;  %v9113_v48 = vld [vmem:[%s9374_s17 + $0x170] sm:$0xff] }
 0x175   : > { %v9917_v24 = vadd.f32 %v9844_v22, %v5938_v39  ;;  %v5955_v25 = vrot.slane %v5954_v11, 1  ;;  %v5962_v26 = vrot.slane %v5961_v12, 2  ;;  %v5970_v29 = vadd.f32 %v5969_v13, %v5968_v62  ;;  %8819 = vmatpush3.bf16.msra.mxu0 %v8816_v1  ;;  %8438 = vmatprep.mubr.msk.f32.mxu0 %vm496_vm0, %v9112_v19  ;;  %v8244_v1 = vpop.f32.mrb[26].mxu0  ;;  %v9116_v13 = vld [vmem:[%s9374_s17 + $0x178] sm:$0xff] }
 0x176   : > { %v5947_v16 = vadd.f32 %v5946_v0, %v5945_v2  ;;  %v5986_v35 = vadd.f32 %v5985_v3, %v5984_v8  ;;  %v5994_v37 = vsel %vm496_vm0, %v8230_v21, 0.0  ;;  %8821 = vmatprep.subr.bf16.mxu1 %v8820_v15  ;;  %v6003_v44 = vsel %vm496_vm0, %v8237_v38, 0.0  ;;  %8445 = vmatprep.mubr.msk.f32.mxu1 %vm496_vm0, %v9113_v48  ;;  %v2675_v10 = vpop.f32.mrb[27].mxu0  ;;  %v8251_v8 = vpop.f32.mrb[26].mxu1 }
 0x177   : > { %v5956_v22 = vadd.f32 %v5955_v25, %v5954_v11  ;;  %v5963_v43 = vadd.f32 %v5962_v26, %v5961_v12  ;;  %v5971_v45 = vrot.slane %v5970_v29, 2  ;;  %8823 = vmatpush3.bf16.msra.mxu1 %v8820_v15  ;;  %v5978_v59 = vrot.slane %v5977_v36, 4  ;;  %v2756_v34 = vpop.f32.mrb[27].mxu1 }
 0x178   : > { %v9928_v61 = vadd.f32 %v9856_v6, %v5947_v16  ;;  %v5987_v55 = vrot.slane %v5986_v35, 4  ;;  %v8824_v53 = vpack.c.bf16 %v8230_v21, %v2513_v9  ;;  %8439 = vmatmul.mubr.msk.f32.vlgmr.msra.gmra.mrb[54].mxu0 %vm496_vm0, %v9114_v57  ;;  %v5993_v3 = vsel %vm496_vm0, %v2513_v9, 0.0  ;;  %v9117_v21 = vld [vmem:[%s9374_s17 + $0x190] sm:$0xff] }
 0x179   : > { %v9933_v62 = vadd.f32 %v9864_v20, %v5956_v22  ;;  %v5964_v60 = vrot.slane %v5963_v43, 1  ;;  %v5972_v2 = vadd.f32 %v5971_v45, %v5970_v29  ;;  %8452 = vmatprep.mubr.msk.f32.mxu0 %vm496_vm0, %v9115_v5  ;;  %v5979_v6 = vadd.f32 %v5978_v59, %v5977_v36  ;;  %v8265_v59 = vpop.f32.mrb[28].mxu1 }
 0x17a   : > { %v5988_v39 = vadd.f32 %v5987_v55, %v5986_v35  ;;  %v5995_v11 = vadd.f32 %v5994_v37, %v5993_v3  ;;  %v8828_v12 = vpack.c.bf16 %v8237_v38, %v2594_v50  ;;  %8446 = vmatmul.mubr.msk.f32.vlgmr.msra.gmra.mrb[54].mxu1 %vm496_vm0, %v9116_v13  ;;  %v6002_v14 = vsel %vm496_vm0, %v2594_v50, 0.0  ;;  %8825 = vmatprep.subr.bf16.mxu0 %v8824_v53  ;;  %v8258_v37 = vpop.f32.mrb[28].mxu0  ;;  %v9118_v55 = vld [vmem:[%s9374_s17 + $0x188] sm:$0xff]  ;;  %v9119_v3 = vld [vmem:[%s9374_s17 + $0x198] sm:$0xff] }
 0x17b   : > { %v5965_v0 = vadd.f32 %v5964_v60, %v5963_v43  ;;  %v5973_v20 = vrot.slane %v5972_v2, 1  ;;  %v6012_v15 = vsel %vm496_vm0, %v8244_v1, 0.0  ;;  %8459 = vmatprep.mubr.msk.f32.mxu1 %vm496_vm0, %v9117_v21  ;;  %v5980_v23 = vrot.slane %v5979_v6, 2  ;;  %8827 = vmatpush3.bf16.msra.mxu0 %v8824_v53  ;;  %v2837_v45 = vpop.f32.mrb[29].mxu0 }
 0x17c   : > { %v5989_v25 = vrot.slane %v5988_v39, 2  ;;  %v5996_v26 = vrot.slane %v5995_v11, 4  ;;  %v6004_v29 = vadd.f32 %v6003_v44, %v6002_v14  ;;  %8829 = vmatprep.subr.bf16.mxu1 %v8828_v12  ;;  %v6021_v36 = vsel %vm496_vm0, %v8251_v8, 0.0  ;;  %v9121_v14 = vld [vmem:[%s9374_s17 + $0x1b0] sm:$0xff] }
 0x17d   : > { %v9945_v9 = vadd.f32 %v9870_v30, %v5965_v0  ;;  %v5974_v16 = vadd.f32 %v5973_v20, %v5972_v2  ;;  %v8832_v35 = vpack.c.bf16 %v8244_v1, %v2675_v10  ;;  %8831 = vmatpush3.bf16.msra.mxu1 %v8828_v12  ;;  %v5981_v38 = vadd.f32 %v5980_v23, %v5979_v6  ;;  %v8272_v12 = vpop.f32.mrb[30].mxu0 }
 0x17e   : > { %v5990_v19 = vadd.f32 %v5989_v25, %v5988_v39  ;;  %v5997_v22 = vadd.f32 %v5996_v26, %v5995_v11  ;;  %v6005_v43 = vrot.slane %v6004_v29, 4  ;;  %v6011_v50 = vsel %vm496_vm0, %v2675_v10, 0.0  ;;  %8453 = vmatmul.mubr.msk.f32.vlgmr.msra.gmra.mrb[56].mxu0 %vm496_vm0, %v9118_v55  ;;  %v9120_v11 = vld [vmem:[%s9374_s17 + $0x1a0] sm:$0xff]  ;;  %v9122_v26 = vld [vmem:[%s9374_s17 + $0x1a8] sm:$0xff]  ;;  %v9125_v55 = vld [vmem:[%s9374_s17 + $0x1d0] sm:$0xff] }
 0x17f   : > { %v9949_v44 = vadd.f32 %v9877_v42, %v5974_v16  ;;  %v8836_v30 = vpack.c.bf16 %v8251_v8, %v2756_v34  ;;  %v6020_v48 = vsel %vm496_vm0, %v2756_v34, 0.0  ;;  %8833 = vmatprep.subr.bf16.mxu0 %v8832_v35  ;;  %v5982_v53 = vrot.slane %v5981_v38, 1  ;;  %v2918_v42 = vpop.f32.mrb[29].mxu1  ;;  %8466 = vmatprep.mubr.msk.f32.mxu0 %vm496_vm0, %v9120_v11 }
 0x180   : > { %v5991_v57 = vrot.slane %v5990_v19, 1  ;;  %v5998_v60 = vrot.slane %v5997_v22, 2  ;;  %v6006_v2 = vadd.f32 %v6005_v43, %v6004_v29  ;;  %8460 = vmatmul.mubr.msk.f32.vlgmr.msra.gmra.mrb[56].mxu1 %vm496_vm0, %v9119_v3  ;;  %8835 = vmatpush3.bf16.msra.mxu0 %v8832_v35  ;;  %v6013_v1 = vadd.f32 %v6012_v15, %v6011_v50  ;;  %v2999_v15 = vpop.f32.mrb[31].mxu0  ;;  %v9123_v35 = vld [vmem:[%s9374_s17 + $0x1c0] sm:$0xff]  ;;  %v8279_v43 = vpop.f32.mrb[30].mxu1 }
 0x181   : > { %v6022_v5 = vadd.f32 %v6021_v36, %v6020_v48  ;;  %v6030_v6 = vsel %vm496_vm0, %v8258_v37, 0.0  ;;  %v6039_v39 = vsel %vm496_vm0, %v8265_v59, 0.0  ;;  %8837 = vmatprep.subr.bf16.mxu1 %v8836_v30  ;;  %v5983_v13 = vadd.f32 %v5982_v53, %v5981_v38  ;;  %8473 = vmatprep.mubr.msk.f32.mxu1 %vm496_vm0, %v9121_v14  ;;  %v3080_v48 = vpop.f32.mrb[31].mxu1  ;;  %v9126_v14 = vld [vmem:[%s9374_s17 + $0x1c8] sm:$0xff] }
 0x182   : > { %v5992_v10 = vadd.f32 %v5991_v57, %v5990_v19  ;;  %v5999_v0 = vadd.f32 %v5998_v60, %v5997_v22  ;;  %v6007_v20 = vrot.slane %v6006_v2, 2  ;;  %8839 = vmatpush3.bf16.msra.mxu1 %v8836_v30  ;;  %v6014_v8 = vrot.slane %v6013_v1, 4 }
 0x183   : > { %v6023_v21 = vrot.slane %v6022_v5, 4  ;;  %v8840_v23 = vpack.c.bf16 %v8258_v37, %v2837_v45  ;;  %v6029_v25 = vsel %vm496_vm0, %v2837_v45, 0.0  ;;  %8467 = vmatmul.mubr.msk.f32.vlgmr.msra.gmra.mrb[58].mxu0 %vm496_vm0, %v9122_v26  ;;  %v9967_v29 = vadd.f32 %v9890_v41, %v5983_v13  ;;  %v9124_v45 = vld [vmem:[%s9374_s17 + $0x1b8] sm:$0xff]  ;;  %v9128_v26 = vld [vmem:[%s9374_s17 + $0x1e0] sm:$0xff] }
 0x184   : > { %v9970_v34 = vadd.f32 %v9895_v31, %v5992_v10  ;;  %v6000_v16 = vrot.slane %v5999_v0, 1  ;;  %v6008_v36 = vadd.f32 %v6007_v20, %v6006_v2  ;;  %8480 = vmatprep.mubr.msk.f32.mxu0 %vm496_vm0, %v9123_v35  ;;  %v6015_v38 = vadd.f32 %v6014_v8, %v6013_v1 }
 0x185   : > { %v6024_v19 = vadd.f32 %v6023_v21, %v6022_v5  ;;  %v6031_v37 = vadd.f32 %v6030_v6, %v6029_v25  ;;  %v8844_v22 = vpack.c.bf16 %v8265_v59, %v2918_v42  ;;  %8474 = vmatmul.mubr.msk.f32.vlgmr.msra.gmra.mrb[58].mxu1 %vm496_vm0, %v9124_v45  ;;  %v6038_v30 = vsel %vm496_vm0, %v2918_v42, 0.0  ;;  %8841 = vmatprep.subr.bf16.mxu0 %v8840_v23 }
 0x186   : > { %v6001_v50 = vadd.f32 %v6000_v16, %v5999_v0  ;;  %v6009_v41 = vrot.slane %v6008_v36, 1  ;;  %v6048_v31 = vsel %vm496_vm0, %v8272_v12, 0.0  ;;  %8487 = vmatprep.mubr.msk.f32.mxu1 %vm496_vm0, %v9125_v55  ;;  %v6016_v53 = vrot.slane %v6015_v38, 2  ;;  %8843 = vmatpush3.bf16.msra.mxu0 %v8840_v23  ;;  %v9127_v23 = vld [vmem:[%s9374_s17 + $0x1d8] sm:$0xff] }
 0x187   : > { %v6025_v57 = vrot.slane %v6024_v19, 2  ;;  %v6032_v60 = vrot.slane %v6031_v37, 4  ;;  %v6040_v2 = vadd.f32 %v6039_v39, %v6038_v30  ;;  %8845 = vmatprep.subr.bf16.mxu1 %v8844_v22  ;;  %v6057_v1 = vsel %vm496_vm0, %v8279_v43, 0.0 }
 0x188   : > { %v6393_v59 = vadd.f32 %v9905_v47, %v6001_v50  ;;  %v6010_v3 = vadd.f32 %v6009_v41, %v6008_v36  ;;  %v8848_v42 = vpack.c.bf16 %v8272_v12, %v2999_v15  ;;  %8847 = vmatpush3.bf16.msra.mxu1 %v8844_v22  ;;  %v6017_v5 = vadd.f32 %v6016_v53, %v6015_v38 }
 0x189   : > { %v6026_v6 = vadd.f32 %v6025_v57, %v6024_v19  ;;  %v6033_v11 = vadd.f32 %v6032_v60, %v6031_v37  ;;  %v6041_v13 = vrot.slane %v6040_v2, 4  ;;  %v6047_v0 = vsel %vm496_vm0, %v2999_v15, 0.0  ;;  %8481 = vmatmul.mubr.msk.f32.vlgmr.msra.gmra.mrb[60].mxu0 %vm496_vm0, %v9126_v14  ;;  %v9129_v19 = vld [vmem:[%s9374_s17 + $0x1f0] sm:$0xff]  ;;  %v9131_v57 = vld [vmem:[%s9374_s17 + $0x1f8] sm:$0xff] }
 0x18a   : > { %v6394_v10 = vadd.f32 %v9917_v24, %v6010_v3  ;;  %v8852_v39 = vpack.c.bf16 %v8279_v43, %v3080_v48  ;;  %v6056_v20 = vsel %vm496_vm0, %v3080_v48, 0.0  ;;  %8849 = vmatprep.subr.bf16.mxu0 %v8848_v42  ;;  %v6018_v47 = vrot.slane %v6017_v5, 1  ;;  %8494 = vmatprep.mubr.msk.f32.mxu0 %vm496_vm0, %v9128_v26  ;;  %v9130_v43 = vld [vmem:[%s9374_s17 + $0x1e8] sm:$0xff] }
 0x18b   : > { %v6027_v12 = vrot.slane %v6026_v6, 1  ;;  %v6034_v8 = vrot.slane %v6033_v11, 2  ;;  %v6042_v21 = vadd.f32 %v6041_v13, %v6040_v2  ;;  %8488 = vmatmul.mubr.msk.f32.vlgmr.msra.gmra.mrb[60].mxu1 %vm496_vm0, %v9127_v23  ;;  %8851 = vmatpush3.bf16.msra.mxu0 %v8848_v42  ;;  %v6049_v15 = vadd.f32 %v6048_v31, %v6047_v0 }
 0x18c   : > { %v6438_v24 = vsel %vm6437_vm1, %v6394_v10, %v6393_v59  ;;  %v6058_v25 = vadd.f32 %v6057_v1, %v6056_v20  ;;  %8853 = vmatprep.subr.bf16.mxu1 %v8852_v39  ;;  %v6019_v16 = vadd.f32 %v6018_v47, %v6017_v5  ;;  %8501 = vmatprep.mubr.msk.f32.mxu1 %vm496_vm0, %v9129_v19  ;;  %v9219_v45 = vmov 0.0|0.0  }
 0x18d   : > { %v6028_v36 = vadd.f32 %v6027_v12, %v6026_v6  ;;  %v6035_v35 = vadd.f32 %v6034_v8, %v6033_v11  ;;  %v6043_v38 = vrot.slane %v6042_v21, 2  ;;  %8855 = vmatpush3.bf16.msra.mxu1 %v8852_v39  ;;  %v6050_v37 = vrot.slane %v6049_v15, 4  ;;  %8856 = vmatprep.subr.bf16.mxu0 %v9219_v45 }
 0x18e   : > { %v6059_v22 = vrot.slane %v6058_v25, 4  ;;  %8495 = vmatmul.mubr.msk.f32.vlgmr.msra.gmra.mrb[62].mxu0 %vm496_vm0, %v9130_v43  ;;  %v6395_v50 = vadd.f32 %v9928_v61, %v6019_v16  ;;  %v9221_v48 = vmov 0.0   ;;  %v5627_v47 = vrot.slane %v9543_v17, 4 }
 0x18f   : > { %v6396_v41 = vadd.f32 %v9933_v62, %v6028_v36  ;;  %v6036_v30 = vrot.slane %v6035_v35, 1  ;;  %v6044_v31 = vadd.f32 %v6043_v38, %v6042_v21  ;;  %8858 = vmatpush3.bf16.msra.mxu0 %v8857_v54  ;;  %8508 = vmatprep.mubr.msk.f32.mxu0 %vm9220_vm4, %v9221_v48  ;;  %v6051_v55 = vadd.f32 %v6050_v37, %v6049_v15 }
 0x190   : > { %v6060_v53 = vadd.f32 %v6059_v22, %v6058_v25  ;;  %8502 = vmatmul.mubr.msk.f32.vlgmr.msra.gmra.mrb[62].mxu1 %vm496_vm0, %v9131_v57  ;;  %8859 = vmatprep.subr.bf16.mxu0 %v9219_v45  ;;  %v6440_v61 = vsel %vm6439_vm2, %v6395_v50, %v6438_v24  ;;  %v5690_v12 = vrot.slane %v9623_v63, 4  ;;  %v5762_v8 = vrot.slane %v9711_v49, 4 }
 0x191   : > { %v6037_v62 = vadd.f32 %v6036_v30, %v6035_v35  ;;  %v6045_v60 = vrot.slane %v6044_v31, 1  ;;  %6784 = vmatprep.mubr.f32.mxu1 %v9221_v48  ;;  %v6052_v32 = vrot.slane %v6051_v55, 2  ;;  %v6442_v54 = vsel %vm6441_vm3, %v6396_v41, %v6440_v61 }
 0x192   : > { %v6061_v33 = vrot.slane %v6060_v53, 2  ;;  %v5628_v23 = vadd.f32 %v5627_v47, %v9543_v17  ;;  %v5691_v24 = vadd.f32 %v5690_v12, %v9623_v63  ;;  %v5771_v26 = vrot.slane %v9720_v56, 4  ;;  %v6703_v47 = vld [vmem:[#allocation6 + $0x78] sm:$0xff] }
 0x193   : > { %v6397_v2 = vadd.f32 %v9945_v9, %v6037_v62  ;;  %v6046_v59 = vadd.f32 %v6045_v60, %v6044_v31  ;;  %v6053_v3 = vadd.f32 %v6052_v32, %v6051_v55  ;;  %v5763_v16 = vadd.f32 %v5762_v8, %v9711_v49  ;;  %v6794_v8 = vld [vmem:[#allocation6 + $0xf8] sm:$0xff] }
 0x194   : > { %v6062_v1 = vadd.f32 %v6061_v33, %v6060_v53  ;;  %v5629_v35 = vrot.slane %v5628_v23, 2  ;;  %v5692_v38 = vrot.slane %v5691_v24, 2  ;;  %v5772_v22 = vadd.f32 %v5771_v26, %v9720_v56  ;;  %v6706_v26 = vld [vmem:[#allocation6 + $0x90] sm:$0xff] }
 0x195   : > { %v6398_v42 = vadd.f32 %v9949_v44, %v6046_v59  ;;  %v6444_v5 = vsel %vm6443_vm5, %v6397_v2, %v6442_v54  ;;  %v6054_v6 = vrot.slane %v6053_v3, 1  ;;  %v5555_v44 = vrot.slane %v9454_v27, 4 }
 0x196   : > { %v6063_v11 = vrot.slane %v6062_v1, 1  ;;  %v5630_v17 = vadd.f32 %v5629_v35, %v5628_v23  ;;  %v5693_v50 = vadd.f32 %v5692_v38, %v5691_v24  ;;  %v6705_v24 = vld [vmem:[#allocation6 + $0x88] sm:$0xff]  ;;  %v6711_v38 = vld [vmem:[#allocation6 + $0xb8] sm:$0xff] }
 0x197   : > { %v6446_v13 = vsel %vm6445_vm6, %v6398_v42, %v6444_v5  ;;  %v6055_v10 = vadd.f32 %v6054_v6, %v6053_v3  ;;  %v5556_v21 = vadd.f32 %v5555_v44, %v9454_v27  ;;  %v5764_v27 = vrot.slane %v5763_v16, 2  ;;  %v6426_v42 = vld [vmem:[#allocation6 + $0x10] sm:$0xff]  ;;  %v6701_v44 = vld [vmem:[#allocation6 + $0x68] sm:$0xff] }
 0x198   : > { %v6064_v0 = vadd.f32 %v6063_v11, %v6062_v1  ;;  %v5631_v31 = vrot.slane %v5630_v17, 1  ;;  %v5694_v55 = vrot.slane %v5693_v50, 1  ;;  %v6531_v3 = vsel %vm6437_vm1, %v9714_v46, %v9706_v58  ;;  %v6425_v1 = vld [vmem:[#allocation6] sm:$0xff]  ;;  %v6709_v35 = vld [vmem:[#allocation6 + $0xa8] sm:$0xff] }
 0x199   : > { %v6399_v39 = vadd.f32 %v9967_v29, %v6055_v10  ;;  %v5699_v29 = vrot.slane %v9642_v18, 4  ;;  %v5557_v36 = vrot.slane %v5556_v21, 2  ;;  %v5765_v30 = vadd.f32 %v5764_v27, %v5763_v16 }
 0x19a   : > { %v6400_v20 = vadd.f32 %v9970_v34, %v6064_v0  ;;  %v5753_v34 = vrot.slane %v9695_v51, 4  ;;  %v5632_v60 = vadd.f32 %v5631_v31, %v5630_v17  ;;  %v5695_v32 = vadd.f32 %v5694_v55, %v5693_v50  ;;  %v6715_v17 = vld [vmem:[#allocation6 + $0xd8] sm:$0xff]  ;;  %v6712_v50 = vld [vmem:[#allocation6 + $0xc0] sm:$0xff] }
 0x19b   : > { %v6448_v9 = vsel %vm6447_vm7, %v6399_v39, %v6446_v13  ;;  %v5700_v15 = vadd.f32 %v5699_v29, %v9642_v18  ;;  %v5558_v43 = vadd.f32 %v5557_v36, %v5556_v21  ;;  %v5773_v18 = vrot.slane %v5772_v22, 2  ;;  %v6702_v29 = vld [vmem:[#allocation6 + $0x70] sm:$0xff] }
 0x19c   : > { %v6450_v14 = vsel %vm6449_vm8, %v6400_v20, %v6448_v9  ;;  %v5754_v25 = vadd.f32 %v5753_v34, %v9695_v51  ;;  %v5766_v61 = vrot.slane %v5765_v30, 1  ;;  %v6367_v5 = vadd.f32 %v9598_v40, %v5695_v32  ;;  %v6792_v34 = vld [vmem:[#allocation6 + $0xe8] sm:$0xff] }
 0x19d   : > { %8509 = vmatmul.mubr.msk.f32.vlgmr.msra.gmra.mrb[64].mxu0 %vm496_vm0, %v6450_v14  ;;  %v5701_v19 = vrot.slane %v5700_v15, 2  ;;  %v5559_v51 = vrot.slane %v5558_v43, 1  ;;  %v5774_v57 = vadd.f32 %v5773_v18, %v5772_v22  ;;  %v6532_v6 = vsel %vm6439_vm2, %v9726_v28, %v6531_v3  ;;  %v6611_v14 = vld [vmem:[#allocation6 + $0x50] sm:$0xff] }
 0x19e   : > { %8515 = vmatprep.mubr.msk.f32.mxu0 %vm9220_vm4, %v9221_v48  ;;  %v5755_v37 = vrot.slane %v5754_v25, 2  ;;  %v5767_v2 = vadd.f32 %v5766_v61, %v5765_v30  ;;  %v8860_v11 = vpack.c.bf16 %v6426_v42, %v6425_v1  ;;  %v6533_v20 = vsel %vm6441_vm3, %v9730_v4, %v6532_v6  ;;  %v6710_v22 = vld [vmem:[#allocation6 + $0xb0] sm:$0xff] }
 0x19f   : > { %v5702_v63 = vadd.f32 %v5701_v19, %v5700_v15  ;;  %v5560_v62 = vadd.f32 %v5559_v51, %v5558_v43  ;;  %v5775_v54 = vrot.slane %v5774_v57, 1  ;;  %v6534_v58 = vsel %vm6443_vm5, %v9735_v7, %v6533_v20  ;;  %v6700_v7 = vld [vmem:[#allocation6 + $0x60] sm:$0xff]  ;;  %v6707_v15 = vld [vmem:[#allocation6 + $0x98] sm:$0xff]  ;;  %v6713_v43 = vld [vmem:[#allocation6 + $0xc8] sm:$0xff] }
 0x1a0   : > { %v5756_v41 = vadd.f32 %v5755_v37, %v5754_v25  ;;  %v6375_v39 = vadd.f32 %v6367_v5, %v5767_v2  ;;  %8861 = vmatpush3.bf16.msra.mxu0 %v8860_v11  ;;  %v8865_v12 = vpack.c.bf16 %v6703_v47, %v6701_v44  ;;  %v8867_v21 = vpack.c.bf16 %v6702_v29, %v6700_v7  ;;  %v6704_v25 = vld [vmem:[#allocation6 + $0x80] sm:$0xff] }
 0x1a1   : > { %v5703_v53 = vrot.slane %v5702_v63, 1  ;;  %v6360_v59 = vadd.f32 %v5632_v60, %v5560_v62  ;;  %v5776_v13 = vadd.f32 %v5775_v54, %v5774_v57  ;;  %8862 = vmatprep.subr.bf16.mxu0 %v9219_v45  ;;  %v8881_v23 = vpack.c.bf16 %v6794_v8, %v6792_v34  ;;  %v6708_v37 = vld [vmem:[#allocation6 + $0xa0] sm:$0xff] }
 0x1a2   : > { %v5757_v49 = vrot.slane %v5756_v41, 1  ;;  %8866 = vmatprep.subr.bf16.mxu1 %v8865_v12  ;;  %v8869_v16 = vpack.c.bf16 %v6707_v15, %v6705_v24  ;;  %v8871_v36 = vpack.c.bf16 %v6706_v26, %v6704_v25  ;;  %v8873_v19 = vpack.c.bf16 %v6711_v38, %v6709_v35 }
 0x1a3   : > { %v5704_v33 = vadd.f32 %v5703_v53, %v5702_v63  ;;  %8868 = vmatpush1.bf16.msra.mxu1 %v8867_v21  ;;  %v8875_v27 = vpack.c.bf16 %v6710_v22, %v6708_v37  ;;  %v8877_v63 = vpack.c.bf16 %v6715_v17, %v6713_v43 }
 0x1a4   : > { %v5758_v56 = vadd.f32 %v5757_v49, %v5756_v41  ;;  %8870 = vmatprep.subr.bf16.mxu1 %v8869_v16  ;;  %v6714_v41 = vld [vmem:[#allocation6 + $0xd0] sm:$0xff] }
 0x1a5   : > { %v6368_v10 = vadd.f32 %v6360_v59, %v5704_v33  ;;  %v8879_v18 = vpack.c.bf16 %v6714_v41, %v6712_v50 }
 0x1a6   : > { %v6374_v0 = vadd.f32 %v9670_v52, %v5758_v56  ;;  %v6610_v52 = vld [vmem:[#allocation6 + $0x40] sm:$0xff] }
 0x1a7   : > { %v6376_v9 = vadd.f32 %v6368_v10, %v5776_v13  ;;  %v8863_v4 = vpack.c.bf16 %v6611_v14, %v6610_v52  ;;  %8872 = vmatpush1.bf16.msra.mxu1 %v8871_v36 }
 0x1a8   : > { %v6535_v46 = vsel %vm6445_vm6, %v6374_v0, %v6534_v58  ;;  %8874 = vmatprep.subr.bf16.mxu1 %v8873_v19 }
 0x1a9   : > { %v6536_v40 = vsel %vm6447_vm7, %v6375_v39, %v6535_v46 }
 0x1aa   : > { %v6537_v28 = vsel %vm6449_vm8, %v6376_v9, %v6536_v40 }
 0x1ab   : > { %8516 = vmatmul.mubr.msk.f32.vlgmr.msra.gmra.mrb[64].mxu0 %vm496_vm0, %v6537_v28  ;;  %8876 = vmatpush1.bf16.msra.mxu1 %v8875_v27 }
 0x1ac   : > { %8522 = vmatprep.mubr.msk.f32.mxu0 %vm9220_vm4, %v9221_v48  ;;  %8864 = vmatpush3.bf16.msra.mxu0 %v8863_v4 }
 0x1ad   : > { %8882 = vmatprep.subr.bf16.mxu0 %v8881_v23  ;;  %8878 = vmatprep.subr.bf16.mxu1 %v8877_v63 }
 0x1af   : > { %8880 = vmatpush1.bf16.msra.mxu1 %v8879_v18 }
 0x1b0   : > { %8897 = vmatprep.subr.bf16.mxu1 %v9219_v45 }
 0x214   : > { %v8286_v30 = vpop.f32.mrb[32].mxu0 }
 0x215   : > { %v6066_v51 = vsel %vm496_vm0, %v8286_v30, 0.0  ;;  %v8293_v31 = vpop.f32.mrb[32].mxu1  ;;  %v3155_v55 = vpop.f32.mrb[33].mxu0 }
 0x216   : > { %v6075_v53 = vsel %vm496_vm0, %v8293_v31, 0.0  ;;  %v6065_v49 = vsel %vm496_vm0, %v3155_v55, 0.0  ;;  %v3230_v57 = vpop.f32.mrb[33].mxu1 }
 0x217   : > { %v6067_v61 = vadd.f32 %v6066_v51, %v6065_v49  ;;  %v6074_v62 = vsel %vm496_vm0, %v3230_v57, 0.0 }
 0x218   : > { %v6076_v60 = vadd.f32 %v6075_v53, %v6074_v62 }
 0x219   : > { %v6068_v32 = vrot.slane %v6067_v61, 4  ;;  %v8300_v33 = vpop.f32.mrb[34].mxu0  ;;  %v8307_v56 = vpop.f32.mrb[34].mxu1 }
 0x21a   : > { %v6077_v54 = vrot.slane %v6076_v60, 4  ;;  %v6084_v2 = vsel %vm496_vm0, %v8300_v33, 0.0  ;;  %v6093_v59 = vsel %vm496_vm0, %v8307_v56, 0.0  ;;  %v3305_v3 = vpop.f32.mrb[35].mxu0  ;;  %v3380_v1 = vpop.f32.mrb[35].mxu1 }
 0x21b   : > { %v6069_v42 = vadd.f32 %v6068_v32, %v6067_v61  ;;  %v6083_v5 = vsel %vm496_vm0, %v3305_v3, 0.0  ;;  %v6092_v6 = vsel %vm496_vm0, %v3380_v1, 0.0 }
 0x21c   : > { %v6078_v11 = vadd.f32 %v6077_v54, %v6076_v60  ;;  %v6085_v13 = vadd.f32 %v6084_v2, %v6083_v5  ;;  %v6094_v10 = vadd.f32 %v6093_v59, %v6092_v6 }
 0x21d   : > { %v8314_v0 = vpop.f32.mrb[36].mxu0  ;;  %v6070_v40 = vrot.slane %v6069_v42, 2 }
 0x21e   : > { %v6086_v39 = vrot.slane %v6085_v13, 4  ;;  %v6095_v20 = vrot.slane %v6094_v10, 4  ;;  %v6102_v9 = vsel %vm496_vm0, %v8314_v0, 0.0  ;;  %v8321_v58 = vpop.f32.mrb[36].mxu1  ;;  %v3455_v46 = vpop.f32.mrb[37].mxu0  ;;  %v6079_v28 = vrot.slane %v6078_v11, 2 }
 0x21f   : > { %v6101_v52 = vsel %vm496_vm0, %v3455_v46, 0.0  ;;  %v3530_v14 = vpop.f32.mrb[37].mxu1  ;;  %v6111_v47 = vsel %vm496_vm0, %v8321_v58, 0.0  ;;  %v6071_v16 = vadd.f32 %v6070_v40, %v6069_v42 }
 0x220   : > { %v6087_v4 = vadd.f32 %v6086_v39, %v6085_v13  ;;  %v6096_v44 = vadd.f32 %v6095_v20, %v6094_v10  ;;  %v6103_v7 = vadd.f32 %v6102_v9, %v6101_v52  ;;  %v6110_v12 = vsel %vm496_vm0, %v3530_v14, 0.0 }
 0x221   : > { %v8328_v29 = vpop.f32.mrb[38].mxu0  ;;  %v6112_v24 = vadd.f32 %v6111_v47, %v6110_v12  ;;  %v6080_v36 = vadd.f32 %v6079_v28, %v6078_v11  ;;  %v6072_v51 = vrot.slane %v6071_v16, 1 }
 0x222   : > { %v6088_v34 = vrot.slane %v6087_v4, 2  ;;  %v6104_v8 = vrot.slane %v6103_v7, 4  ;;  %v3605_v21 = vpop.f32.mrb[39].mxu0  ;;  %v6097_v23 = vrot.slane %v6096_v44, 2  ;;  %v6120_v15 = vsel %vm496_vm0, %v8328_v29, 0.0 }
 0x223   : > { %v8335_v25 = vpop.f32.mrb[38].mxu1  ;;  %v6119_v26 = vsel %vm496_vm0, %v3605_v21, 0.0  ;;  %v6113_v19 = vrot.slane %v6112_v24, 4  ;;  %v6081_v53 = vrot.slane %v6080_v36, 1  ;;  %v6073_v59 = vadd.f32 %v6072_v51, %v6071_v16 }
 0x224   : > { %v6105_v35 = vadd.f32 %v6104_v8, %v6103_v7  ;;  %v3680_v38 = vpop.f32.mrb[39].mxu1  ;;  %v6129_v37 = vsel %vm496_vm0, %v8335_v25, 0.0  ;;  %v6121_v22 = vadd.f32 %v6120_v15, %v6119_v26  ;;  %v6089_v63 = vadd.f32 %v6088_v34, %v6087_v4 }
 0x225   : > { %v6128_v27 = vsel %vm496_vm0, %v3680_v38, 0.0  ;;  %v6098_v41 = vadd.f32 %v6097_v23, %v6096_v44  ;;  %v6114_v31 = vadd.f32 %v6113_v19, %v6112_v24  ;;  %v6082_v6 = vadd.f32 %v6081_v53, %v6080_v36 }
 0x226   : > { %v6106_v43 = vrot.slane %v6105_v35, 2  ;;  %v6130_v17 = vadd.f32 %v6129_v37, %v6128_v27  ;;  %v8342_v50 = vpop.f32.mrb[40].mxu0  ;;  %v6122_v49 = vrot.slane %v6121_v22, 4  ;;  %v6090_v56 = vrot.slane %v6089_v63, 1 }
 0x227   : > { %v6138_v18 = vsel %vm496_vm0, %v8342_v50, 0.0  ;;  %v3755_v30 = vpop.f32.mrb[41].mxu0  ;;  %v6099_v54 = vrot.slane %v6098_v41, 1  ;;  %v6115_v3 = vrot.slane %v6114_v31, 2 }
 0x228   : > { %v8349_v55 = vpop.f32.mrb[40].mxu1  ;;  %v6137_v61 = vsel %vm496_vm0, %v3755_v30, 0.0  ;;  %v6107_v60 = vadd.f32 %v6106_v43, %v6105_v35  ;;  %v6131_v1 = vrot.slane %v6130_v17, 4  ;;  %v6123_v11 = vadd.f32 %v6122_v49, %v6121_v22 }
 0x229   : > { %v6147_v57 = vsel %vm496_vm0, %v8349_v55, 0.0  ;;  %v3830_v62 = vpop.f32.mrb[41].mxu1  ;;  %v6139_v32 = vadd.f32 %v6138_v18, %v6137_v61  ;;  %v10077_v28 = vadd.f32 %v6090_v56, %v6089_v63  ;;  %v10079_v52 = vadd.f32 %v6099_v54, %v6098_v41 }
 0x22a   : > { %v6146_v33 = vsel %vm496_vm0, %v3830_v62, 0.0  ;;  %v8356_v5 = vpop.f32.mrb[42].mxu0  ;;  %v6108_v20 = vrot.slane %v6107_v60, 1  ;;  %v6116_v44 = vadd.f32 %v6115_v3, %v6114_v31  ;;  %v6132_v47 = vadd.f32 %v6131_v1, %v6130_v17 }
 0x22b   : > { %v6148_v2 = vadd.f32 %v6147_v57, %v6146_v33  ;;  %v6140_v42 = vrot.slane %v6139_v32, 4  ;;  %v6156_v10 = vsel %vm496_vm0, %v8356_v5, 0.0  ;;  %v3905_v39 = vpop.f32.mrb[43].mxu0  ;;  %v6124_v34 = vrot.slane %v6123_v11, 2 }
 0x22c   : > { %v8363_v0 = vpop.f32.mrb[42].mxu1  ;;  %v6155_v46 = vsel %vm496_vm0, %v3905_v39, 0.0  ;;  %v10082_v15 = vadd.f32 %v6108_v20, %v6107_v60  ;;  %v6133_v27 = vrot.slane %v6132_v47, 2  ;;  %v6117_v51 = vrot.slane %v6116_v44, 1 }
 0x22d   : > { %v6149_v13 = vrot.slane %v6148_v2, 4  ;;  %v6141_v9 = vadd.f32 %v6140_v42, %v6139_v32  ;;  %v6165_v58 = vsel %vm496_vm0, %v8363_v0, 0.0  ;;  %v3980_v40 = vpop.f32.mrb[43].mxu1  ;;  %v6157_v4 = vadd.f32 %v6156_v10, %v6155_v46 }
 0x22e   : > { %v6164_v12 = vsel %vm496_vm0, %v3980_v40, 0.0  ;;  %v10088_v31 = vadd.f32 %v6124_v34, %v6123_v11  ;;  %v6118_v40 = vadd.f32 %v6117_v51, %v6116_v44 }
 0x22f   : > { %v6150_v14 = vadd.f32 %v6149_v13, %v6148_v2  ;;  %v6142_v7 = vrot.slane %v6141_v9, 2  ;;  %v6158_v21 = vrot.slane %v6157_v4, 4  ;;  %v6166_v23 = vadd.f32 %v6165_v58, %v6164_v12 }
 0x230   : > { %v8370_v29 = vpop.f32.mrb[44].mxu0 }
 0x231   : > { %v6151_v8 = vrot.slane %v6150_v14, 2  ;;  %v4055_v24 = vpop.f32.mrb[45].mxu0  ;;  %v6143_v25 = vadd.f32 %v6142_v7, %v6141_v9  ;;  %v6174_v26 = vsel %vm496_vm0, %v8370_v29, 0.0  ;;  %v6159_v38 = vadd.f32 %v6158_v21, %v6157_v4 }
 0x232   : > { %v8377_v16 = vpop.f32.mrb[44].mxu1  ;;  %v6173_v36 = vsel %vm496_vm0, %v4055_v24, 0.0  ;;  %v6167_v19 = vrot.slane %v6166_v23, 4 }
 0x233   : > { %v6152_v35 = vadd.f32 %v6151_v8, %v6150_v14  ;;  %v6183_v37 = vsel %vm496_vm0, %v8377_v16, 0.0  ;;  %v4130_v22 = vpop.f32.mrb[45].mxu1  ;;  %v6144_v43 = vrot.slane %v6143_v25, 1  ;;  %v6175_v17 = vadd.f32 %v6174_v26, %v6173_v36 }
 0x234   : > { %v6182_v50 = vsel %vm496_vm0, %v4130_v22, 0.0  ;;  %v6160_v41 = vrot.slane %v6159_v38, 2  ;;  %v6168_v18 = vadd.f32 %v6167_v19, %v6166_v23  ;;  %v6134_v14 = vadd.f32 %v6133_v27, %v6132_v47 }
 0x235   : > { %v6153_v63 = vrot.slane %v6152_v35, 1  ;;  %v6184_v30 = vadd.f32 %v6183_v37, %v6182_v50  ;;  %v6145_v55 = vadd.f32 %v6144_v43, %v6143_v25  ;;  %v6176_v53 = vrot.slane %v6175_v17, 4 }
 0x236   : > { %v8384_v49 = vpop.f32.mrb[46].mxu0  ;;  %v6161_v61 = vadd.f32 %v6160_v41, %v6159_v38  ;;  %v6169_v62 = vrot.slane %v6168_v18, 2  ;;  %v6126_v27 = vrot.slane %v10088_v31, 1 }
 0x237   : > { %v6154_v57 = vadd.f32 %v6153_v63, %v6152_v35  ;;  %v6185_v60 = vrot.slane %v6184_v30, 4  ;;  %v4205_v32 = vpop.f32.mrb[47].mxu0  ;;  %v10090_v33 = vadd.f32 %v6145_v55, %v6073_v59  ;;  %v6177_v56 = vadd.f32 %v6176_v53, %v6175_v17 }
 0x238   : > { %v6192_v54 = vsel %vm496_vm0, %v8384_v49, 0.0  ;;  %v8391_v2 = vpop.f32.mrb[46].mxu1  ;;  %v6191_v3 = vsel %vm496_vm0, %v4205_v32, 0.0  ;;  %v6162_v42 = vrot.slane %v6161_v61, 1  ;;  %v6170_v5 = vadd.f32 %v6169_v62, %v6168_v18 }
 0x239   : > { %v10094_v1 = vadd.f32 %v6154_v57, %v6082_v6  ;;  %v6186_v11 = vadd.f32 %v6185_v60, %v6184_v30  ;;  %v4280_v13 = vpop.f32.mrb[47].mxu1  ;;  %v6178_v10 = vrot.slane %v6177_v56, 2  ;;  %v6201_v0 = vsel %vm496_vm0, %v8391_v2, 0.0 }
 0x23a   : > { %v6193_v39 = vadd.f32 %v6192_v54, %v6191_v3  ;;  %v6200_v20 = vsel %vm496_vm0, %v4280_v13, 0.0  ;;  %v6163_v59 = vadd.f32 %v6162_v42, %v6161_v61  ;;  %v6171_v9 = vrot.slane %v6170_v5, 1 }
 0x23b   : > { %v6187_v58 = vrot.slane %v6186_v11, 2  ;;  %v6202_v46 = vadd.f32 %v6201_v0, %v6200_v20  ;;  %v6179_v4 = vadd.f32 %v6178_v10, %v6177_v56  ;;  %v6135_v63 = vrot.slane %v6134_v14, 1 }
 0x23c   : > { %v6194_v7 = vrot.slane %v6193_v39, 4  ;;  %v8398_v6 = vpop.f32.mrb[48].mxu0  ;;  %v10099_v12 = vadd.f32 %v6163_v59, %v10077_v28  ;;  %v6172_v29 = vadd.f32 %v6171_v9, %v6170_v5  ;;  %v6127_v5 = vadd.f32 %v6126_v27, %v10088_v31 }
 0x23d   : > { %v6188_v34 = vadd.f32 %v6187_v58, %v6186_v11  ;;  %v6203_v8 = vrot.slane %v6202_v46, 4  ;;  %v4355_v21 = vpop.f32.mrb[49].mxu0  ;;  %v6180_v23 = vrot.slane %v6179_v4, 1  ;;  %v6210_v25 = vsel %vm496_vm0, %v8398_v6, 0.0 }
 0x23e   : > { %v6195_v24 = vadd.f32 %v6194_v7, %v6193_v39  ;;  %v8405_v26 = vpop.f32.mrb[48].mxu1  ;;  %v6209_v16 = vsel %vm496_vm0, %v4355_v21, 0.0  ;;  %v10104_v44 = vadd.f32 %v6172_v29, %v10079_v52  ;;  %v6136_v0 = vadd.f32 %v6135_v63, %v6134_v14 }
 0x23f   : > { %v6189_v47 = vrot.slane %v6188_v34, 1  ;;  %v6204_v36 = vadd.f32 %v6203_v8, %v6202_v46  ;;  %v6219_v35 = vsel %vm496_vm0, %v8405_v26, 0.0  ;;  %v4430_v28 = vpop.f32.mrb[49].mxu1  ;;  %v6181_v38 = vadd.f32 %v6180_v23, %v6179_v4 }
 0x240   : > { %v6196_v19 = vrot.slane %v6195_v24, 2  ;;  %v6211_v37 = vadd.f32 %v6210_v25, %v6209_v16  ;;  %v6218_v22 = vsel %vm496_vm0, %v4430_v28, 0.0  ;;  %v8412_v30 = vpop.f32.mrb[50].mxu0 }
 0x241   : > { %v6190_v43 = vadd.f32 %v6189_v47, %v6188_v34  ;;  %v6205_v17 = vrot.slane %v6204_v36, 2  ;;  %v6220_v50 = vadd.f32 %v6219_v35, %v6218_v22  ;;  %v10110_v41 = vadd.f32 %v6181_v38, %v10082_v15  ;;  %v4505_v61 = vpop.f32.mrb[51].mxu0 }
 0x242   : > { %v6197_v52 = vadd.f32 %v6196_v19, %v6195_v24  ;;  %v6212_v18 = vrot.slane %v6211_v37, 4  ;;  %v6228_v49 = vsel %vm496_vm0, %v8412_v30, 0.0  ;;  %v8419_v57 = vpop.f32.mrb[50].mxu1  ;;  %v6227_v56 = vsel %vm496_vm0, %v4505_v61, 0.0 }
 0x243   : > { %v10112_v51 = vadd.f32 %v6190_v43, %v6118_v40  ;;  %v6206_v55 = vadd.f32 %v6205_v17, %v6204_v36  ;;  %v6221_v53 = vrot.slane %v6220_v50, 4  ;;  %v6237_v32 = vsel %vm496_vm0, %v8419_v57, 0.0  ;;  %v4580_v54 = vpop.f32.mrb[51].mxu1 }
 0x244   : > { %v6198_v62 = vrot.slane %v6197_v52, 1  ;;  %v6213_v60 = vadd.f32 %v6212_v18, %v6211_v37  ;;  %v6229_v3 = vadd.f32 %v6228_v49, %v6227_v56  ;;  %v6236_v42 = vsel %vm496_vm0, %v4580_v54, 0.0 }
 0x245   : > { %v6207_v15 = vrot.slane %v6206_v55, 1  ;;  %v6222_v2 = vadd.f32 %v6221_v53, %v6220_v50  ;;  %v6238_v10 = vadd.f32 %v6237_v32, %v6236_v42 }
 0x246   : > { %v6199_v11 = vadd.f32 %v6198_v62, %v6197_v52  ;;  %v6214_v13 = vrot.slane %v6213_v60, 2  ;;  %v6230_v59 = vrot.slane %v6229_v3, 4  ;;  %v8426_v9 = vpop.f32.mrb[52].mxu0 }
 0x247   : > { %v6208_v39 = vadd.f32 %v6207_v15, %v6206_v55  ;;  %v6223_v20 = vrot.slane %v6222_v2, 2  ;;  %v6239_v40 = vrot.slane %v6238_v10, 4  ;;  %v6246_v4 = vsel %vm496_vm0, %v8426_v9, 0.0  ;;  %v8433_v7 = vpop.f32.mrb[52].mxu1  ;;  %v4655_v6 = vpop.f32.mrb[53].mxu0 }
 0x248   : > { %v10119_v58 = vadd.f32 %v6199_v11, %v6127_v5  ;;  %v6215_v46 = vadd.f32 %v6214_v13, %v6213_v60  ;;  %v6231_v31 = vadd.f32 %v6230_v59, %v6229_v3  ;;  %v6255_v8 = vsel %vm496_vm0, %v8433_v7, 0.0  ;;  %v4730_v21 = vpop.f32.mrb[53].mxu1 }
 0x249   : > { %v10122_v29 = vadd.f32 %v6208_v39, %v6136_v0  ;;  %v6224_v34 = vadd.f32 %v6223_v20, %v6222_v2  ;;  %v6240_v23 = vadd.f32 %v6239_v40, %v6238_v10  ;;  %v6245_v24 = vsel %vm496_vm0, %v4655_v6, 0.0 }
 0x24a   : > { %v6216_v14 = vrot.slane %v6215_v46, 1  ;;  %v6254_v25 = vsel %vm496_vm0, %v4730_v21, 0.0  ;;  %v6232_v16 = vrot.slane %v6231_v31, 2  ;;  %v6247_v47 = vadd.f32 %v6246_v4, %v6245_v24 }
 0x24b   : > { %v6225_v26 = vrot.slane %v6224_v34, 1  ;;  %v6256_v36 = vadd.f32 %v6255_v8, %v6254_v25  ;;  %v8440_v35 = vpop.f32.mrb[54].mxu0  ;;  %v6241_v38 = vrot.slane %v6240_v23, 2 }
 0x24c   : > { %v6217_v28 = vadd.f32 %v6216_v14, %v6215_v46  ;;  %v6264_v19 = vsel %vm496_vm0, %v8440_v35, 0.0  ;;  %v4805_v37 = vpop.f32.mrb[55].mxu0  ;;  %v6233_v27 = vadd.f32 %v6232_v16, %v6231_v31  ;;  %v6248_v43 = vrot.slane %v6247_v47, 4 }
 0x24d   : > { %v6226_v22 = vadd.f32 %v6225_v26, %v6224_v34  ;;  %v6257_v17 = vrot.slane %v6256_v36, 4  ;;  %v8447_v50 = vpop.f32.mrb[54].mxu1  ;;  %v6242_v52 = vadd.f32 %v6241_v38, %v6240_v23  ;;  %v6263_v30 = vsel %vm496_vm0, %v4805_v37, 0.0 }
 0x24e   : > { %v10129_v63 = vadd.f32 %v10090_v33, %v6217_v28  ;;  %v6273_v18 = vsel %vm496_vm0, %v8447_v50, 0.0  ;;  %v4880_v55 = vpop.f32.mrb[55].mxu1  ;;  %v6234_v49 = vrot.slane %v6233_v27, 1  ;;  %v6249_v57 = vadd.f32 %v6248_v43, %v6247_v47 }
 0x24f   : > { %v10134_v53 = vadd.f32 %v10094_v1, %v6226_v22  ;;  %v6258_v61 = vadd.f32 %v6257_v17, %v6256_v36  ;;  %v6243_v62 = vrot.slane %v6242_v52, 1  ;;  %v6265_v60 = vadd.f32 %v6264_v19, %v6263_v30 }
 0x250   : > { %v6272_v32 = vsel %vm496_vm0, %v4880_v55, 0.0  ;;  %v6235_v56 = vadd.f32 %v6234_v49, %v6233_v27  ;;  %v6250_v54 = vrot.slane %v6249_v57, 2 }
 0x251   : > { %v6259_v33 = vrot.slane %v6258_v61, 2  ;;  %v6274_v15 = vadd.f32 %v6273_v18, %v6272_v32  ;;  %v6244_v2 = vadd.f32 %v6243_v62, %v6242_v52  ;;  %v6266_v3 = vrot.slane %v6265_v60, 4  ;;  %v8454_v42 = vpop.f32.mrb[56].mxu0 }
 0x252   : > { %v10138_v5 = vadd.f32 %v10099_v12, %v6235_v56  ;;  %v6251_v11 = vadd.f32 %v6250_v54, %v6249_v57  ;;  %v4955_v0 = vpop.f32.mrb[57].mxu0  ;;  %v6282_v59 = vsel %vm496_vm0, %v8454_v42, 0.0 }
 0x253   : > { %v6260_v1 = vadd.f32 %v6259_v33, %v6258_v61  ;;  %v6275_v13 = vrot.slane %v6274_v15, 4  ;;  %v8461_v10 = vpop.f32.mrb[56].mxu1  ;;  %v10141_v39 = vadd.f32 %v10104_v44, %v6244_v2  ;;  %v6267_v20 = vadd.f32 %v6266_v3, %v6265_v60 }
 0x254   : > { %v6291_v9 = vsel %vm496_vm0, %v8461_v10, 0.0  ;;  %v5030_v46 = vpop.f32.mrb[57].mxu1  ;;  %v6252_v40 = vrot.slane %v6251_v11, 1  ;;  %v6281_v12 = vsel %vm496_vm0, %v4955_v0, 0.0 }
 0x255   : > { %v6261_v4 = vrot.slane %v6260_v1, 1  ;;  %v6276_v7 = vadd.f32 %v6275_v13, %v6274_v15  ;;  %v6268_v6 = vrot.slane %v6267_v20, 2  ;;  %v6283_v34 = vadd.f32 %v6282_v59, %v6281_v12 }
 0x256   : > { %v6290_v31 = vsel %vm496_vm0, %v5030_v46, 0.0  ;;  %v8468_v8 = vpop.f32.mrb[58].mxu0  ;;  %v6253_v21 = vadd.f32 %v6252_v40, %v6251_v11 }
 0x257   : > { %v6262_v14 = vadd.f32 %v6261_v4, %v6260_v1  ;;  %v6277_v44 = vrot.slane %v6276_v7, 2  ;;  %v6292_v23 = vadd.f32 %v6291_v9, %v6290_v31  ;;  %v5105_v24 = vpop.f32.mrb[59].mxu0  ;;  %v6269_v25 = vadd.f32 %v6268_v6, %v6267_v20 }
 0x258   : > { %v6284_v26 = vrot.slane %v6283_v34, 4  ;;  %v6300_v16 = vsel %vm496_vm0, %v8468_v8, 0.0  ;;  %v8475_v47 = vpop.f32.mrb[58].mxu1  ;;  %v6299_v36 = vsel %vm496_vm0, %v5105_v24, 0.0  ;;  %v10150_v35 = vadd.f32 %v10110_v41, %v6253_v21 }
 0x259   : > { %v10153_v28 = vadd.f32 %v10112_v51, %v6262_v14  ;;  %v6278_v38 = vadd.f32 %v6277_v44, %v6276_v7  ;;  %v6293_v19 = vrot.slane %v6292_v23, 4  ;;  %v5180_v37 = vpop.f32.mrb[59].mxu1  ;;  %v6270_v22 = vrot.slane %v6269_v25, 1 }
 0x25a   : > { %v6285_v27 = vadd.f32 %v6284_v26, %v6283_v34  ;;  %v6309_v43 = vsel %vm496_vm0, %v8475_v47, 0.0  ;;  %v6301_v17 = vadd.f32 %v6300_v16, %v6299_v36  ;;  %v6308_v18 = vsel %vm496_vm0, %v5180_v37, 0.0 }
 0x25b   : > { %v6279_v50 = vrot.slane %v6278_v38, 1  ;;  %v6294_v52 = vadd.f32 %v6293_v19, %v6292_v23  ;;  %v6271_v30 = vadd.f32 %v6270_v22, %v6269_v25  ;;  %v6310_v41 = vadd.f32 %v6309_v43, %v6308_v18 }
 0x25c   : > { %v6286_v55 = vrot.slane %v6285_v27, 2  ;;  %v6302_v49 = vrot.slane %v6301_v17, 4  ;;  %v8482_v51 = vpop.f32.mrb[60].mxu0 }
 0x25d   : > { %v6280_v57 = vadd.f32 %v6279_v50, %v6278_v38  ;;  %v6295_v61 = vrot.slane %v6294_v52, 2  ;;  %v10158_v62 = vadd.f32 %v10119_v58, %v6271_v30  ;;  %v6311_v56 = vrot.slane %v6310_v41, 4  ;;  %v5255_v33 = vpop.f32.mrb[61].mxu0 }
 0x25e   : > { %v6287_v60 = vadd.f32 %v6286_v55, %v6285_v27  ;;  %v6303_v32 = vadd.f32 %v6302_v49, %v6301_v17  ;;  %v8489_v54 = vpop.f32.mrb[60].mxu1  ;;  %v6318_v3 = vsel %vm496_vm0, %v8482_v51, 0.0  ;;  %v6317_v58 = vsel %vm496_vm0, %v5255_v33, 0.0 }
 0x25f   : > { %v10161_v15 = vadd.f32 %v10122_v29, %v6280_v57  ;;  %v6296_v2 = vadd.f32 %v6295_v61, %v6294_v52  ;;  %v6327_v42 = vsel %vm496_vm0, %v8489_v54, 0.0  ;;  %v5330_v11 = vpop.f32.mrb[61].mxu1  ;;  %v6312_v10 = vadd.f32 %v6311_v56, %v6310_v41 }
 0x260   : > { %v6288_v1 = vrot.slane %v6287_v60, 1  ;;  %v6304_v13 = vrot.slane %v6303_v32, 2  ;;  %v6319_v20 = vadd.f32 %v6318_v3, %v6317_v58  ;;  %v6326_v59 = vsel %vm496_vm0, %v5330_v11, 0.0  ;;  %v6791_v58 = vld [vmem:[#allocation6 + $0xe0] sm:$0xff] }
 0x261   : > { %v6297_v0 = vrot.slane %v6296_v2, 1  ;;  %v8496_v9 = vpop.f32.mrb[62].mxu0  ;;  %v6313_v29 = vrot.slane %v6312_v10, 2  ;;  %v6328_v4 = vadd.f32 %v6327_v42, %v6326_v59 }
 0x262   : > { %v6289_v46 = vadd.f32 %v6288_v1, %v6287_v60  ;;  %v6305_v40 = vadd.f32 %v6304_v13, %v6303_v32  ;;  %v5405_v7 = vpop.f32.mrb[63].mxu0  ;;  %v6320_v6 = vrot.slane %v6319_v20, 4  ;;  %v6336_v34 = vsel %vm496_vm0, %v8496_v9, 0.0  ;;  %v6796_v9 = vld [vmem:[#allocation6 + $0x108] sm:$0xff] }
 0x263   : > { %v6298_v12 = vadd.f32 %v6297_v0, %v6296_v2  ;;  %v8503_v31 = vpop.f32.mrb[62].mxu1  ;;  %v6335_v8 = vsel %vm496_vm0, %v5405_v7, 0.0  ;;  %v6314_v44 = vadd.f32 %v6313_v29, %v6312_v10  ;;  %v6329_v23 = vrot.slane %v6328_v4, 4  ;;  %v6793_v0 = vld [vmem:[#allocation6 + $0xf0] sm:$0xff] }
 0x264   : > { %v6417_v21 = vadd.f32 %v10129_v63, %v6289_v46  ;;  %v6306_v14 = vrot.slane %v6305_v40, 1  ;;  %v5480_v24 = vpop.f32.mrb[63].mxu1  ;;  %v6321_v26 = vadd.f32 %v6320_v6, %v6319_v20  ;;  %v6345_v16 = vsel %vm496_vm0, %v8503_v31, 0.0  ;;  %v6798_v46 = vld [vmem:[#allocation6 + $0x118] sm:$0xff]  ;;  %v6797_v7 = vld [vmem:[#allocation6 + $0x110] sm:$0xff]  ;;  %v6800_v6 = vld [vmem:[#allocation6 + $0x128] sm:$0xff] }
 0x265   : > { %v6418_v25 = vadd.f32 %v10134_v53, %v6298_v12  ;;  %v6337_v47 = vadd.f32 %v6336_v34, %v6335_v8  ;;  %v6315_v38 = vrot.slane %v6314_v44, 1  ;;  %v6330_v19 = vadd.f32 %v6329_v23, %v6328_v4  ;;  %v6802_v34 = vld [vmem:[#allocation6 + $0x138] sm:$0xff]  ;;  %v6799_v8 = vld [vmem:[#allocation6 + $0x120] sm:$0xff] }
 0x266   : > { %v6307_v36 = vadd.f32 %v6306_v14, %v6305_v40  ;;  %v6344_v37 = vsel %vm496_vm0, %v5480_v24, 0.0  ;;  %v6322_v27 = vrot.slane %v6321_v26, 2  ;;  %v8883_v29 = vpack.c.bf16 %v6793_v0, %v6791_v58  ;;  %v6806_v14 = vld [vmem:[#allocation6 + $0x158] sm:$0xff]  ;;  %v6803_v24 = vld [vmem:[#allocation6 + $0x140] sm:$0xff]  ;;  %v6905_v0 = vld [vmem:[#allocation6 + $0x2f0] sm:$0xff] }
 0x267   : > { %v6620_v22 = vsel %vm6437_vm1, %v6418_v25, %v6417_v21  ;;  %v6338_v43 = vrot.slane %v6337_v47, 4  ;;  %v6346_v63 = vadd.f32 %v6345_v16, %v6344_v37  ;;  %v6316_v50 = vadd.f32 %v6315_v38, %v6314_v44  ;;  %v6804_v21 = vld [vmem:[#allocation6 + $0x148] sm:$0xff]  ;;  %v6805_v25 = vld [vmem:[#allocation6 + $0x150] sm:$0xff]  ;;  %v6896_v16 = vld [vmem:[#allocation6 + $0x260] sm:$0xff] }
 0x268   : > { %v6419_v17 = vadd.f32 %v10138_v5, %v6307_v36  ;;  %v6331_v52 = vrot.slane %v6330_v19, 2  ;;  %v6323_v18 = vadd.f32 %v6322_v27, %v6321_v26  ;;  %v8885_v4 = vpack.c.bf16 %v6798_v46, %v6796_v9  ;;  %v6912_v38 = vld [vmem:[#allocation6 + $0x360] sm:$0xff] }
 0x269   : > { %v6339_v53 = vadd.f32 %v6338_v43, %v6337_v47  ;;  %v6347_v30 = vrot.slane %v6346_v63, 4  ;;  %v6420_v49 = vadd.f32 %v10141_v39, %v6316_v50  ;;  %v8893_v23 = vpack.c.bf16 %v6806_v14, %v6804_v21  ;;  %v6897_v47 = vld [vmem:[#allocation6 + $0x270] sm:$0xff]  ;;  %v6880_v37 = vld [vmem:[#allocation6 + $0x160] sm:$0xff] }
 0x26a   : > { %v6621_v55 = vsel %vm6439_vm2, %v6419_v17, %v6620_v22  ;;  %v6332_v41 = vadd.f32 %v6331_v52, %v6330_v19  ;;  %v6324_v57 = vrot.slane %v6323_v18, 1  ;;  %v8895_v26 = vpack.c.bf16 %v6805_v25, %v6803_v24  ;;  %v6913_v19 = vld [vmem:[#allocation6 + $0x370] sm:$0xff]  ;;  %v6898_v27 = vld [vmem:[#allocation6 + $0x280] sm:$0xff] }
 0x26b   : > { %v6340_v61 = vrot.slane %v6339_v53, 2  ;;  %v6348_v51 = vadd.f32 %v6347_v30, %v6346_v63  ;;  %v6622_v60 = vsel %vm6441_vm3, %v6420_v49, %v6621_v55  ;;  %v8909_v36 = vpack.c.bf16 %v6897_v47, %v6896_v16  ;;  %v6881_v22 = vld [vmem:[#allocation6 + $0x170] sm:$0xff]  ;;  %v6914_v17 = vld [vmem:[#allocation6 + $0x380] sm:$0xff] }
 0x26c   : > { %v6333_v32 = vrot.slane %v6332_v41, 1  ;;  %v6325_v56 = vadd.f32 %v6324_v57, %v6323_v18  ;;  %v6899_v43 = vld [vmem:[#allocation6 + $0x290] sm:$0xff]  ;;  %v8898_v63 = vpack.c.bf16 %v6913_v19, %v6912_v38  ;;  %v8911_v52 = vpack.c.bf16 %v6881_v22, %v6880_v37  ;;  %v6882_v30 = vld [vmem:[#allocation6 + $0x180] sm:$0xff] }
 0x26d   : > { %v6341_v54 = vadd.f32 %v6340_v61, %v6339_v53  ;;  %v6349_v33 = vrot.slane %v6348_v51, 2  ;;  %v6915_v50 = vld [vmem:[#allocation6 + $0x390] sm:$0xff]  ;;  %v8913_v53 = vpack.c.bf16 %v6899_v43, %v6898_v27  ;;  %v6904_v58 = vld [vmem:[#allocation6 + $0x2e0] sm:$0xff] }
 0x26e   : > { %v6334_v5 = vadd.f32 %v6333_v32, %v6332_v41  ;;  %v6421_v2 = vadd.f32 %v10150_v35, %v6325_v56  ;;  %v6883_v55 = vld [vmem:[#allocation6 + $0x190] sm:$0xff]  ;;  %v6900_v41 = vld [vmem:[#allocation6 + $0x2a0] sm:$0xff]  ;;  %v8901_v61 = vpack.c.bf16 %v6915_v50, %v6914_v17  ;;  %v8925_v9 = vpack.c.bf16 %v6905_v0, %v6904_v58 }
 0x26f   : > { %v6342_v3 = vrot.slane %v6341_v54, 1  ;;  %v6350_v42 = vadd.f32 %v6349_v33, %v6348_v51  ;;  %v6901_v57 = vld [vmem:[#allocation6 + $0x2b0] sm:$0xff]  ;;  %v6916_v51 = vld [vmem:[#allocation6 + $0x3a0] sm:$0xff]  ;;  %v8915_v32 = vpack.c.bf16 %v6883_v55, %v6882_v30 }
 0x270   : > { %v6422_v11 = vadd.f32 %v10153_v28, %v6334_v5  ;;  %v6623_v39 = vsel %vm6443_vm5, %v6421_v2, %v6622_v60  ;;  %v6795_v28 = vld [vmem:[#allocation6 + $0x100] sm:$0xff]  ;;  %v6917_v60 = vld [vmem:[#allocation6 + $0x3b0] sm:$0xff]  ;;  %v8917_v56 = vpack.c.bf16 %v6901_v57, %v6900_v41 }
 0x271   : > { %v6343_v1 = vadd.f32 %v6342_v3, %v6341_v54  ;;  %v6351_v13 = vrot.slane %v6350_v42, 1  ;;  %v8887_v31 = vpack.c.bf16 %v6797_v7, %v6795_v28  ;;  %v6884_v54 = vld [vmem:[#allocation6 + $0x1a0] sm:$0xff]  ;;  %v6885_v33 = vld [vmem:[#allocation6 + $0x1b0] sm:$0xff]  ;;  %v8904_v3 = vpack.c.bf16 %v6917_v60, %v6916_v51 }
 0x272   : > { %v6624_v10 = vsel %vm6445_vm6, %v6422_v11, %v6623_v39  ;;  %v6902_v5 = vld [vmem:[#allocation6 + $0x2c0] sm:$0xff]  ;;  %v6903_v2 = vld [vmem:[#allocation6 + $0x2d0] sm:$0xff] }
 0x273   : > { %v6423_v20 = vadd.f32 %v10158_v62, %v6343_v1  ;;  %v6352_v59 = vadd.f32 %v6351_v13, %v6350_v42  ;;  %v8889_v62 = vpack.c.bf16 %v6802_v34, %v6800_v6  ;;  %v6918_v42 = vld [vmem:[#allocation6 + $0x3c0] sm:$0xff]  ;;  %v6919_v11 = vld [vmem:[#allocation6 + $0x3d0] sm:$0xff]  ;;  %v8919_v1 = vpack.c.bf16 %v6885_v33, %v6884_v54 }
 0x274   : > { %v8921_v13 = vpack.c.bf16 %v6903_v2, %v6902_v5  ;;  %v6886_v39 = vld [vmem:[#allocation6 + $0x1c0] sm:$0xff]  ;;  %v6909_v34 = vld [vmem:[#allocation6 + $0x330] sm:$0xff] }
 0x275   : > { %v6424_v40 = vadd.f32 %v10161_v15, %v6352_v59  ;;  %v6625_v35 = vsel %vm6447_vm7, %v6423_v20, %v6624_v10  ;;  %v6801_v15 = vld [vmem:[#allocation6 + $0x130] sm:$0xff]  ;;  %v8907_v20 = vpack.c.bf16 %v6919_v11, %v6918_v42  ;;  %v6888_v46 = vld [vmem:[#allocation6 + $0x1e0] sm:$0xff] }
 0x276   : > { %v8891_v44 = vpack.c.bf16 %v6801_v15, %v6799_v8  ;;  %v6887_v10 = vld [vmem:[#allocation6 + $0x1d0] sm:$0xff]  ;;  %v6890_v7 = vld [vmem:[#allocation6 + $0x200] sm:$0xff] }
 0x277   : > { %v6626_v12 = vsel %vm6449_vm8, %v6424_v40, %v6625_v35  ;;  %v8923_v59 = vpack.c.bf16 %v6887_v10, %v6886_v39  ;;  %v6889_v40 = vld [vmem:[#allocation6 + $0x1f0] sm:$0xff]  ;;  %v6906_v35 = vld [vmem:[#allocation6 + $0x300] sm:$0xff] }
 0x278   : > { %8523 = vmatmul.mubr.msk.f32.vlgmr.msra.gmra.mrb[64].mxu0 %vm496_vm0, %v6626_v12  ;;  %v6891_v12 = vld [vmem:[#allocation6 + $0x210] sm:$0xff]  ;;  %v6908_v6 = vld [vmem:[#allocation6 + $0x320] sm:$0xff] }
 0x279   : > { %8884 = vmatpush1.bf16.msra.mxu0 %v8883_v29  ;;  %6871 = vmatprep.mubr.f32.mxu0 %v9221_v48  ;;  %v6907_v29 = vld [vmem:[#allocation6 + $0x310] sm:$0xff]  ;;  %v6892_v8 = vld [vmem:[#allocation6 + $0x220] sm:$0xff] }
 0x27a   : > { %8886 = vmatprep.subr.bf16.mxu0 %v8885_v4  ;;  %v8927_v4 = vpack.c.bf16 %v6889_v40, %v6888_v46  ;;  %v8929_v28 = vpack.c.bf16 %v6907_v29, %v6906_v35  ;;  %v6893_v15 = vld [vmem:[#allocation6 + $0x230] sm:$0xff]  ;;  %v6910_v14 = vld [vmem:[#allocation6 + $0x340] sm:$0xff] }
 0x27b   : > { %v8935_v21 = vpack.c.bf16 %v6893_v15, %v6892_v8  ;;  %v6894_v24 = vld [vmem:[#allocation6 + $0x240] sm:$0xff]  ;;  %v6895_v25 = vld [vmem:[#allocation6 + $0x250] sm:$0xff] }
 0x27c   : > { %v7067_v16 = vld [vmem:[#allocation6 + $0x3e0] sm:$0xff]  ;;  %v7068_v47 = vld [vmem:[#allocation6 + $0x3f0] sm:$0xff] }
 0x27d   : > { %8888 = vmatpush1.bf16.msra.mxu0 %v8887_v31  ;;  %v8931_v31 = vpack.c.bf16 %v6891_v12, %v6890_v7  ;;  %v8942_v38 = vpack.c.bf16 %v7068_v47, %v7067_v16  ;;  %v7070_v19 = vld [vmem:[#allocation6 + $0x410] sm:$0xff]  ;;  %v7154_v54 = vld [vmem:[#allocation6 + $0x460] sm:$0xff] }
 0x27e   : > { %8890 = vmatprep.subr.bf16.mxu0 %v8889_v62  ;;  %v8933_v62 = vpack.c.bf16 %v6909_v34, %v6908_v6  ;;  %v7072_v30 = vld [vmem:[#allocation6 + $0x430] sm:$0xff]  ;;  %v7156_v42 = vld [vmem:[#allocation6 + $0x480] sm:$0xff] }
 0x27f   : > { %v7074_v41 = vld [vmem:[#allocation6 + $0x450] sm:$0xff]  ;;  %v7160_v58 = vld [vmem:[#allocation6 + $0x4c0] sm:$0xff] }
 0x280   : > { %v7155_v33 = vld [vmem:[#allocation6 + $0x470] sm:$0xff]  ;;  %v7706_v40 = vld [vmem:[%s10260_s4 + $0x1] ss:$0 sm:$0xff] }
 0x281   : > { %8892 = vmatpush1.bf16.msra.mxu0 %v8891_v44  ;;  %v6911_v44 = vld [vmem:[#allocation6 + $0x350] sm:$0xff]  ;;  %v8954_v2 = vpack.c.bf16 %v7155_v33, %v7154_v54  ;;  %v7243_v7 = vld [vmem:[#allocation6 + $0x500] sm:$0xff] }
 0x282   : > { %8894 = vmatprep.subr.bf16.mxu0 %v8893_v23  ;;  %v8937_v23 = vpack.c.bf16 %v6911_v44, %v6910_v14  ;;  %v7157_v11 = vld [vmem:[#allocation6 + $0x490] sm:$0xff]  ;;  %v7325_v15 = vld [vmem:[#allocation6 + $0x520] sm:$0xff] }
 0x283   : > { %v7159_v39 = vld [vmem:[#allocation6 + $0x4b0] sm:$0xff] }
 0x284   : > { %v7161_v0 = vld [vmem:[#allocation6 + $0x4d0] sm:$0xff] }
 0x285   : > { %8896 = vmatpush1.bf16.msra.mxu0 %v8895_v26  ;;  %v8939_v26 = vpack.c.bf16 %v6895_v25, %v6894_v24  ;;  %v7244_v12 = vld [vmem:[#allocation6 + $0x510] sm:$0xff] }
 0x286   : > { %8910 = vmatprep.subr.bf16.mxu0 %v8909_v36  ;;  %v7069_v36 = vld [vmem:[#allocation6 + $0x400] sm:$0xff]  ;;  %v8969_v6 = vpack.c.bf16 %v7244_v12, %v7243_v7 }
 0x287   : > { %v8945_v37 = vpack.c.bf16 %v7070_v19, %v7069_v36 }
 0x34b   : > { %v6695_v18 = vpop.f32.mrb[64].mxu0 }
 0x34c   : > { %v8524_v49 = vpop.f32.mrb[65].mxu0  ;;  %7702 = vmatmul.mubr.msk.f32.vlgmr.msra.gmra.mrb[64].mxu1 %vm6716_vm9, %v6695_v18  ;;  %7703 = vmatmul.mubr.msk.f32.vlgmr.msra.gmra.mrb[66].mxu0 %vm6716_vm9, %v6695_v18 }
 0x34d   : > { %8899 = vmatpush3.bf16.msra.mxu1 %v8898_v63  ;;  %8541 = vmatprep.mubr.msk.f32.mxu1 %vm9220_vm4, %v9221_v48  ;;  %v7073_v49 = vld [vmem:[#allocation6 + $0x440] sm:$0xff] }
 0x34e   : > { %8900 = vmatprep.subr.bf16.mxu1 %v9219_v45  ;;  %8912 = vmatpush3.bf16.msra.mxu0 %v8911_v52  ;;  %v8951_v57 = vpack.c.bf16 %v7074_v41, %v7073_v49 }
 0x34f   : > { %8914 = vmatprep.subr.bf16.mxu0 %v8913_v53  ;;  %v7071_v53 = vld [vmem:[#allocation6 + $0x420] sm:$0xff] }
 0x350   : > { %v8948_v55 = vpack.c.bf16 %v7072_v30, %v7071_v53 }
 0x351   : > { %8902 = vmatpush3.bf16.msra.mxu1 %v8901_v61 }
 0x352   : > { %8903 = vmatprep.subr.bf16.mxu1 %v9219_v45  ;;  %8916 = vmatpush3.bf16.msra.mxu0 %v8915_v32  ;;  %v7705_v32 = vld [vmem:[%s10260_s4] ss:$0 sm:$0xff] }
 0x353   : > { %8918 = vmatprep.subr.bf16.mxu0 %v8917_v56 }
 0x355   : > { %8905 = vmatpush3.bf16.msra.mxu1 %v8904_v3 }
 0x356   : > { %8906 = vmatprep.subr.bf16.mxu1 %v9219_v45  ;;  %8920 = vmatpush3.bf16.msra.mxu0 %v8919_v1  ;;  %v8957_v1 = vpack.c.bf16 %v7157_v11, %v7156_v42 }
 0x357   : > { %8922 = vmatprep.subr.bf16.mxu0 %v8921_v13  ;;  %v7158_v13 = vld [vmem:[#allocation6 + $0x4a0] sm:$0xff] }
 0x358   : > { %v8960_v10 = vpack.c.bf16 %v7159_v39, %v7158_v13 }
 0x359   : > { %8908 = vmatpush3.bf16.msra.mxu1 %v8907_v20  ;;  %v8963_v20 = vpack.c.bf16 %v7161_v0, %v7160_v58 }
 0x35a   : > { %8924 = vmatpush3.bf16.msra.mxu0 %v8923_v59  ;;  %8941 = vmatprep.subr.bf16.mxu1 %v9219_v45  ;;  %v7241_v59 = vld [vmem:[#allocation6 + $0x4e0] sm:$0xff] }
 0x35b   : > { %8926 = vmatprep.subr.bf16.mxu0 %v8925_v9  ;;  %v7242_v9 = vld [vmem:[#allocation6 + $0x4f0] sm:$0xff] }
 0x35c   : > { %8542 = vmatmul.mubr.msk.f32.vlgmr.msra.gmra.mrb[66].mxu1 %vm6716_vm9, %v6695_v18  ;;  %v8966_v46 = vpack.c.bf16 %v7242_v9, %v7241_v59 }
 0x35d   : > { %8560 = vmatprep.mubr.msk.f32.mxu1 %vm9220_vm4, %v9221_v48  ;;  %8943 = vmatpush3.bf16.msra.mxu1 %v8942_v38 }
 0x35e   : > { %8928 = vmatpush3.bf16.msra.mxu0 %v8927_v4  ;;  %8944 = vmatprep.subr.bf16.mxu1 %v9219_v45 }
 0x35f   : > { %8930 = vmatprep.subr.bf16.mxu0 %v8929_v28 }
 0x361   : > { %8946 = vmatpush3.bf16.msra.mxu1 %v8945_v37 }
 0x362   : > { %8932 = vmatpush3.bf16.msra.mxu0 %v8931_v31  ;;  %8947 = vmatprep.subr.bf16.mxu1 %v9219_v45 }
 0x363   : > { %8934 = vmatprep.subr.bf16.mxu0 %v8933_v62 }
 0x365   : > { %8949 = vmatpush3.bf16.msra.mxu1 %v8948_v55 }
 0x366   : > { %8936 = vmatpush3.bf16.msra.mxu0 %v8935_v21  ;;  %8950 = vmatprep.subr.bf16.mxu1 %v9219_v45  ;;  %v7326_v21 = vld [vmem:[#allocation6 + $0x530] sm:$0xff] }
 0x367   : > { %8938 = vmatprep.subr.bf16.mxu0 %v8937_v23  ;;  %v8972_v14 = vpack.c.bf16 %v7326_v21, %v7325_v15 }
 0x369   : > { %8952 = vmatpush3.bf16.msra.mxu1 %v8951_v57 }
 0x36a   : > { %8940 = vmatpush3.bf16.msra.mxu0 %v8939_v26  ;;  %8953 = vmatprep.subr.bf16.mxu1 %v9219_v45  ;;  %v7712_v26 = vld [vmem:[%s10260_s4 + $0x4] ss:$0 sm:$0xff] }
 0x36b   : > { %8965 = vmatprep.subr.bf16.mxu0 %v9219_v45 }
 0x41f   : > { %v6786_v22 = vpop.f32.mrb[64].mxu1  ;;  %v6873_v27 = vpop.f32.mrb[66].mxu0 }
 0x420   : > { %v6878_v43 = vmul.f32 %v6873_v27, %v6786_v22  ;;  %v6788_v63 = vpop.f32.mrb[65].mxu1  ;;  %v6875_v17 = vpop.f32.mrb[67].mxu0 }
 0x421   : > { %v6879_v50 = vmul.f32 %v6875_v17, %v6788_v63  ;;  %v7411_v17 = vld [vmem:[%s361_s14] sm:$0xff] }
 0x423   : > { %7054 = vmatprep.mubr.f32.mxu0 %v6879_v50  ;;  %v7412_v50 = vsub.f32 0.0, %v7411_v17 }
 0x424   : > { %7055 = vmatmul.mubr.f32.vlgmr.msra.gmra.mrb[68].mxu0 %v6878_v43 }
 0x425   : > { %8590 = vmatprep.mubr.msk.f32.mxu0 %vm9220_vm4, %v9221_v48  ;;  %8967 = vmatpush3.bf16.msra.mxu0 %v8966_v46 }
 0x426   : > { %8968 = vmatprep.subr.bf16.mxu0 %v9219_v45 }
 0x429   : > { %8970 = vmatpush3.bf16.msra.mxu0 %v8969_v6 }
 0x42f   : > { %v6986_v52 = vpop.f32.mrb[66].mxu1 }
 0x430   : > { %v8543_v18 = vpop.f32.mrb[67].mxu1 }
 0x4f7   : > { %v8027_v61 = vpop.f32.mrb[68].mxu0 }
 0x4f8   : > { %v8028_v51 = vpop.f32.mrb[69].mxu0 }
 0x4f9   : > { %v8029_v60 = vadd.f32 %v8028_v51, %v8027_v61 }
 0x4fb   : > { %v7057_v56 = vadd.f32 %v8029_v60, %v6986_v52 }
 0x4fd   : > { %v7065_v5 = vadd.f32 %v7705_v32, %v7057_v56 }
 0x4ff   : > { %v7066_v3 = vmax.f32 %v7065_v5, 0.0 }
 0x501   : > { %8561 = vmatmul.mubr.msk.f32.vlgmr.msra.gmra.mrb[68].mxu1 %vm6716_vm9, %v7066_v3 }
 0x502   : > { %8955 = vmatpush3.bf16.msra.mxu1 %v8954_v2  ;;  %8579 = vmatprep.mubr.msk.f32.mxu1 %vm9220_vm4, %v9221_v48 }
 0x503   : > { %8956 = vmatprep.subr.bf16.mxu1 %v9219_v45 }
 0x506   : > { %8958 = vmatpush3.bf16.msra.mxu1 %v8957_v1 }
 0x507   : > { %8959 = vmatprep.subr.bf16.mxu1 %v9219_v45 }
 0x50a   : > { %8961 = vmatpush3.bf16.msra.mxu1 %v8960_v10 }
 0x50b   : > { %8962 = vmatprep.subr.bf16.mxu1 %v9219_v45 }
 0x50e   : > { %8964 = vmatpush3.bf16.msra.mxu1 %v8963_v20 }
 0x50f   : > { %8971 = vmatprep.subr.bf16.mxu1 %v9219_v45  ;;  %v7708_v45 = vld [vmem:[%s10260_s4 + $0x2] ss:$0 sm:$0xff] }
 0x5d4   : > { %v7149_v35 = vpop.f32.mrb[68].mxu1 }
 0x5d5   : > { %v7150_v29 = vadd.f32 %v7706_v40, %v7149_v35  ;;  %v8562_v4 = vpop.f32.mrb[69].mxu1 }
 0x5d7   : > { %v7153_v28 = vmax.f32 %v7150_v29, 0.0 }
 0x5d9   : > { %8580 = vmatmul.mubr.msk.f32.vlgmr.msra.gmra.mrb[70].mxu1 %vm6716_vm9, %v7153_v28 }
 0x5da   : > { %8597 = vmatprep.mubr.msk.f32.mxu1 %vm9220_vm4, %v9221_v48  ;;  %8973 = vmatpush3.bf16.msra.mxu1 %v8972_v14  ;;  %v7710_v48 = vld [vmem:[%s10260_s4 + $0x3] ss:$0 sm:$0xff] }
 0x6ac   : > { %v7236_v34 = vpop.f32.mrb[70].mxu1 }
 0x6ad   : > { %v7237_v31 = vadd.f32 %v7708_v45, %v7236_v34  ;;  %v8581_v62 = vpop.f32.mrb[71].mxu1 }
 0x6af   : > { %v7240_v8 = vmax.f32 %v7237_v31, 0.0 }
 0x6b1   : > { %8591 = vmatmul.mubr.msk.f32.vlgmr.msra.gmra.mrb[70].mxu0 %vm7250_vm10, %v7240_v8 }
 0x784   : > { %v7320_v44 = vpop.f32.mrb[70].mxu0 }
 0x785   : > { %v7321_v23 = vadd.f32 %v7710_v48, %v7320_v44  ;;  %v8592_v24 = vpop.f32.mrb[71].mxu0 }
 0x787   : > { %v7324_v25 = vmax.f32 %v7321_v23, 0.0 }
 0x789   : > { %8598 = vmatmul.mubr.msk.f32.vlgmr.msra.gmra.mrb[72].mxu1 %vm496_vm0, %v7324_v25 }
 0x85c   : > { %v7401_v16 = vpop.f32.mrb[72].mxu1 }
 0x85d   : > { %v7402_v47 = vadd.f32 %v7712_v26, %v7401_v16  ;;  %v8599_v36 = vpop.f32.mrb[73].mxu1 }
 0x85f   : > { %v7714_v38 = vmul.f32 -1.442695, %v7402_v47 }
 0x861   : > { %9058 = vpow2.f32 %v7714_v38 }
 0x86b   : > { %v9059_v19 = vpop.eup %9058 }
 0x86c   : > { %v7408_v37 = vadd.f32 1.0, %v9059_v19 }
 0x86e   : > { %9060 = vrcp.f32 %v7408_v37 }
 0x878   : > { %v9061_v22 = vpop.eup %9060 }
 0x879   : > { %9062 = vlog2.f32 %v9061_v22 }
 0x87a   : > { %9064 = vrcp.f32 %v7411_v17 }
 0x883   : > { %v9063_v27 = vpop.eup %9062 }
 0x884   : > { %v7414_v43 = vmul.f32 0.6931472, %v9063_v27  ;;  %v9065_v53 = vpop.eup %9064 }
 0x886   : > { %v7416_v63 = vsel %vm7415_vm11, %v7414_v43, 0.0 }
 0x887   : > { %7417 = vadd.xlane.f32.xlu0 %v7416_v63 }
 0x914   : > { %v7418_v52 = vpop.xlane.xlu0 %7417 }
 0x915   : > { %v7419_v18 = vmul.f32 %v7418_v52, %v7412_v50 }
 0x917   : > { %v7420_v30 = vsub.f32 0.0, %v7419_v18  ;;  %7426 = vrot.lane.b32.xlu0 %v7419_v18, %s9222_s15 }
 0x919   : > { %v7422_v55 = vmul.f32 %v9065_v53, %v7420_v30 }
 0x91b   : > { %v7423_v49 = vmul.f32 1.442695, %v7422_v55 }
 0x91d   : > { %9066 = vpow2.f32 %v7423_v49 }
 0x927   : > { %v9067_v41 = vpop.eup %9066 }
 0x928   : > { %7430 = vrot.lane.b32.xlu1 %v9067_v41, %s9223_s16 }
 0x989   : > { %v7427_v57 = vpop.permute.xlu0 %7426 }
 0x98a   : > { %v7433_v61 = vsel %vm7415_vm11, %v9061_v22, %v7427_v57 }
 0x99a   : > { %v7431_v51 = vpop.permute.xlu1 %7430 }
 0x99b   : > { %v7435_v60 = vsel %vm7434_vm12, %v7433_v61, %v7431_v51 }
 0x99c   : > { %v7437_v32 = vsel %vm7436_vm13, %v7435_v60, 0.0 }
 0x99d   : > { %7439 = vst.msk [vmem:[%s367_s27] sm:$0xff] %vm7438_vm14, %v7437_v32 }
 0x99e PF: > { %p18_p0 = scmp.ge.s32.totalorder %s9276_s23, 4   ;;  %s10275_s18 = smov %s9194_s19 }
 0x99f   : > { %s10276_s19 = smov %s9198_s20  ;;  %s10277_s20 = smov %s9286_s26 }
 0x9a0   : > { %s10278_s21 = smov %s9276_s23  ;;  %20 = sbr.rel (!%p18_p0) target bundleno = 5 (0x5), region = 110 }
 0x9a7   :  { %7459 = vsyncpa [#allocation3], 1 }
 0x9a8   :  { %7461 = vsyncpa [#allocation3 + $0x1], 1 }
 0x9a9   :  { %7462 = vsyncpa [#allocation5], 1 }
 0x9aa   :  { %7464 = vsyncpa [#allocation5 + $0x1], 1 }

</bundles_post_ra>
